<compile_context>
chip_gen: v6e
topology: v6e:2x2x1
jax: 0.10.0
libtpu: 0.0.40
codegen_flags: <defaults>
</compile_context>

<pallas_src>
import functools

import jax
import jax.numpy as jnp
from jax.experimental import pallas as pl
from jax.experimental.pallas import tpu as pltpu

# Keep matmul operands in f32 for numerical fidelity with the PyTorch module.
# (On v6e/v7x, casting operands to bf16 here is the main extra MXU lever.)
_VMEM_LIMIT_BYTES = 64 * 1024 * 1024


# ------------------------------ tile helpers -------------------------------

def _pick_tile(dim, cap, align):
    """Largest `align`-aligned tile <= cap that exactly divides dim.

    Falls back to the full dimension (always a legal block shape)."""
    if dim <= cap:
        return dim
    for t in range(cap - cap % align, 0, -align):
        if dim % t == 0:
            return t
    return dim


def _pick_seq_tile(dim, cap=128):
    if dim <= cap:
        return dim
    for t in range(cap - cap % 8, 0, -8):
        if dim % t == 0:
            return t
    return dim


# -------------------------- fused linear kernel -----------------------------
# y = x @ w + b  [+ relu]  [+ residual]  [-> LayerNorm(gamma, beta)]

def _linear_kernel(*refs, activation, add_residual, layernorm, eps):
    x_ref, w_ref, b_ref = refs[0], refs[1], refs[2]
    idx = 3
    res_ref = g_ref = beta_ref = None
    if add_residual:
        res_ref = refs[idx]; idx += 1
    if layernorm:
        g_ref, beta_ref = refs[idx], refs[idx + 1]; idx += 2
    o_ref, acc_ref = refs[idx], refs[idx + 1]

    k = pl.program_id(2)

    @pl.when(k == 0)
    def _():
        acc_ref[...] = jnp.zeros_like(acc_ref)

    acc_ref[...] += jnp.dot(x_ref[...], w_ref[...],
                            preferred_element_type=jnp.float32)

    @pl.when(k == pl.num_programs(2) - 1)
    def _():
        y = acc_ref[...] + b_ref[...]
        if activation == "relu":
            y = jnp.maximum(y, 0.0)
        if add_residual:
            y = y + res_ref[...]
        if layernorm:
            mu = jnp.mean(y, axis=-1, keepdims=True)
            var = jnp.mean(jnp.square(y - mu), axis=-1, keepdims=True)
            y = (y - mu) * jax.lax.rsqrt(var + eps)
            y = y * g_ref[...] + beta_ref[...]
        o_ref[...] = y.astype(o_ref.dtype)


def fused_linear(x, w, b, *, residual=None, ln_gamma=None, ln_beta=None,
                 activation=None, eps=1e-5):
    """Tiled, pipelined y = x @ w + b with optional fused relu / residual / LN."""
    lead = x.shape[:-1]
    K = x.shape[-1]
    N = w.shape[1]
    x2 = x.reshape(-1, K)
    M = x2.shape[0]
    add_residual = residual is not None
    layernorm = ln_gamma is not None

    tm = _pick_tile(M, 256, 8)
    # LayerNorm needs the full row resident in one block.
    tn = N if layernorm else _pick_tile(N, 512, 128)
    tk = _pick_tile(K, 512, 128)

    in_specs = [
        pl.BlockSpec((tm, tk), lambda i, j, k: (i, k)),
        pl.BlockSpec((tk, tn), lambda i, j, k: (k, j)),
        pl.BlockSpec((1, tn), lambda i, j, k: (0, j)),
    ]
    inputs = [x2, w, b.reshape(1, N)]
    if add_residual:
        in_specs.append(pl.BlockSpec((tm, tn), lambda i, j, k: (i, j)))
        inputs.append(residual.reshape(-1, N))
    if layernorm:
        in_specs.append(pl.BlockSpec((1, tn), lambda i, j, k: (0, j)))
        in_specs.append(pl.BlockSpec((1, tn), lambda i, j, k: (0, j)))
        inputs.extend([ln_gamma.reshape(1, N), ln_beta.reshape(1, N)])

    out = pl.pallas_call(
        functools.partial(_linear_kernel, activation=activation,
                          add_residual=add_residual, layernorm=layernorm,
                          eps=eps),
        out_shape=jax.ShapeDtypeStruct((M, N), jnp.float32),
        grid=(M // tm, N // tn, K // tk),
        in_specs=in_specs,
        out_specs=pl.BlockSpec((tm, tn), lambda i, j, k: (i, j)),
        scratch_shapes=[pltpu.VMEM((tm, tn), jnp.float32)],
        compiler_params=pltpu.CompilerParams(
            dimension_semantics=("parallel", "parallel", "arbitrary"),
            vmem_limit_bytes=_VMEM_LIMIT_BYTES),
    )(*inputs)
    return out.reshape(*lead, N)


# ----------------------------- attention kernel ------------------------------
# qkv block: (ts, T, 3H) — ts attention-batches (S axis), T = attended length
# (= B, batch_first=False semantics), all heads processed in one grid step.

def _attn_kernel(qkv_ref, o_ref, *, num_heads, head_dim, scale):
    H = num_heads * head_dim
    qkv = qkv_ref[...]                                     # (ts, T, 3H) f32
    for h in range(num_heads):                             # static unroll
        lo = h * head_dim
        q = qkv[:, :, lo:lo + head_dim] * scale            # fold 1/sqrt(hd) into q
        k = qkv[:, :, H + lo:H + lo + head_dim]
        v = qkv[:, :, 2 * H + lo:2 * H + lo + head_dim]
        # leading-batch contraction on the last dim (no K transpose)
        s = jnp.einsum("sqd,skd->sqk", q, k,
                       preferred_element_type=jnp.float32)  # (ts, T, T)
        m = jnp.max(s, axis=-1, keepdims=True)
        p = jnp.exp(s - m)
        denom = jnp.sum(p, axis=-1, keepdims=True)
        p = p * pl.reciprocal(denom, approx=True)
        o = jnp.einsum("sqk,skd->sqd", p, v,
                       preferred_element_type=jnp.float32)  # (ts, T, hd)
        o_ref[:, :, lo:lo + head_dim] = o.astype(o_ref.dtype)


def mha_attention(qkv, num_heads):
    """qkv: (S, T, 3H) in (seq-batch, attended, feature) order -> (S, T, H)."""
    S, T, H3 = qkv.shape
    H = H3 // 3
    hd = H // num_heads
    ts = _pick_seq_tile(S)
    return pl.pallas_call(
        functools.partial(_attn_kernel, num_heads=num_heads, head_dim=hd,
                          scale=1.0 / float(hd) ** 0.5),
        out_shape=jax.ShapeDtypeStruct((S, T, H), jnp.float32),
        grid=(S // ts,),
        in_specs=[pl.BlockSpec((ts, T, H3), lambda i: (i, 0, 0))],
        out_specs=pl.BlockSpec((ts, T, H), lambda i: (i, 0, 0)),
        compiler_params=pltpu.CompilerParams(
            dimension_semantics=("parallel",),
            vmem_limit_bytes=_VMEM_LIMIT_BYTES),
    )(qkv)


# ------------------------------ pred head kernel -----------------------------
# Fuses pred_head1 (H->128) and pred_head2 (128->2); output padded to 128
# lanes for a dense store, sliced in the wrapper.

def _pred_head_kernel(x_ref, w1_ref, b1_ref, w2_ref, b2_ref, o_ref):
    h = jnp.dot(x_ref[...], w1_ref[...],
                preferred_element_type=jnp.float32) + b1_ref[...]
    y = jnp.dot(h, w2_ref[...],
                preferred_element_type=jnp.float32) + b2_ref[...]
    o_ref[...] = y.astype(o_ref.dtype)


def pred_head(cls, w1, b1, w2, b2):
    B, H = cls.shape
    mid = w1.shape[1]
    n_out = w2.shape[1]
    n_pad = ((n_out + 127) // 128) * 128
    w2p = jnp.pad(w2, ((0, 0), (0, n_pad - n_out)))
    b2p = jnp.pad(b2, (0, n_pad - n_out)).reshape(1, n_pad)
    out = pl.pallas_call(
        _pred_head_kernel,
        out_shape=jax.ShapeDtypeStruct((B, n_pad), jnp.float32),
        grid=(1,),
        in_specs=[
            pl.BlockSpec((B, H), lambda i: (0, 0)),
            pl.BlockSpec((H, mid), lambda i: (0, 0)),
            pl.BlockSpec((1, mid), lambda i: (0, 0)),
            pl.BlockSpec((mid, n_pad), lambda i: (0, 0)),
            pl.BlockSpec((1, n_pad), lambda i: (0, 0)),
        ],
        out_specs=pl.BlockSpec((B, n_pad), lambda i: (0, 0)),
    )(cls, w1, b1.reshape(1, mid), w2p, b2p)
    return out[:, :n_out]


# ------------------------------- parameters --------------------------------

def init_params(key, input_size, hidden_size, num_layers, num_heads):
    del num_heads  # head count only affects reshape, not parameter shapes
    ks = jax.random.split(key, 6 + num_layers)

    def w(k, shape, scale=0.02):
        return (scale * jax.random.normal(k, shape)).astype(jnp.float32)

    params = {
        "emb_w": w(ks[0], (input_size, hidden_size)),
        "emb_b": jnp.zeros((hidden_size,), jnp.float32),
        "pos_table": w(ks[1], (1250, hidden_size)),          # nn.Embedding(1250, H)
        "mlm_w": w(ks[2], (hidden_size, input_size)),
        "mlm_b": jnp.zeros((input_size,), jnp.float32),
        "p1_w": w(ks[3], (hidden_size, 128)),
        "p1_b": jnp.zeros((128,), jnp.float32),
        "p2_w": w(ks[4], (128, 2)),
        "p2_b": jnp.zeros((2,), jnp.float32),
        "layers": [],
    }
    for li in range(num_layers):
        lk = jax.random.split(ks[5 + li], 4)
        params["layers"].append({
            "in_proj_w": w(lk[0], (hidden_size, 3 * hidden_size)),
            "in_proj_b": jnp.zeros((3 * hidden_size,), jnp.float32),
            "out_proj_w": w(lk[1], (hidden_size, hidden_size)),
            "out_proj_b": jnp.zeros((hidden_size,), jnp.float32),
            "ffn1_w": w(lk[2], (hidden_size, 4 * hidden_size)),
            "ffn1_b": jnp.zeros((4 * hidden_size,), jnp.float32),
            "ffn2_w": w(lk[3], (4 * hidden_size, hidden_size)),
            "ffn2_b": jnp.zeros((hidden_size,), jnp.float32),
            "ln1_g": jnp.ones((hidden_size,), jnp.float32),
            "ln1_b": jnp.zeros((hidden_size,), jnp.float32),
            "ln2_g": jnp.ones((hidden_size,), jnp.float32),
            "ln2_b": jnp.zeros((hidden_size,), jnp.float32),
        })
    return params


# --------------------------------- forward ---------------------------------

def transformer_encoder_forward(params, x, num_heads):
    B, S, _ = x.shape
    H = params["emb_w"].shape[1]

    # Work in the (S, B, ·) row order nn.TransformerEncoder(batch_first=False)
    # uses internally: one tiny input transpose here, none per layer.
    x_sb = jnp.transpose(x, (1, 0, 2)).reshape(S * B, -1)

    pos = params["pos_table"][:S]                                   # (S, H)
    pos_sb = jnp.broadcast_to(pos[:, None, :], (S, B, H)).reshape(S * B, H)

    # embedding linear fused with the positional-embedding add
    h = fused_linear(x_sb, params["emb_w"], params["emb_b"], residual=pos_sb)

    for lp in params["layers"]:
        # --- self-attention block (MultiheadAttention, batch_first=False) ---
        qkv = fused_linear(h, lp["in_proj_w"], lp["in_proj_b"])     # (S*B, 3H)
        o = mha_attention(qkv.reshape(S, B, 3 * H), num_heads)      # (S, B, H)
        # out_proj fused with residual add + LayerNorm1 (post-LN)
        h = fused_linear(o.reshape(S * B, H), lp["out_proj_w"], lp["out_proj_b"],
                         residual=h, ln_gamma=lp["ln1_g"], ln_beta=lp["ln1_b"])
        # --- feed-forward block (ReLU), ffn2 fused with residual + LN2 ---
        f = fused_linear(h, lp["ffn1_w"], lp["ffn1_b"], activation="relu")
        h = fused_linear(f, lp["ffn2_w"], lp["ffn2_b"],
                         residual=h, ln_gamma=lp["ln2_g"], ln_beta=lp["ln2_b"])

    mlm = fused_linear(h, params["mlm_w"], params["mlm_b"])         # (S*B, input)
    mlm_logits = jnp.transpose(mlm.reshape(S, B, -1), (1, 0, 2))    # (B, S, input)

    cls = h[:B]                                      # rows with s == 0 -> (B, H)
    pred = pred_head(cls, params["p1_w"], params["p1_b"],
                     params["p2_w"], params["p2_b"])                # (B, 2)
    return mlm_logits, pred


# ----------------------------------- main -----------------------------------

if __name__ == "__main__":
    input_size, hidden_size, num_layers, num_heads = 16, 32, 2, 4
    B, S = 2, 8

    key = jax.random.PRNGKey(0)
    pkey, xkey = jax.random.split(key)
    params = init_params(pkey, input_size, hidden_size, num_layers, num_heads)
    x = jax.random.normal(xkey, (B, S, input_size), dtype=jnp.float32)

    fwd = jax.jit(functools.partial(transformer_encoder_forward,
                                    num_heads=num_heads))
    mlm_logits, pred = fwd(params, x)
    jax.block_until_ready((mlm_logits, pred))

    assert mlm_logits.shape == (B, S, input_size), mlm_logits.shape
    assert pred.shape == (B, 2), pred.shape
    print("KERNEL_OK")
</pallas_src>

<mosaic_0001>
module attributes {stable_mosaic.version = 11 : i64} {
  func.func @_linear_kernel(%arg0: i32, %arg1: i32, %arg2: i32, %arg3: memref<16x16xf32, #tpu.memory_space<vmem>>, %arg4: memref<16x32xf32, #tpu.memory_space<vmem>>, %arg5: memref<1x32xf32, #tpu.memory_space<vmem>>, %arg6: memref<16x32xf32, #tpu.memory_space<vmem>>, %arg7: memref<16x32xf32, #tpu.memory_space<vmem>>, %arg8: memref<16x32xf32, #tpu.memory_space<vmem>>) attributes {dimension_semantics = [#tpu.dimension_semantics<parallel>, #tpu.dimension_semantics<parallel>, #tpu.dimension_semantics<arbitrary>], iteration_bounds = array<i64: 1, 1, 1>, scalar_prefetch = 0 : i64, scratch_operands = 1 : i64, tpu.core_type = #tpu.core_type<tc>, window_params = [{transform_indices = @transform_0, window_bounds = array<i64: 16, 16>}, {transform_indices = @transform_1, window_bounds = array<i64: 16, 32>}, {transform_indices = @transform_2, window_bounds = array<i64: 1, 32>}, {transform_indices = @transform_3, window_bounds = array<i64: 16, 32>}, {transform_indices = @transform_4, window_bounds = array<i64: 16, 32>}]} {
    %c0_i32 = arith.constant 0 : i32
    %0 = arith.cmpi eq, %arg2, %c0_i32 : i32
    %1 = arith.extui %0 : i1 to i32
    %c0_i32_0 = arith.constant 0 : i32
    %2 = arith.cmpi ne, %1, %c0_i32_0 : i32
    scf.if %2 {
      %cst_10 = arith.constant 0.000000e+00 : f32
      %12 = vector.broadcast %cst_10 : f32 to vector<16x32xf32>
      %c0_11 = arith.constant 0 : index
      %c0_12 = arith.constant 0 : index
      %13 = vector.load %arg8[%c0_11, %c0_12] : memref<16x32xf32, #tpu.memory_space<vmem>>, vector<16x32xf32>
      tpu.vector_store %arg8[%c0_11, %c0_12], %12 {strides = array<i32>} : memref<16x32xf32, #tpu.memory_space<vmem>>, vector<16x32xf32>,
    } else {
    }
    %c0 = arith.constant 0 : index
    %c0_1 = arith.constant 0 : index
    %3 = vector.load %arg8[%c0, %c0_1] : memref<16x32xf32, #tpu.memory_space<vmem>>, vector<16x32xf32>
    %c0_2 = arith.constant 0 : index
    %c0_3 = arith.constant 0 : index
    %4 = vector.load %arg3[%c0_2, %c0_3] : memref<16x16xf32, #tpu.memory_space<vmem>>, vector<16x16xf32>
    %c0_4 = arith.constant 0 : index
    %c0_5 = arith.constant 0 : index
    %5 = vector.load %arg4[%c0_4, %c0_5] : memref<16x32xf32, #tpu.memory_space<vmem>>, vector<16x32xf32>
    %cst = arith.constant dense<0.000000e+00> : vector<16x32xf32>
    %6 = tpu.matmul %4, %5, %cst {dimension_numbers = #tpu.dot_dimension_numbers<[1], [0], [0], [1], [0, 0, 1, 1], [], []>} : vector<16x16xf32>, vector<16x32xf32>, vector<16x32xf32> -> vector<16x32xf32>
    %7 = arith.addf %3, %6 : vector<16x32xf32>
    %c0_6 = arith.constant 0 : index
    %c0_7 = arith.constant 0 : index
    %8 = vector.load %arg8[%c0_6, %c0_7] : memref<16x32xf32, #tpu.memory_space<vmem>>, vector<16x32xf32>
    tpu.vector_store %arg8[%c0_6, %c0_7], %7 {strides = array<i32>} : memref<16x32xf32, #tpu.memory_space<vmem>>, vector<16x32xf32>,
    %c0_i32_8 = arith.constant 0 : i32
    %9 = arith.cmpi eq, %arg2, %c0_i32_8 : i32
    %10 = arith.extui %9 : i1 to i32
    %c0_i32_9 = arith.constant 0 : i32
    %11 = arith.cmpi ne, %10, %c0_i32_9 : i32
    scf.if %11 {
      %c0_10 = arith.constant 0 : index
      %c0_11 = arith.constant 0 : index
      %12 = vector.load %arg8[%c0_10, %c0_11] : memref<16x32xf32, #tpu.memory_space<vmem>>, vector<16x32xf32>
      %c0_12 = arith.constant 0 : index
      %c0_13 = arith.constant 0 : index
      %13 = vector.load %arg5[%c0_12, %c0_13] : memref<1x32xf32, #tpu.memory_space<vmem>>, vector<1x32xf32>
      %14 = vector.broadcast %13 : vector<1x32xf32> to vector<16x32xf32>
      %15 = arith.addf %12, %14 : vector<16x32xf32>
      %c0_14 = arith.constant 0 : index
      %c0_15 = arith.constant 0 : index
      %16 = vector.load %arg6[%c0_14, %c0_15] : memref<16x32xf32, #tpu.memory_space<vmem>>, vector<16x32xf32>
      %17 = arith.addf %15, %16 : vector<16x32xf32>
      %c0_16 = arith.constant 0 : index
      %c0_17 = arith.constant 0 : index
      %18 = vector.load %arg7[%c0_16, %c0_17] : memref<16x32xf32, #tpu.memory_space<vmem>>, vector<16x32xf32>
      tpu.vector_store %arg7[%c0_16, %c0_17], %17 {strides = array<i32>} : memref<16x32xf32, #tpu.memory_space<vmem>>, vector<16x32xf32>,
    } else {
    }
    return
  }
  func.func @transform_0(%arg0: i32, %arg1: i32, %arg2: i32) -> (i32, i32) {
    %c0_i32 = arith.constant 0 : i32
    return %arg0, %arg2 : i32, i32
  }
  func.func @transform_1(%arg0: i32, %arg1: i32, %arg2: i32) -> (i32, i32) {
    %c0_i32 = arith.constant 0 : i32
    return %arg2, %arg1 : i32, i32
  }
  func.func @transform_2(%arg0: i32, %arg1: i32, %arg2: i32) -> (i32, i32) {
    %c0_i32 = arith.constant 0 : i32
    %c0_i32_0 = arith.constant 0 : i32
    return %c0_i32, %arg1 : i32, i32
  }
  func.func @transform_3(%arg0: i32, %arg1: i32, %arg2: i32) -> (i32, i32) {
    %c0_i32 = arith.constant 0 : i32
    return %arg0, %arg1 : i32, i32
  }
  func.func @transform_4(%arg0: i32, %arg1: i32, %arg2: i32) -> (i32, i32) {
    %c0_i32 = arith.constant 0 : i32
    return %arg0, %arg1 : i32, i32
  }
}

module attributes {stable_mosaic.version = 11 : i64} {
  func.func @_linear_kernel(%arg0: i32, %arg1: i32, %arg2: i32, %arg3: memref<16x32xf32, #tpu.memory_space<vmem>>, %arg4: memref<32x96xf32, #tpu.memory_space<vmem>>, %arg5: memref<1x96xf32, #tpu.memory_space<vmem>>, %arg6: memref<16x96xf32, #tpu.memory_space<vmem>>, %arg7: memref<16x96xf32, #tpu.memory_space<vmem>>) attributes {dimension_semantics = [#tpu.dimension_semantics<parallel>, #tpu.dimension_semantics<parallel>, #tpu.dimension_semantics<arbitrary>], iteration_bounds = array<i64: 1, 1, 1>, scalar_prefetch = 0 : i64, scratch_operands = 1 : i64, tpu.core_type = #tpu.core_type<tc>, window_params = [{transform_indices = @transform_0, window_bounds = array<i64: 16, 32>}, {transform_indices = @transform_1, window_bounds = array<i64: 32, 96>}, {transform_indices = @transform_2, window_bounds = array<i64: 1, 96>}, {transform_indices = @transform_3, window_bounds = array<i64: 16, 96>}]} {
    %c0_i32 = arith.constant 0 : i32
    %0 = arith.cmpi eq, %arg2, %c0_i32 : i32
    %1 = arith.extui %0 : i1 to i32
    %c0_i32_0 = arith.constant 0 : i32
    %2 = arith.cmpi ne, %1, %c0_i32_0 : i32
    scf.if %2 {
      %cst_10 = arith.constant 0.000000e+00 : f32
      %12 = vector.broadcast %cst_10 : f32 to vector<16x96xf32>
      %c0_11 = arith.constant 0 : index
      %c0_12 = arith.constant 0 : index
      %13 = vector.load %arg7[%c0_11, %c0_12] : memref<16x96xf32, #tpu.memory_space<vmem>>, vector<16x96xf32>
      tpu.vector_store %arg7[%c0_11, %c0_12], %12 {strides = array<i32>} : memref<16x96xf32, #tpu.memory_space<vmem>>, vector<16x96xf32>,
    } else {
    }
    %c0 = arith.constant 0 : index
    %c0_1 = arith.constant 0 : index
    %3 = vector.load %arg7[%c0, %c0_1] : memref<16x96xf32, #tpu.memory_space<vmem>>, vector<16x96xf32>
    %c0_2 = arith.constant 0 : index
    %c0_3 = arith.constant 0 : index
    %4 = vector.load %arg3[%c0_2, %c0_3] : memref<16x32xf32, #tpu.memory_space<vmem>>, vector<16x32xf32>
    %c0_4 = arith.constant 0 : index
    %c0_5 = arith.constant 0 : index
    %5 = vector.load %arg4[%c0_4, %c0_5] : memref<32x96xf32, #tpu.memory_space<vmem>>, vector<32x96xf32>
    %cst = arith.constant dense<0.000000e+00> : vector<16x96xf32>
    %6 = tpu.matmul %4, %5, %cst {dimension_numbers = #tpu.dot_dimension_numbers<[1], [0], [0], [1], [0, 0, 1, 1], [], []>} : vector<16x32xf32>, vector<32x96xf32>, vector<16x96xf32> -> vector<16x96xf32>
    %7 = arith.addf %3, %6 : vector<16x96xf32>
    %c0_6 = arith.constant 0 : index
    %c0_7 = arith.constant 0 : index
    %8 = vector.load %arg7[%c0_6, %c0_7] : memref<16x96xf32, #tpu.memory_space<vmem>>, vector<16x96xf32>
    tpu.vector_store %arg7[%c0_6, %c0_7], %7 {strides = array<i32>} : memref<16x96xf32, #tpu.memory_space<vmem>>, vector<16x96xf32>,
    %c0_i32_8 = arith.constant 0 : i32
    %9 = arith.cmpi eq, %arg2, %c0_i32_8 : i32
    %10 = arith.extui %9 : i1 to i32
    %c0_i32_9 = arith.constant 0 : i32
    %11 = arith.cmpi ne, %10, %c0_i32_9 : i32
    scf.if %11 {
      %c0_10 = arith.constant 0 : index
      %c0_11 = arith.constant 0 : index
      %12 = vector.load %arg7[%c0_10, %c0_11] : memref<16x96xf32, #tpu.memory_space<vmem>>, vector<16x96xf32>
      %c0_12 = arith.constant 0 : index
      %c0_13 = arith.constant 0 : index
      %13 = vector.load %arg5[%c0_12, %c0_13] : memref<1x96xf32, #tpu.memory_space<vmem>>, vector<1x96xf32>
      %14 = vector.broadcast %13 : vector<1x96xf32> to vector<16x96xf32>
      %15 = arith.addf %12, %14 : vector<16x96xf32>
      %c0_14 = arith.constant 0 : index
      %c0_15 = arith.constant 0 : index
      %16 = vector.load %arg6[%c0_14, %c0_15] : memref<16x96xf32, #tpu.memory_space<vmem>>, vector<16x96xf32>
      tpu.vector_store %arg6[%c0_14, %c0_15], %15 {strides = array<i32>} : memref<16x96xf32, #tpu.memory_space<vmem>>, vector<16x96xf32>,
    } else {
    }
    return
  }
  func.func @transform_0(%arg0: i32, %arg1: i32, %arg2: i32) -> (i32, i32) {
    %c0_i32 = arith.constant 0 : i32
    return %arg0, %arg2 : i32, i32
  }
  func.func @transform_1(%arg0: i32, %arg1: i32, %arg2: i32) -> (i32, i32) {
    %c0_i32 = arith.constant 0 : i32
    return %arg2, %arg1 : i32, i32
  }
  func.func @transform_2(%arg0: i32, %arg1: i32, %arg2: i32) -> (i32, i32) {
    %c0_i32 = arith.constant 0 : i32
    %c0_i32_0 = arith.constant 0 : i32
    return %c0_i32, %arg1 : i32, i32
  }
  func.func @transform_3(%arg0: i32, %arg1: i32, %arg2: i32) -> (i32, i32) {
    %c0_i32 = arith.constant 0 : i32
    return %arg0, %arg1 : i32, i32
  }
}

module attributes {stable_mosaic.version = 11 : i64} {
  func.func @_attn_kernel(%arg0: i32, %arg1: memref<8x2x96xf32, #tpu.memory_space<vmem>>, %arg2: memref<8x2x32xf32, #tpu.memory_space<vmem>>) attributes {dimension_semantics = [#tpu.dimension_semantics<parallel>], iteration_bounds = array<i64: 1>, scalar_prefetch = 0 : i64, scratch_operands = 0 : i64, tpu.core_type = #tpu.core_type<tc>, window_params = [{transform_indices = @transform_0, window_bounds = array<i64: 8, 2, 96>}, {transform_indices = @transform_1, window_bounds = array<i64: 8, 2, 32>}]} {
    %c0 = arith.constant 0 : index
    %c0_0 = arith.constant 0 : index
    %c0_1 = arith.constant 0 : index
    %0 = vector.load %arg1[%c0, %c0_0, %c0_1] : memref<8x2x96xf32, #tpu.memory_space<vmem>>, vector<8x2x96xf32>
    %1 = vector.extract_strided_slice %0 {offsets = [0, 0, 0], sizes = [8, 2, 8], strides = [1, 1, 1]} : vector<8x2x96xf32> to vector<8x2x8xf32>
    %cst = arith.constant 0.353553385 : f32
    %2 = vector.broadcast %cst : f32 to vector<8x2x8xf32>
    %3 = arith.mulf %1, %2 : vector<8x2x8xf32>
    %4 = vector.extract_strided_slice %0 {offsets = [0, 0, 32], sizes = [8, 2, 8], strides = [1, 1, 1]} : vector<8x2x96xf32> to vector<8x2x8xf32>
    %5 = vector.extract_strided_slice %0 {offsets = [0, 0, 64], sizes = [8, 2, 8], strides = [1, 1, 1]} : vector<8x2x96xf32> to vector<8x2x8xf32>
    "tpu.trace_start"() <{level = 10 : i32, message = "sqd,skd->sqk"}> : () -> ()
    %cst_2 = arith.constant dense<0.000000e+00> : vector<8x2x2xf32>
    %6 = tpu.matmul %3, %4, %cst_2 {dimension_numbers = #tpu.dot_dimension_numbers<[2], [2], [1], [1], [0, 0, 0, 1, 1, 1], [0], [0]>} : vector<8x2x8xf32>, vector<8x2x8xf32>, vector<8x2x2xf32> -> vector<8x2x2xf32>
    "tpu.trace_stop"() : () -> ()
    %cst_3 = arith.constant dense<0xFF800000> : vector<8x2xf32>
    %7 = vector.multi_reduction <maximumf>, %6, %cst_3 [2] : vector<8x2x2xf32> to vector<8x2xf32>
    %8 = vector.shape_cast %7 : vector<8x2xf32> to vector<8x2x1xf32>
    %9 = vector.broadcast %8 : vector<8x2x1xf32> to vector<8x2x2xf32>
    %10 = arith.subf %6, %9 : vector<8x2x2xf32>
    %11 = math.exp %10 : vector<8x2x2xf32>
    %cst_4 = arith.constant dense<0.000000e+00> : vector<8x2xf32>
    %12 = vector.multi_reduction <add>, %11, %cst_4 [2] : vector<8x2x2xf32> to vector<8x2xf32>
    %13 = vector.shape_cast %12 : vector<8x2xf32> to vector<8x2x1xf32>
    %14 = tpu.reciprocal %13 {approx = true} : vector<8x2x1xf32> -> vector<8x2x1xf32>
    %15 = vector.broadcast %14 : vector<8x2x1xf32> to vector<8x2x2xf32>
    %16 = arith.mulf %11, %15 : vector<8x2x2xf32>
    "tpu.trace_start"() <{level = 10 : i32, message = "sqk,skd->sqd"}> : () -> ()
    %cst_5 = arith.constant dense<0.000000e+00> : vector<8x2x8xf32>
    %17 = tpu.matmul %16, %5, %cst_5 {dimension_numbers = #tpu.dot_dimension_numbers<[2], [1], [1], [2], [0, 0, 0, 1, 1, 2], [0], [0]>} : vector<8x2x2xf32>, vector<8x2x8xf32>, vector<8x2x8xf32> -> vector<8x2x8xf32>
    "tpu.trace_stop"() : () -> ()
    %c0_6 = arith.constant 0 : index
    %c0_7 = arith.constant 0 : index
    %c0_8 = arith.constant 0 : index
    %18 = vector.load %arg2[%c0_6, %c0_7, %c0_8] : memref<8x2x32xf32, #tpu.memory_space<vmem>>, vector<8x2x8xf32>
    tpu.vector_store %arg2[%c0_6, %c0_7, %c0_8], %17 {strides = array<i32>} : memref<8x2x32xf32, #tpu.memory_space<vmem>>, vector<8x2x8xf32>,
    %19 = vector.extract_strided_slice %0 {offsets = [0, 0, 8], sizes = [8, 2, 8], strides = [1, 1, 1]} : vector<8x2x96xf32> to vector<8x2x8xf32>
    %cst_9 = arith.constant 0.353553385 : f32
    %20 = vector.broadcast %cst_9 : f32 to vector<8x2x8xf32>
    %21 = arith.mulf %19, %20 : vector<8x2x8xf32>
    %22 = vector.extract_strided_slice %0 {offsets = [0, 0, 40], sizes = [8, 2, 8], strides = [1, 1, 1]} : vector<8x2x96xf32> to vector<8x2x8xf32>
    %23 = vector.extract_strided_slice %0 {offsets = [0, 0, 72], sizes = [8, 2, 8], strides = [1, 1, 1]} : vector<8x2x96xf32> to vector<8x2x8xf32>
    "tpu.trace_start"() <{level = 10 : i32, message = "sqd,skd->sqk"}> : () -> ()
    %cst_10 = arith.constant dense<0.000000e+00> : vector<8x2x2xf32>
    %24 = tpu.matmul %21, %22, %cst_10 {dimension_numbers = #tpu.dot_dimension_numbers<[2], [2], [1], [1], [0, 0, 0, 1, 1, 1], [0], [0]>} : vector<8x2x8xf32>, vector<8x2x8xf32>, vector<8x2x2xf32> -> vector<8x2x2xf32>
    "tpu.trace_stop"() : () -> ()
    %cst_11 = arith.constant dense<0xFF800000> : vector<8x2xf32>
    %25 = vector.multi_reduction <maximumf>, %24, %cst_11 [2] : vector<8x2x2xf32> to vector<8x2xf32>
    %26 = vector.shape_cast %25 : vector<8x2xf32> to vector<8x2x1xf32>
    %27 = vector.broadcast %26 : vector<8x2x1xf32> to vector<8x2x2xf32>
    %28 = arith.subf %24, %27 : vector<8x2x2xf32>
    %29 = math.exp %28 : vector<8x2x2xf32>
    %cst_12 = arith.constant dense<0.000000e+00> : vector<8x2xf32>
    %30 = vector.multi_reduction <add>, %29, %cst_12 [2] : vector<8x2x2xf32> to vector<8x2xf32>
    %31 = vector.shape_cast %30 : vector<8x2xf32> to vector<8x2x1xf32>
    %32 = tpu.reciprocal %31 {approx = true} : vector<8x2x1xf32> -> vector<8x2x1xf32>
    %33 = vector.broadcast %32 : vector<8x2x1xf32> to vector<8x2x2xf32>
    %34 = arith.mulf %29, %33 : vector<8x2x2xf32>
    "tpu.trace_start"() <{level = 10 : i32, message = "sqk,skd->sqd"}> : () -> ()
    %cst_13 = arith.constant dense<0.000000e+00> : vector<8x2x8xf32>
    %35 = tpu.matmul %34, %23, %cst_13 {dimension_numbers = #tpu.dot_dimension_numbers<[2], [1], [1], [2], [0, 0, 0, 1, 1, 2], [0], [0]>} : vector<8x2x2xf32>, vector<8x2x8xf32>, vector<8x2x8xf32> -> vector<8x2x8xf32>
    "tpu.trace_stop"() : () -> ()
    %c0_14 = arith.constant 0 : index
    %c0_15 = arith.constant 0 : index
    %c8 = arith.constant 8 : index
    %36 = vector.load %arg2[%c0_14, %c0_15, %c8] : memref<8x2x32xf32, #tpu.memory_space<vmem>>, vector<8x2x8xf32>
    tpu.vector_store %arg2[%c0_14, %c0_15, %c8], %35 {strides = array<i32>} : memref<8x2x32xf32, #tpu.memory_space<vmem>>, vector<8x2x8xf32>,
    %37 = vector.extract_strided_slice %0 {offsets = [0, 0, 16], sizes = [8, 2, 8], strides = [1, 1, 1]} : vector<8x2x96xf32> to vector<8x2x8xf32>
    %cst_16 = arith.constant 0.353553385 : f32
    %38 = vector.broadcast %cst_16 : f32 to vector<8x2x8xf32>
    %39 = arith.mulf %37, %38 : vector<8x2x8xf32>
    %40 = vector.extract_strided_slice %0 {offsets = [0, 0, 48], sizes = [8, 2, 8], strides = [1, 1, 1]} : vector<8x2x96xf32> to vector<8x2x8xf32>
    %41 = vector.extract_strided_slice %0 {offsets = [0, 0, 80], sizes = [8, 2, 8], strides = [1, 1, 1]} : vector<8x2x96xf32> to vector<8x2x8xf32>
    "tpu.trace_start"() <{level = 10 : i32, message = "sqd,skd->sqk"}> : () -> ()
    %cst_17 = arith.constant dense<0.000000e+00> : vector<8x2x2xf32>
    %42 = tpu.matmul %39, %40, %cst_17 {dimension_numbers = #tpu.dot_dimension_numbers<[2], [2], [1], [1], [0, 0, 0, 1, 1, 1], [0], [0]>} : vector<8x2x8xf32>, vector<8x2x8xf32>, vector<8x2x2xf32> -> vector<8x2x2xf32>
    "tpu.trace_stop"() : () -> ()
    %cst_18 = arith.constant dense<0xFF800000> : vector<8x2xf32>
    %43 = vector.multi_reduction <maximumf>, %42, %cst_18 [2] : vector<8x2x2xf32> to vector<8x2xf32>
    %44 = vector.shape_cast %43 : vector<8x2xf32> to vector<8x2x1xf32>
    %45 = vector.broadcast %44 : vector<8x2x1xf32> to vector<8x2x2xf32>
    %46 = arith.subf %42, %45 : vector<8x2x2xf32>
    %47 = math.exp %46 : vector<8x2x2xf32>
    %cst_19 = arith.constant dense<0.000000e+00> : vector<8x2xf32>
    %48 = vector.multi_reduction <add>, %47, %cst_19 [2] : vector<8x2x2xf32> to vector<8x2xf32>
    %49 = vector.shape_cast %48 : vector<8x2xf32> to vector<8x2x1xf32>
    %50 = tpu.reciprocal %49 {approx = true} : vector<8x2x1xf32> -> vector<8x2x1xf32>
    %51 = vector.broadcast %50 : vector<8x2x1xf32> to vector<8x2x2xf32>
    %52 = arith.mulf %47, %51 : vector<8x2x2xf32>
    "tpu.trace_start"() <{level = 10 : i32, message = "sqk,skd->sqd"}> : () -> ()
    %cst_20 = arith.constant dense<0.000000e+00> : vector<8x2x8xf32>
    %53 = tpu.matmul %52, %41, %cst_20 {dimension_numbers = #tpu.dot_dimension_numbers<[2], [1], [1], [2], [0, 0, 0, 1, 1, 2], [0], [0]>} : vector<8x2x2xf32>, vector<8x2x8xf32>, vector<8x2x8xf32> -> vector<8x2x8xf32>
    "tpu.trace_stop"() : () -> ()
    %c0_21 = arith.constant 0 : index
    %c0_22 = arith.constant 0 : index
    %c16 = arith.constant 16 : index
    %54 = vector.load %arg2[%c0_21, %c0_22, %c16] : memref<8x2x32xf32, #tpu.memory_space<vmem>>, vector<8x2x8xf32>
    tpu.vector_store %arg2[%c0_21, %c0_22, %c16], %53 {strides = array<i32>} : memref<8x2x32xf32, #tpu.memory_space<vmem>>, vector<8x2x8xf32>,
    %55 = vector.extract_strided_slice %0 {offsets = [0, 0, 24], sizes = [8, 2, 8], strides = [1, 1, 1]} : vector<8x2x96xf32> to vector<8x2x8xf32>
    %cst_23 = arith.constant 0.353553385 : f32
    %56 = vector.broadcast %cst_23 : f32 to vector<8x2x8xf32>
    %57 = arith.mulf %55, %56 : vector<8x2x8xf32>
    %58 = vector.extract_strided_slice %0 {offsets = [0, 0, 56], sizes = [8, 2, 8], strides = [1, 1, 1]} : vector<8x2x96xf32> to vector<8x2x8xf32>
    %59 = vector.extract_strided_slice %0 {offsets = [0, 0, 88], sizes = [8, 2, 8], strides = [1, 1, 1]} : vector<8x2x96xf32> to vector<8x2x8xf32>
    "tpu.trace_start"() <{level = 10 : i32, message = "sqd,skd->sqk"}> : () -> ()
    %cst_24 = arith.constant dense<0.000000e+00> : vector<8x2x2xf32>
    %60 = tpu.matmul %57, %58, %cst_24 {dimension_numbers = #tpu.dot_dimension_numbers<[2], [2], [1], [1], [0, 0, 0, 1, 1, 1], [0], [0]>} : vector<8x2x8xf32>, vector<8x2x8xf32>, vector<8x2x2xf32> -> vector<8x2x2xf32>
    "tpu.trace_stop"() : () -> ()
    %cst_25 = arith.constant dense<0xFF800000> : vector<8x2xf32>
    %61 = vector.multi_reduction <maximumf>, %60, %cst_25 [2] : vector<8x2x2xf32> to vector<8x2xf32>
    %62 = vector.shape_cast %61 : vector<8x2xf32> to vector<8x2x1xf32>
    %63 = vector.broadcast %62 : vector<8x2x1xf32> to vector<8x2x2xf32>
    %64 = arith.subf %60, %63 : vector<8x2x2xf32>
    %65 = math.exp %64 : vector<8x2x2xf32>
    %cst_26 = arith.constant dense<0.000000e+00> : vector<8x2xf32>
    %66 = vector.multi_reduction <add>, %65, %cst_26 [2] : vector<8x2x2xf32> to vector<8x2xf32>
    %67 = vector.shape_cast %66 : vector<8x2xf32> to vector<8x2x1xf32>
    %68 = tpu.reciprocal %67 {approx = true} : vector<8x2x1xf32> -> vector<8x2x1xf32>
    %69 = vector.broadcast %68 : vector<8x2x1xf32> to vector<8x2x2xf32>
    %70 = arith.mulf %65, %69 : vector<8x2x2xf32>
    "tpu.trace_start"() <{level = 10 : i32, message = "sqk,skd->sqd"}> : () -> ()
    %cst_27 = arith.constant dense<0.000000e+00> : vector<8x2x8xf32>
    %71 = tpu.matmul %70, %59, %cst_27 {dimension_numbers = #tpu.dot_dimension_numbers<[2], [1], [1], [2], [0, 0, 0, 1, 1, 2], [0], [0]>} : vector<8x2x2xf32>, vector<8x2x8xf32>, vector<8x2x8xf32> -> vector<8x2x8xf32>
    "tpu.trace_stop"() : () -> ()
    %c0_28 = arith.constant 0 : index
    %c0_29 = arith.constant 0 : index
    %c24 = arith.constant 24 : index
    %72 = vector.load %arg2[%c0_28, %c0_29, %c24] : memref<8x2x32xf32, #tpu.memory_space<vmem>>, vector<8x2x8xf32>
    tpu.vector_store %arg2[%c0_28, %c0_29, %c24], %71 {strides = array<i32>} : memref<8x2x32xf32, #tpu.memory_space<vmem>>, vector<8x2x8xf32>,
    return
  }
  func.func @transform_0(%arg0: i32) -> (i32, i32, i32) {
    %c0_i32 = arith.constant 0 : i32
    %c0_i32_0 = arith.constant 0 : i32
    %c0_i32_1 = arith.constant 0 : i32
    return %arg0, %c0_i32, %c0_i32_0 : i32, i32, i32
  }
  func.func @transform_1(%arg0: i32) -> (i32, i32, i32) {
    %c0_i32 = arith.constant 0 : i32
    %c0_i32_0 = arith.constant 0 : i32
    %c0_i32_1 = arith.constant 0 : i32
    return %arg0, %c0_i32, %c0_i32_0 : i32, i32, i32
  }
}

module attributes {stable_mosaic.version = 11 : i64} {
  func.func @_linear_kernel(%arg0: i32, %arg1: i32, %arg2: i32, %arg3: memref<16x32xf32, #tpu.memory_space<vmem>>, %arg4: memref<32x32xf32, #tpu.memory_space<vmem>>, %arg5: memref<1x32xf32, #tpu.memory_space<vmem>>, %arg6: memref<16x32xf32, #tpu.memory_space<vmem>>, %arg7: memref<1x32xf32, #tpu.memory_space<vmem>>, %arg8: memref<1x32xf32, #tpu.memory_space<vmem>>, %arg9: memref<16x32xf32, #tpu.memory_space<vmem>>, %arg10: memref<16x32xf32, #tpu.memory_space<vmem>>) attributes {dimension_semantics = [#tpu.dimension_semantics<parallel>, #tpu.dimension_semantics<parallel>, #tpu.dimension_semantics<arbitrary>], iteration_bounds = array<i64: 1, 1, 1>, scalar_prefetch = 0 : i64, scratch_operands = 1 : i64, tpu.core_type = #tpu.core_type<tc>, window_params = [{transform_indices = @transform_0, window_bounds = array<i64: 16, 32>}, {transform_indices = @transform_1, window_bounds = array<i64: 32, 32>}, {transform_indices = @transform_2, window_bounds = array<i64: 1, 32>}, {transform_indices = @transform_3, window_bounds = array<i64: 16, 32>}, {transform_indices = @transform_4, window_bounds = array<i64: 1, 32>}, {transform_indices = @transform_5, window_bounds = array<i64: 1, 32>}, {transform_indices = @transform_6, window_bounds = array<i64: 16, 32>}]} {
    %c0_i32 = arith.constant 0 : i32
    %0 = arith.cmpi eq, %arg2, %c0_i32 : i32
    %1 = arith.extui %0 : i1 to i32
    %c0_i32_0 = arith.constant 0 : i32
    %2 = arith.cmpi ne, %1, %c0_i32_0 : i32
    scf.if %2 {
      %cst_10 = arith.constant 0.000000e+00 : f32
      %12 = vector.broadcast %cst_10 : f32 to vector<16x32xf32>
      %c0_11 = arith.constant 0 : index
      %c0_12 = arith.constant 0 : index
      %13 = vector.load %arg10[%c0_11, %c0_12] : memref<16x32xf32, #tpu.memory_space<vmem>>, vector<16x32xf32>
      tpu.vector_store %arg10[%c0_11, %c0_12], %12 {strides = array<i32>} : memref<16x32xf32, #tpu.memory_space<vmem>>, vector<16x32xf32>,
    } else {
    }
    %c0 = arith.constant 0 : index
    %c0_1 = arith.constant 0 : index
    %3 = vector.load %arg10[%c0, %c0_1] : memref<16x32xf32, #tpu.memory_space<vmem>>, vector<16x32xf32>
    %c0_2 = arith.constant 0 : index
    %c0_3 = arith.constant 0 : index
    %4 = vector.load %arg3[%c0_2, %c0_3] : memref<16x32xf32, #tpu.memory_space<vmem>>, vector<16x32xf32>
    %c0_4 = arith.constant 0 : index
    %c0_5 = arith.constant 0 : index
    %5 = vector.load %arg4[%c0_4, %c0_5] : memref<32x32xf32, #tpu.memory_space<vmem>>, vector<32x32xf32>
    %cst = arith.constant dense<0.000000e+00> : vector<16x32xf32>
    %6 = tpu.matmul %4, %5, %cst {dimension_numbers = #tpu.dot_dimension_numbers<[1], [0], [0], [1], [0, 0, 1, 1], [], []>} : vector<16x32xf32>, vector<32x32xf32>, vector<16x32xf32> -> vector<16x32xf32>
    %7 = arith.addf %3, %6 : vector<16x32xf32>
    %c0_6 = arith.constant 0 : index
    %c0_7 = arith.constant 0 : index
    %8 = vector.load %arg10[%c0_6, %c0_7] : memref<16x32xf32, #tpu.memory_space<vmem>>, vector<16x32xf32>
    tpu.vector_store %arg10[%c0_6, %c0_7], %7 {strides = array<i32>} : memref<16x32xf32, #tpu.memory_space<vmem>>, vector<16x32xf32>,
    %c0_i32_8 = arith.constant 0 : i32
    %9 = arith.cmpi eq, %arg2, %c0_i32_8 : i32
    %10 = arith.extui %9 : i1 to i32
    %c0_i32_9 = arith.constant 0 : i32
    %11 = arith.cmpi ne, %10, %c0_i32_9 : i32
    scf.if %11 {
      %c0_10 = arith.constant 0 : index
      %c0_11 = arith.constant 0 : index
      %12 = vector.load %arg10[%c0_10, %c0_11] : memref<16x32xf32, #tpu.memory_space<vmem>>, vector<16x32xf32>
      %c0_12 = arith.constant 0 : index
      %c0_13 = arith.constant 0 : index
      %13 = vector.load %arg5[%c0_12, %c0_13] : memref<1x32xf32, #tpu.memory_space<vmem>>, vector<1x32xf32>
      %14 = vector.broadcast %13 : vector<1x32xf32> to vector<16x32xf32>
      %15 = arith.addf %12, %14 : vector<16x32xf32>
      %c0_14 = arith.constant 0 : index
      %c0_15 = arith.constant 0 : index
      %16 = vector.load %arg6[%c0_14, %c0_15] : memref<16x32xf32, #tpu.memory_space<vmem>>, vector<16x32xf32>
      %17 = arith.addf %15, %16 : vector<16x32xf32>
      %cst_16 = arith.constant dense<0.000000e+00> : vector<16xf32>
      %18 = vector.multi_reduction <add>, %17, %cst_16 [1] : vector<16x32xf32> to vector<16xf32>
      %19 = vector.shape_cast %18 : vector<16xf32> to vector<16x1xf32>
      %cst_17 = arith.constant 3.200000e+01 : f32
      %20 = vector.broadcast %cst_17 : f32 to vector<16x1xf32>
      %21 = arith.divf %19, %20 : vector<16x1xf32>
      %22 = vector.broadcast %21 : vector<16x1xf32> to vector<16x32xf32>
      %23 = arith.subf %17, %22 : vector<16x32xf32>
      %24 = arith.mulf %23, %23 : vector<16x32xf32>
      %cst_18 = arith.constant dense<0.000000e+00> : vector<16xf32>
      %25 = vector.multi_reduction <add>, %24, %cst_18 [1] : vector<16x32xf32> to vector<16xf32>
      %26 = vector.shape_cast %25 : vector<16xf32> to vector<16x1xf32>
      %cst_19 = arith.constant 3.200000e+01 : f32
      %27 = vector.broadcast %cst_19 : f32 to vector<16x1xf32>
      %28 = arith.divf %26, %27 : vector<16x1xf32>
      %29 = vector.broadcast %21 : vector<16x1xf32> to vector<16x32xf32>
      %30 = arith.subf %17, %29 : vector<16x32xf32>
      %cst_20 = arith.constant 9.99999974E-6 : f32
      %31 = vector.broadcast %cst_20 : f32 to vector<16x1xf32>
      %32 = arith.addf %28, %31 : vector<16x1xf32>
      %33 = math.rsqrt %32 : vector<16x1xf32>
      %34 = vector.broadcast %33 : vector<16x1xf32> to vector<16x32xf32>
      %35 = arith.mulf %30, %34 : vector<16x32xf32>
      %c0_21 = arith.constant 0 : index
      %c0_22 = arith.constant 0 : index
      %36 = vector.load %arg7[%c0_21, %c0_22] : memref<1x32xf32, #tpu.memory_space<vmem>>, vector<1x32xf32>
      %37 = vector.broadcast %36 : vector<1x32xf32> to vector<16x32xf32>
      %38 = arith.mulf %35, %37 : vector<16x32xf32>
      %c0_23 = arith.constant 0 : index
      %c0_24 = arith.constant 0 : index
      %39 = vector.load %arg8[%c0_23, %c0_24] : memref<1x32xf32, #tpu.memory_space<vmem>>, vector<1x32xf32>
      %40 = vector.broadcast %39 : vector<1x32xf32> to vector<16x32xf32>
      %41 = arith.addf %38, %40 : vector<16x32xf32>
      %c0_25 = arith.constant 0 : index
      %c0_26 = arith.constant 0 : index
      %42 = vector.load %arg9[%c0_25, %c0_26] : memref<16x32xf32, #tpu.memory_space<vmem>>, vector<16x32xf32>
      tpu.vector_store %arg9[%c0_25, %c0_26], %41 {strides = array<i32>} : memref<16x32xf32, #tpu.memory_space<vmem>>, vector<16x32xf32>,
    } else {
    }
    return
  }
  func.func @transform_0(%arg0: i32, %arg1: i32, %arg2: i32) -> (i32, i32) {
    %c0_i32 = arith.constant 0 : i32
    return %arg0, %arg2 : i32, i32
  }
  func.func @transform_1(%arg0: i32, %arg1: i32, %arg2: i32) -> (i32, i32) {
    %c0_i32 = arith.constant 0 : i32
    return %arg2, %arg1 : i32, i32
  }
  func.func @transform_2(%arg0: i32, %arg1: i32, %arg2: i32) -> (i32, i32) {
    %c0_i32 = arith.constant 0 : i32
    %c0_i32_0 = arith.constant 0 : i32
    return %c0_i32, %arg1 : i32, i32
  }
  func.func @transform_3(%arg0: i32, %arg1: i32, %arg2: i32) -> (i32, i32) {
    %c0_i32 = arith.constant 0 : i32
    return %arg0, %arg1 : i32, i32
  }
  func.func @transform_4(%arg0: i32, %arg1: i32, %arg2: i32) -> (i32, i32) {
    %c0_i32 = arith.constant 0 : i32
    %c0_i32_0 = arith.constant 0 : i32
    return %c0_i32, %arg1 : i32, i32
  }
  func.func @transform_5(%arg0: i32, %arg1: i32, %arg2: i32) -> (i32, i32) {
    %c0_i32 = arith.constant 0 : i32
    %c0_i32_0 = arith.constant 0 : i32
    return %c0_i32, %arg1 : i32, i32
  }
  func.func @transform_6(%arg0: i32, %arg1: i32, %arg2: i32) -> (i32, i32) {
    %c0_i32 = arith.constant 0 : i32
    return %arg0, %arg1 : i32, i32
  }
}

module attributes {stable_mosaic.version = 11 : i64} {
  func.func @_linear_kernel(%arg0: i32, %arg1: i32, %arg2: i32, %arg3: memref<16x128xf32, #tpu.memory_space<vmem>>, %arg4: memref<128x32xf32, #tpu.memory_space<vmem>>, %arg5: memref<1x32xf32, #tpu.memory_space<vmem>>, %arg6: memref<16x32xf32, #tpu.memory_space<vmem>>, %arg7: memref<1x32xf32, #tpu.memory_space<vmem>>, %arg8: memref<1x32xf32, #tpu.memory_space<vmem>>, %arg9: memref<16x32xf32, #tpu.memory_space<vmem>>, %arg10: memref<16x32xf32, #tpu.memory_space<vmem>>) attributes {dimension_semantics = [#tpu.dimension_semantics<parallel>, #tpu.dimension_semantics<parallel>, #tpu.dimension_semantics<arbitrary>], iteration_bounds = array<i64: 1, 1, 1>, scalar_prefetch = 0 : i64, scratch_operands = 1 : i64, tpu.core_type = #tpu.core_type<tc>, window_params = [{transform_indices = @transform_0, window_bounds = array<i64: 16, 128>}, {transform_indices = @transform_1, window_bounds = array<i64: 128, 32>}, {transform_indices = @transform_2, window_bounds = array<i64: 1, 32>}, {transform_indices = @transform_3, window_bounds = array<i64: 16, 32>}, {transform_indices = @transform_4, window_bounds = array<i64: 1, 32>}, {transform_indices = @transform_5, window_bounds = array<i64: 1, 32>}, {transform_indices = @transform_6, window_bounds = array<i64: 16, 32>}]} {
    %c0_i32 = arith.constant 0 : i32
    %0 = arith.cmpi eq, %arg2, %c0_i32 : i32
    %1 = arith.extui %0 : i1 to i32
    %c0_i32_0 = arith.constant 0 : i32
    %2 = arith.cmpi ne, %1, %c0_i32_0 : i32
    scf.if %2 {
      %cst_10 = arith.constant 0.000000e+00 : f32
      %12 = vector.broadcast %cst_10 : f32 to vector<16x32xf32>
      %c0_11 = arith.constant 0 : index
      %c0_12 = arith.constant 0 : index
      %13 = vector.load %arg10[%c0_11, %c0_12] : memref<16x32xf32, #tpu.memory_space<vmem>>, vector<16x32xf32>
      tpu.vector_store %arg10[%c0_11, %c0_12], %12 {strides = array<i32>} : memref<16x32xf32, #tpu.memory_space<vmem>>, vector<16x32xf32>,
    } else {
    }
    %c0 = arith.constant 0 : index
    %c0_1 = arith.constant 0 : index
    %3 = vector.load %arg10[%c0, %c0_1] : memref<16x32xf32, #tpu.memory_space<vmem>>, vector<16x32xf32>
    %c0_2 = arith.constant 0 : index
    %c0_3 = arith.constant 0 : index
    %4 = vector.load %arg3[%c0_2, %c0_3] : memref<16x128xf32, #tpu.memory_space<vmem>>, vector<16x128xf32>
    %c0_4 = arith.constant 0 : index
    %c0_5 = arith.constant 0 : index
    %5 = vector.load %arg4[%c0_4, %c0_5] : memref<128x32xf32, #tpu.memory_space<vmem>>, vector<128x32xf32>
    %cst = arith.constant dense<0.000000e+00> : vector<16x32xf32>
    %6 = tpu.matmul %4, %5, %cst {dimension_numbers = #tpu.dot_dimension_numbers<[1], [0], [0], [1], [0, 0, 1, 1], [], []>} : vector<16x128xf32>, vector<128x32xf32>, vector<16x32xf32> -> vector<16x32xf32>
    %7 = arith.addf %3, %6 : vector<16x32xf32>
    %c0_6 = arith.constant 0 : index
    %c0_7 = arith.constant 0 : index
    %8 = vector.load %arg10[%c0_6, %c0_7] : memref<16x32xf32, #tpu.memory_space<vmem>>, vector<16x32xf32>
    tpu.vector_store %arg10[%c0_6, %c0_7], %7 {strides = array<i32>} : memref<16x32xf32, #tpu.memory_space<vmem>>, vector<16x32xf32>,
    %c0_i32_8 = arith.constant 0 : i32
    %9 = arith.cmpi eq, %arg2, %c0_i32_8 : i32
    %10 = arith.extui %9 : i1 to i32
    %c0_i32_9 = arith.constant 0 : i32
    %11 = arith.cmpi ne, %10, %c0_i32_9 : i32
    scf.if %11 {
      %c0_10 = arith.constant 0 : index
      %c0_11 = arith.constant 0 : index
      %12 = vector.load %arg10[%c0_10, %c0_11] : memref<16x32xf32, #tpu.memory_space<vmem>>, vector<16x32xf32>
      %c0_12 = arith.constant 0 : index
      %c0_13 = arith.constant 0 : index
      %13 = vector.load %arg5[%c0_12, %c0_13] : memref<1x32xf32, #tpu.memory_space<vmem>>, vector<1x32xf32>
      %14 = vector.broadcast %13 : vector<1x32xf32> to vector<16x32xf32>
      %15 = arith.addf %12, %14 : vector<16x32xf32>
      %c0_14 = arith.constant 0 : index
      %c0_15 = arith.constant 0 : index
      %16 = vector.load %arg6[%c0_14, %c0_15] : memref<16x32xf32, #tpu.memory_space<vmem>>, vector<16x32xf32>
      %17 = arith.addf %15, %16 : vector<16x32xf32>
      %cst_16 = arith.constant dense<0.000000e+00> : vector<16xf32>
      %18 = vector.multi_reduction <add>, %17, %cst_16 [1] : vector<16x32xf32> to vector<16xf32>
      %19 = vector.shape_cast %18 : vector<16xf32> to vector<16x1xf32>
      %cst_17 = arith.constant 3.200000e+01 : f32
      %20 = vector.broadcast %cst_17 : f32 to vector<16x1xf32>
      %21 = arith.divf %19, %20 : vector<16x1xf32>
      %22 = vector.broadcast %21 : vector<16x1xf32> to vector<16x32xf32>
      %23 = arith.subf %17, %22 : vector<16x32xf32>
      %24 = arith.mulf %23, %23 : vector<16x32xf32>
      %cst_18 = arith.constant dense<0.000000e+00> : vector<16xf32>
      %25 = vector.multi_reduction <add>, %24, %cst_18 [1] : vector<16x32xf32> to vector<16xf32>
      %26 = vector.shape_cast %25 : vector<16xf32> to vector<16x1xf32>
      %cst_19 = arith.constant 3.200000e+01 : f32
      %27 = vector.broadcast %cst_19 : f32 to vector<16x1xf32>
      %28 = arith.divf %26, %27 : vector<16x1xf32>
      %29 = vector.broadcast %21 : vector<16x1xf32> to vector<16x32xf32>
      %30 = arith.subf %17, %29 : vector<16x32xf32>
      %cst_20 = arith.constant 9.99999974E-6 : f32
      %31 = vector.broadcast %cst_20 : f32 to vector<16x1xf32>
      %32 = arith.addf %28, %31 : vector<16x1xf32>
      %33 = math.rsqrt %32 : vector<16x1xf32>
      %34 = vector.broadcast %33 : vector<16x1xf32> to vector<16x32xf32>
      %35 = arith.mulf %30, %34 : vector<16x32xf32>
      %c0_21 = arith.constant 0 : index
      %c0_22 = arith.constant 0 : index
      %36 = vector.load %arg7[%c0_21, %c0_22] : memref<1x32xf32, #tpu.memory_space<vmem>>, vector<1x32xf32>
      %37 = vector.broadcast %36 : vector<1x32xf32> to vector<16x32xf32>
      %38 = arith.mulf %35, %37 : vector<16x32xf32>
      %c0_23 = arith.constant 0 : index
      %c0_24 = arith.constant 0 : index
      %39 = vector.load %arg8[%c0_23, %c0_24] : memref<1x32xf32, #tpu.memory_space<vmem>>, vector<1x32xf32>
      %40 = vector.broadcast %39 : vector<1x32xf32> to vector<16x32xf32>
      %41 = arith.addf %38, %40 : vector<16x32xf32>
      %c0_25 = arith.constant 0 : index
      %c0_26 = arith.constant 0 : index
      %42 = vector.load %arg9[%c0_25, %c0_26] : memref<16x32xf32, #tpu.memory_space<vmem>>, vector<16x32xf32>
      tpu.vector_store %arg9[%c0_25, %c0_26], %41 {strides = array<i32>} : memref<16x32xf32, #tpu.memory_space<vmem>>, vector<16x32xf32>,
    } else {
    }
    return
  }
  func.func @transform_0(%arg0: i32, %arg1: i32, %arg2: i32) -> (i32, i32) {
    %c0_i32 = arith.constant 0 : i32
    return %arg0, %arg2 : i32, i32
  }
  func.func @transform_1(%arg0: i32, %arg1: i32, %arg2: i32) -> (i32, i32) {
    %c0_i32 = arith.constant 0 : i32
    return %arg2, %arg1 : i32, i32
  }
  func.func @transform_2(%arg0: i32, %arg1: i32, %arg2: i32) -> (i32, i32) {
    %c0_i32 = arith.constant 0 : i32
    %c0_i32_0 = arith.constant 0 : i32
    return %c0_i32, %arg1 : i32, i32
  }
  func.func @transform_3(%arg0: i32, %arg1: i32, %arg2: i32) -> (i32, i32) {
    %c0_i32 = arith.constant 0 : i32
    return %arg0, %arg1 : i32, i32
  }
  func.func @transform_4(%arg0: i32, %arg1: i32, %arg2: i32) -> (i32, i32) {
    %c0_i32 = arith.constant 0 : i32
    %c0_i32_0 = arith.constant 0 : i32
    return %c0_i32, %arg1 : i32, i32
  }
  func.func @transform_5(%arg0: i32, %arg1: i32, %arg2: i32) -> (i32, i32) {
    %c0_i32 = arith.constant 0 : i32
    %c0_i32_0 = arith.constant 0 : i32
    return %c0_i32, %arg1 : i32, i32
  }
  func.func @transform_6(%arg0: i32, %arg1: i32, %arg2: i32) -> (i32, i32) {
    %c0_i32 = arith.constant 0 : i32
    return %arg0, %arg1 : i32, i32
  }
}

module attributes {stable_mosaic.version = 11 : i64} {
  func.func @_linear_kernel(%arg0: i32, %arg1: i32, %arg2: i32, %arg3: memref<16x32xf32, #tpu.memory_space<vmem>>, %arg4: memref<32x128xf32, #tpu.memory_space<vmem>>, %arg5: memref<1x128xf32, #tpu.memory_space<vmem>>, %arg6: memref<16x128xf32, #tpu.memory_space<vmem>>, %arg7: memref<16x128xf32, #tpu.memory_space<vmem>>) attributes {dimension_semantics = [#tpu.dimension_semantics<parallel>, #tpu.dimension_semantics<parallel>, #tpu.dimension_semantics<arbitrary>], iteration_bounds = array<i64: 1, 1, 1>, scalar_prefetch = 0 : i64, scratch_operands = 1 : i64, tpu.core_type = #tpu.core_type<tc>, window_params = [{transform_indices = @transform_0, window_bounds = array<i64: 16, 32>}, {transform_indices = @transform_1, window_bounds = array<i64: 32, 128>}, {transform_indices = @transform_2, window_bounds = array<i64: 1, 128>}, {transform_indices = @transform_3, window_bounds = array<i64: 16, 128>}]} {
    %c0_i32 = arith.constant 0 : i32
    %0 = arith.cmpi eq, %arg2, %c0_i32 : i32
    %1 = arith.extui %0 : i1 to i32
    %c0_i32_0 = arith.constant 0 : i32
    %2 = arith.cmpi ne, %1, %c0_i32_0 : i32
    scf.if %2 {
      %cst_10 = arith.constant 0.000000e+00 : f32
      %12 = vector.broadcast %cst_10 : f32 to vector<16x128xf32>
      %c0_11 = arith.constant 0 : index
      %c0_12 = arith.constant 0 : index
      %13 = vector.load %arg7[%c0_11, %c0_12] : memref<16x128xf32, #tpu.memory_space<vmem>>, vector<16x128xf32>
      tpu.vector_store %arg7[%c0_11, %c0_12], %12 {strides = array<i32>} : memref<16x128xf32, #tpu.memory_space<vmem>>, vector<16x128xf32>,
    } else {
    }
    %c0 = arith.constant 0 : index
    %c0_1 = arith.constant 0 : index
    %3 = vector.load %arg7[%c0, %c0_1] : memref<16x128xf32, #tpu.memory_space<vmem>>, vector<16x128xf32>
    %c0_2 = arith.constant 0 : index
    %c0_3 = arith.constant 0 : index
    %4 = vector.load %arg3[%c0_2, %c0_3] : memref<16x32xf32, #tpu.memory_space<vmem>>, vector<16x32xf32>
    %c0_4 = arith.constant 0 : index
    %c0_5 = arith.constant 0 : index
    %5 = vector.load %arg4[%c0_4, %c0_5] : memref<32x128xf32, #tpu.memory_space<vmem>>, vector<32x128xf32>
    %cst = arith.constant dense<0.000000e+00> : vector<16x128xf32>
    %6 = tpu.matmul %4, %5, %cst {dimension_numbers = #tpu.dot_dimension_numbers<[1], [0], [0], [1], [0, 0, 1, 1], [], []>} : vector<16x32xf32>, vector<32x128xf32>, vector<16x128xf32> -> vector<16x128xf32>
    %7 = arith.addf %3, %6 : vector<16x128xf32>
    %c0_6 = arith.constant 0 : index
    %c0_7 = arith.constant 0 : index
    %8 = vector.load %arg7[%c0_6, %c0_7] : memref<16x128xf32, #tpu.memory_space<vmem>>, vector<16x128xf32>
    tpu.vector_store %arg7[%c0_6, %c0_7], %7 {strides = array<i32>} : memref<16x128xf32, #tpu.memory_space<vmem>>, vector<16x128xf32>,
    %c0_i32_8 = arith.constant 0 : i32
    %9 = arith.cmpi eq, %arg2, %c0_i32_8 : i32
    %10 = arith.extui %9 : i1 to i32
    %c0_i32_9 = arith.constant 0 : i32
    %11 = arith.cmpi ne, %10, %c0_i32_9 : i32
    scf.if %11 {
      %c0_10 = arith.constant 0 : index
      %c0_11 = arith.constant 0 : index
      %12 = vector.load %arg7[%c0_10, %c0_11] : memref<16x128xf32, #tpu.memory_space<vmem>>, vector<16x128xf32>
      %c0_12 = arith.constant 0 : index
      %c0_13 = arith.constant 0 : index
      %13 = vector.load %arg5[%c0_12, %c0_13] : memref<1x128xf32, #tpu.memory_space<vmem>>, vector<1x128xf32>
      %14 = vector.broadcast %13 : vector<1x128xf32> to vector<16x128xf32>
      %15 = arith.addf %12, %14 : vector<16x128xf32>
      %cst_14 = arith.constant 0.000000e+00 : f32
      %16 = vector.broadcast %cst_14 : f32 to vector<16x128xf32>
      %17 = arith.maximumf %15, %16 : vector<16x128xf32>
      %c0_15 = arith.constant 0 : index
      %c0_16 = arith.constant 0 : index
      %18 = vector.load %arg6[%c0_15, %c0_16] : memref<16x128xf32, #tpu.memory_space<vmem>>, vector<16x128xf32>
      tpu.vector_store %arg6[%c0_15, %c0_16], %17 {strides = array<i32>} : memref<16x128xf32, #tpu.memory_space<vmem>>, vector<16x128xf32>,
    } else {
    }
    return
  }
  func.func @transform_0(%arg0: i32, %arg1: i32, %arg2: i32) -> (i32, i32) {
    %c0_i32 = arith.constant 0 : i32
    return %arg0, %arg2 : i32, i32
  }
  func.func @transform_1(%arg0: i32, %arg1: i32, %arg2: i32) -> (i32, i32) {
    %c0_i32 = arith.constant 0 : i32
    return %arg2, %arg1 : i32, i32
  }
  func.func @transform_2(%arg0: i32, %arg1: i32, %arg2: i32) -> (i32, i32) {
    %c0_i32 = arith.constant 0 : i32
    %c0_i32_0 = arith.constant 0 : i32
    return %c0_i32, %arg1 : i32, i32
  }
  func.func @transform_3(%arg0: i32, %arg1: i32, %arg2: i32) -> (i32, i32) {
    %c0_i32 = arith.constant 0 : i32
    return %arg0, %arg1 : i32, i32
  }
}

module attributes {stable_mosaic.version = 11 : i64} {
  func.func @_pred_head_kernel(%arg0: i32, %arg1: memref<2x32xf32, #tpu.memory_space<vmem>>, %arg2: memref<32x128xf32, #tpu.memory_space<vmem>>, %arg3: memref<1x128xf32, #tpu.memory_space<vmem>>, %arg4: memref<128x128xf32, #tpu.memory_space<vmem>>, %arg5: memref<1x128xf32, #tpu.memory_space<vmem>>, %arg6: memref<2x128xf32, #tpu.memory_space<vmem>>) attributes {dimension_semantics = [#tpu.dimension_semantics<arbitrary>], iteration_bounds = array<i64: 1>, scalar_prefetch = 0 : i64, scratch_operands = 0 : i64, tpu.core_type = #tpu.core_type<tc>, window_params = [{pipeline_mode = #tpu.pipeline_mode<synchronous>, transform_indices = @transform_0, window_bounds = array<i64: 2, 32>}, {pipeline_mode = #tpu.pipeline_mode<synchronous>, transform_indices = @transform_1, window_bounds = array<i64: 32, 128>}, {pipeline_mode = #tpu.pipeline_mode<synchronous>, transform_indices = @transform_2, window_bounds = array<i64: 1, 128>}, {pipeline_mode = #tpu.pipeline_mode<synchronous>, transform_indices = @transform_3, window_bounds = array<i64: 128, 128>}, {pipeline_mode = #tpu.pipeline_mode<synchronous>, transform_indices = @transform_4, window_bounds = array<i64: 1, 128>}, {pipeline_mode = #tpu.pipeline_mode<synchronous>, transform_indices = @transform_5, window_bounds = array<i64: 2, 128>}]} {
    %c0 = arith.constant 0 : index
    %c0_0 = arith.constant 0 : index
    %0 = vector.load %arg1[%c0, %c0_0] : memref<2x32xf32, #tpu.memory_space<vmem>>, vector<2x32xf32>
    %c0_1 = arith.constant 0 : index
    %c0_2 = arith.constant 0 : index
    %1 = vector.load %arg2[%c0_1, %c0_2] : memref<32x128xf32, #tpu.memory_space<vmem>>, vector<32x128xf32>
    %cst = arith.constant dense<0.000000e+00> : vector<2x128xf32>
    %2 = tpu.matmul %0, %1, %cst {dimension_numbers = #tpu.dot_dimension_numbers<[1], [0], [0], [1], [0, 0, 1, 1], [], []>} : vector<2x32xf32>, vector<32x128xf32>, vector<2x128xf32> -> vector<2x128xf32>
    %c0_3 = arith.constant 0 : index
    %c0_4 = arith.constant 0 : index
    %3 = vector.load %arg3[%c0_3, %c0_4] : memref<1x128xf32, #tpu.memory_space<vmem>>, vector<1x128xf32>
    %4 = vector.broadcast %3 : vector<1x128xf32> to vector<2x128xf32>
    %5 = arith.addf %2, %4 : vector<2x128xf32>
    %c0_5 = arith.constant 0 : index
    %c0_6 = arith.constant 0 : index
    %6 = vector.load %arg4[%c0_5, %c0_6] : memref<128x128xf32, #tpu.memory_space<vmem>>, vector<128x128xf32>
    %cst_7 = arith.constant dense<0.000000e+00> : vector<2x128xf32>
    %7 = tpu.matmul %5, %6, %cst_7 {dimension_numbers = #tpu.dot_dimension_numbers<[1], [0], [0], [1], [0, 0, 1, 1], [], []>} : vector<2x128xf32>, vector<128x128xf32>, vector<2x128xf32> -> vector<2x128xf32>
    %c0_8 = arith.constant 0 : index
    %c0_9 = arith.constant 0 : index
    %8 = vector.load %arg5[%c0_8, %c0_9] : memref<1x128xf32, #tpu.memory_space<vmem>>, vector<1x128xf32>
    %9 = vector.broadcast %8 : vector<1x128xf32> to vector<2x128xf32>
    %10 = arith.addf %7, %9 : vector<2x128xf32>
    %c0_10 = arith.constant 0 : index
    %c0_11 = arith.constant 0 : index
    %11 = vector.load %arg6[%c0_10, %c0_11] : memref<2x128xf32, #tpu.memory_space<vmem>>, vector<2x128xf32>
    tpu.vector_store %arg6[%c0_10, %c0_11], %10 {strides = array<i32>} : memref<2x128xf32, #tpu.memory_space<vmem>>, vector<2x128xf32>,
    return
  }
  func.func @transform_0(%arg0: i32) -> (i32, i32) {
    %c0_i32 = arith.constant 0 : i32
    %c0_i32_0 = arith.constant 0 : i32
    %c0_i32_1 = arith.constant 0 : i32
    return %c0_i32, %c0_i32_0 : i32, i32
  }
  func.func @transform_1(%arg0: i32) -> (i32, i32) {
    %c0_i32 = arith.constant 0 : i32
    %c0_i32_0 = arith.constant 0 : i32
    %c0_i32_1 = arith.constant 0 : i32
    return %c0_i32, %c0_i32_0 : i32, i32
  }
  func.func @transform_2(%arg0: i32) -> (i32, i32) {
    %c0_i32 = arith.constant 0 : i32
    %c0_i32_0 = arith.constant 0 : i32
    %c0_i32_1 = arith.constant 0 : i32
    return %c0_i32, %c0_i32_0 : i32, i32
  }
  func.func @transform_3(%arg0: i32) -> (i32, i32) {
    %c0_i32 = arith.constant 0 : i32
    %c0_i32_0 = arith.constant 0 : i32
    %c0_i32_1 = arith.constant 0 : i32
    return %c0_i32, %c0_i32_0 : i32, i32
  }
  func.func @transform_4(%arg0: i32) -> (i32, i32) {
    %c0_i32 = arith.constant 0 : i32
    %c0_i32_0 = arith.constant 0 : i32
    %c0_i32_1 = arith.constant 0 : i32
    return %c0_i32, %c0_i32_0 : i32, i32
  }
  func.func @transform_5(%arg0: i32) -> (i32, i32) {
    %c0_i32 = arith.constant 0 : i32
    %c0_i32_0 = arith.constant 0 : i32
    %c0_i32_1 = arith.constant 0 : i32
    return %c0_i32, %c0_i32_0 : i32, i32
  }
}

module attributes {stable_mosaic.version = 11 : i64} {
  func.func @_linear_kernel(%arg0: i32, %arg1: i32, %arg2: i32, %arg3: memref<16x32xf32, #tpu.memory_space<vmem>>, %arg4: memref<32x16xf32, #tpu.memory_space<vmem>>, %arg5: memref<1x16xf32, #tpu.memory_space<vmem>>, %arg6: memref<16x16xf32, #tpu.memory_space<vmem>>, %arg7: memref<16x16xf32, #tpu.memory_space<vmem>>) attributes {dimension_semantics = [#tpu.dimension_semantics<parallel>, #tpu.dimension_semantics<parallel>, #tpu.dimension_semantics<arbitrary>], iteration_bounds = array<i64: 1, 1, 1>, scalar_prefetch = 0 : i64, scratch_operands = 1 : i64, tpu.core_type = #tpu.core_type<tc>, window_params = [{transform_indices = @transform_0, window_bounds = array<i64: 16, 32>}, {transform_indices = @transform_1, window_bounds = array<i64: 32, 16>}, {transform_indices = @transform_2, window_bounds = array<i64: 1, 16>}, {transform_indices = @transform_3, window_bounds = array<i64: 16, 16>}]} {
    %c0_i32 = arith.constant 0 : i32
    %0 = arith.cmpi eq, %arg2, %c0_i32 : i32
    %1 = arith.extui %0 : i1 to i32
    %c0_i32_0 = arith.constant 0 : i32
    %2 = arith.cmpi ne, %1, %c0_i32_0 : i32
    scf.if %2 {
      %cst_10 = arith.constant 0.000000e+00 : f32
      %12 = vector.broadcast %cst_10 : f32 to vector<16x16xf32>
      %c0_11 = arith.constant 0 : index
      %c0_12 = arith.constant 0 : index
      %13 = vector.load %arg7[%c0_11, %c0_12] : memref<16x16xf32, #tpu.memory_space<vmem>>, vector<16x16xf32>
      tpu.vector_store %arg7[%c0_11, %c0_12], %12 {strides = array<i32>} : memref<16x16xf32, #tpu.memory_space<vmem>>, vector<16x16xf32>,
    } else {
    }
    %c0 = arith.constant 0 : index
    %c0_1 = arith.constant 0 : index
    %3 = vector.load %arg7[%c0, %c0_1] : memref<16x16xf32, #tpu.memory_space<vmem>>, vector<16x16xf32>
    %c0_2 = arith.constant 0 : index
    %c0_3 = arith.constant 0 : index
    %4 = vector.load %arg3[%c0_2, %c0_3] : memref<16x32xf32, #tpu.memory_space<vmem>>, vector<16x32xf32>
    %c0_4 = arith.constant 0 : index
    %c0_5 = arith.constant 0 : index
    %5 = vector.load %arg4[%c0_4, %c0_5] : memref<32x16xf32, #tpu.memory_space<vmem>>, vector<32x16xf32>
    %cst = arith.constant dense<0.000000e+00> : vector<16x16xf32>
    %6 = tpu.matmul %4, %5, %cst {dimension_numbers = #tpu.dot_dimension_numbers<[1], [0], [0], [1], [0, 0, 1, 1], [], []>} : vector<16x32xf32>, vector<32x16xf32>, vector<16x16xf32> -> vector<16x16xf32>
    %7 = arith.addf %3, %6 : vector<16x16xf32>
    %c0_6 = arith.constant 0 : index
    %c0_7 = arith.constant 0 : index
    %8 = vector.load %arg7[%c0_6, %c0_7] : memref<16x16xf32, #tpu.memory_space<vmem>>, vector<16x16xf32>
    tpu.vector_store %arg7[%c0_6, %c0_7], %7 {strides = array<i32>} : memref<16x16xf32, #tpu.memory_space<vmem>>, vector<16x16xf32>,
    %c0_i32_8 = arith.constant 0 : i32
    %9 = arith.cmpi eq, %arg2, %c0_i32_8 : i32
    %10 = arith.extui %9 : i1 to i32
    %c0_i32_9 = arith.constant 0 : i32
    %11 = arith.cmpi ne, %10, %c0_i32_9 : i32
    scf.if %11 {
      %c0_10 = arith.constant 0 : index
      %c0_11 = arith.constant 0 : index
      %12 = vector.load %arg7[%c0_10, %c0_11] : memref<16x16xf32, #tpu.memory_space<vmem>>, vector<16x16xf32>
      %c0_12 = arith.constant 0 : index
      %c0_13 = arith.constant 0 : index
      %13 = vector.load %arg5[%c0_12, %c0_13] : memref<1x16xf32, #tpu.memory_space<vmem>>, vector<1x16xf32>
      %14 = vector.broadcast %13 : vector<1x16xf32> to vector<16x16xf32>
      %15 = arith.addf %12, %14 : vector<16x16xf32>
      %c0_14 = arith.constant 0 : index
      %c0_15 = arith.constant 0 : index
      %16 = vector.load %arg6[%c0_14, %c0_15] : memref<16x16xf32, #tpu.memory_space<vmem>>, vector<16x16xf32>
      tpu.vector_store %arg6[%c0_14, %c0_15], %15 {strides = array<i32>} : memref<16x16xf32, #tpu.memory_space<vmem>>, vector<16x16xf32>,
    } else {
    }
    return
  }
  func.func @transform_0(%arg0: i32, %arg1: i32, %arg2: i32) -> (i32, i32) {
    %c0_i32 = arith.constant 0 : i32
    return %arg0, %arg2 : i32, i32
  }
  func.func @transform_1(%arg0: i32, %arg1: i32, %arg2: i32) -> (i32, i32) {
    %c0_i32 = arith.constant 0 : i32
    return %arg2, %arg1 : i32, i32
  }
  func.func @transform_2(%arg0: i32, %arg1: i32, %arg2: i32) -> (i32, i32) {
    %c0_i32 = arith.constant 0 : i32
    %c0_i32_0 = arith.constant 0 : i32
    return %c0_i32, %arg1 : i32, i32
  }
  func.func @transform_3(%arg0: i32, %arg1: i32, %arg2: i32) -> (i32, i32) {
    %c0_i32 = arith.constant 0 : i32
    return %arg0, %arg1 : i32, i32
  }
}

</mosaic_0001>

<bundles_post_ra>
// kernel: transformer_encoder_forward.13
= control target key start
LH: loop header
LB: loop body
LE: loop exit
PB: predicated region body
PF: predicated region fallthrough
CT: control target
= control target key end

     0   :  { %vm30_vm0 = vcmask 130048   ;;  %vm21_vm1 = vcmask 261120   ;;  %v156_v3 = vmov 0.0   ;;  %s215_s1 = inlined_call_operand.vmem [shape: f32[16,32], index: 1, kind: input, shape index: {}]   ;;  %s216_s0 = inlined_call_operand.vmem [shape: f32[16,16], index: 0, kind: input, shape index: {}]   ;;  %s217_s2 = inlined_call_operand.vmem [shape: f32[1,32], index: 2, kind: input, shape index: {}]   ;;  %s218_s3 = inlined_call_operand.vmem [shape: f32[16,32], index: 3, kind: input, shape index: {}]   ;;  %s219_s4 = inlined_call_operand.vmem [shape: f32[16,32], index: 4, kind: output, shape index: {}]  }
   0x1   :  { %v29_v0 = vld [vmem:[%s215_s1 + $0x8] sm:$0xff]  ;;  %v28_v1 = vld [vmem:[%s215_s1] sm:$0xff]  ;;  %23 = vst.msk [vmem:[#allocation2 + $0x8] sm:$0xff] %vm21_vm1, %v156_v3  ;;  %22 = vst.msk [vmem:[#allocation2] sm:$0xff] %vm21_vm1, %v156_v3 }
   0x2   :  { %v26_v2 = vld [vmem:[%s216_s0] sm:$0xff]  ;;  %148 = vmatprep.subr.mxu0 %v29_v0  ;;  %v27_v4 = vld [vmem:[%s216_s0 + $0x8] sm:$0xff] }
   0x3   :  { %152 = vmatprep.mubr.msk.f32.mxu0 %vm30_vm0, %v26_v2  ;;  %149 = vmatpush3.msra.mxu0 %v29_v0  ;;  %v143_v11 = vld [vmem:[%s217_s2] ss:$0 sm:$0xff]  ;;  %v132_v13 = vld [vmem:[%s218_s3 + $0x8] sm:$0xff] }
   0x4   :  { %150 = vmatprep.subr.mxu0 %v28_v1  ;;  %v131_v15 = vld [vmem:[%s218_s3] sm:$0xff] }
   0x5   :  { %151 = vmatpush3.msra.mxu0 %v28_v1 }
   0x6   :  { %153 = vmatmul.mubr.msk.f32.vlgmr.msra.gmra.mxu0 %vm30_vm0, %v27_v4 }
   0x8   :  { %v25_v5 = vld [vmem:[#allocation2 + $0x8] sm:$0xff]  ;;  %v24_v7 = vld [vmem:[#allocation2] sm:$0xff] }
  0xc6   :  { %v154_v6 = vpop.f32.mrf.mxu0 }
  0xc7   :  { %v113_v8 = vadd.f32 %v154_v6, %v25_v5 }
  0xc8   :  { %v103_v9 = vpop.f32.mrf.mxu0 }
  0xc9   :  { %116 = vst.msk [vmem:[#allocation2 + $0x8] sm:$0xff] %vm21_vm1, %v113_v8  ;;  %v112_v10 = vadd.f32 %v103_v9, %v24_v7 }
  0xcb   :  { %115 = vst.msk [vmem:[#allocation2] sm:$0xff] %vm21_vm1, %v112_v10 }
  0xd0   :  { %v121_v12 = vld [vmem:[#allocation2 + $0x8] sm:$0xff] }
  0xd1   :  { %v130_v14 = vadd.f32 %v143_v11, %v121_v12 }
  0xd2   :  { %v120_v16 = vld [vmem:[#allocation2] sm:$0xff] }
  0xd3   :  { %v134_v17 = vadd.f32 %v132_v13, %v130_v14  ;;  %v129_v18 = vadd.f32 %v143_v11, %v120_v16 }
  0xd5   :  { %136 = vst.msk [vmem:[%s219_s4 + $0x8] sm:$0xff] %vm21_vm1, %v134_v17  ;;  %v133_v19 = vadd.f32 %v131_v15, %v129_v18 }
  0xd7   :  { %135 = vst.msk [vmem:[%s219_s4] sm:$0xff] %vm21_vm1, %v133_v19 }

// kernel: transformer_encoder_forward.14
= control target key start
LH: loop header
LB: loop body
LE: loop exit
PB: predicated region body
PF: predicated region fallthrough
CT: control target
= control target key end

     0   :  { %vm29_vm0 = vcmask 261120   ;;  %vm18_vm1 = vcmask 785408   ;;  %v157_v2 = vmov 0.0   ;;  %s213_s1 = inlined_call_operand.vmem [shape: f32[32,96], index: 1, kind: input, shape index: {}]   ;;  %s214_s0 = inlined_call_operand.vmem [shape: f32[16,32], index: 0, kind: input, shape index: {}]   ;;  %s215_s2 = inlined_call_operand.vmem [shape: f32[1,96], index: 2, kind: input, shape index: {}]   ;;  %s216_s3 = inlined_call_operand.vmem [shape: f32[16,96], index: 3, kind: output, shape index: {}]  }
   0x1   :  { %v28_v0 = vld [vmem:[%s213_s1 + $0x18] sm:$0xff]  ;;  %v27_v1 = vld [vmem:[%s213_s1 + $0x10] sm:$0xff]  ;;  %20 = vst.msk [vmem:[#allocation2 + $0x8] sm:$0xff] %vm18_vm1, %v157_v2  ;;  %19 = vst.msk [vmem:[#allocation2] sm:$0xff] %vm18_vm1, %v157_v2 }
   0x2   :  { %145 = vmatprep.subr.mxu0 %v28_v0  ;;  %v23_v3 = vld [vmem:[%s214_s0] sm:$0xff]  ;;  %v26_v4 = vld [vmem:[%s213_s1 + $0x8] sm:$0xff] }
   0x3   :  { %146 = vmatpush3.msra.mxu0 %v28_v0  ;;  %153 = vmatprep.mubr.msk.f32.mxu0 %vm29_vm0, %v23_v3  ;;  %v25_v5 = vld [vmem:[%s213_s1] sm:$0xff]  ;;  %v24_v6 = vld [vmem:[%s214_s0 + $0x8] sm:$0xff] }
   0x4   :  { %147 = vmatprep.subr.mxu0 %v27_v1  ;;  %v138_v13 = vld [vmem:[%s215_s2] ss:$0 sm:$0xff] }
   0x5   :  { %148 = vmatpush3.msra.mxu0 %v27_v1 }
   0x6   :  { %149 = vmatprep.subr.mxu0 %v26_v4 }
   0x7   :  { %150 = vmatpush3.msra.mxu0 %v26_v4 }
   0x8   :  { %151 = vmatprep.subr.mxu0 %v25_v5  ;;  %v22_v7 = vld [vmem:[#allocation2 + $0x8] sm:$0xff]  ;;  %v21_v9 = vld [vmem:[#allocation2] sm:$0xff] }
   0x9   :  { %152 = vmatpush3.msra.mxu0 %v25_v5 }
   0xa   :  { %154 = vmatmul.mubr.msk.f32.vlgmr.msra.gmra.mxu0 %vm29_vm0, %v24_v6 }
  0xca   :  { %v155_v8 = vpop.f32.mrf.mxu0 }
  0xcb   :  { %v112_v10 = vadd.f32 %v155_v8, %v22_v7 }
  0xcc   :  { %v102_v11 = vpop.f32.mrf.mxu0 }
  0xcd   :  { %115 = vst.msk [vmem:[#allocation2 + $0x8] sm:$0xff] %vm18_vm1, %v112_v10  ;;  %v111_v12 = vadd.f32 %v102_v11, %v21_v9 }
  0xcf   :  { %114 = vst.msk [vmem:[#allocation2] sm:$0xff] %vm18_vm1, %v111_v12 }
  0xd4   :  { %v120_v14 = vld [vmem:[#allocation2 + $0x8] sm:$0xff] }
  0xd5   :  { %v129_v15 = vadd.f32 %v138_v13, %v120_v14 }
  0xd6   :  { %v119_v16 = vld [vmem:[#allocation2] sm:$0xff] }
  0xd7   :  { %131 = vst.msk [vmem:[%s216_s3 + $0x8] sm:$0xff] %vm18_vm1, %v129_v15  ;;  %v128_v17 = vadd.f32 %v138_v13, %v119_v16 }
  0xd9   :  { %130 = vst.msk [vmem:[%s216_s3] sm:$0xff] %vm18_vm1, %v128_v17 }

// kernel: transformer_encoder_forward.16
= control target key start
LH: loop header
LB: loop body
LE: loop exit
PB: predicated region body
PF: predicated region fallthrough
CT: control target
= control target key end

     0   :  { %vm27_vm0 = vcmask 261120   ;;  %v220_v2 = vmov 0.0   ;;  %s307_s1 = inlined_call_operand.vmem [shape: f32[32,32], index: 1, kind: input, shape index: {}]   ;;  %s308_s0 = inlined_call_operand.vmem [shape: f32[16,32], index: 0, kind: input, shape index: {}]   ;;  %s309_s2 = inlined_call_operand.vmem [shape: f32[1,32], index: 2, kind: input, shape index: {}]   ;;  %s310_s3 = inlined_call_operand.vmem [shape: f32[16,32], index: 3, kind: input, shape index: {}]   ;;  %s311_s4 = inlined_call_operand.vmem [shape: f32[1,32], index: 4, kind: input, shape index: {}]   ;;  %s312_s5 = inlined_call_operand.vmem [shape: f32[1,32], index: 5, kind: input, shape index: {}]   ;;  %s313_s6 = inlined_call_operand.vmem [shape: f32[16,32], index: 6, kind: output, shape index: {}]  }
   0x1   :  { %v37_v0 = vld [vmem:[%s307_s1 + $0x18] sm:$0xff]  ;;  %v36_v1 = vld [vmem:[%s307_s1 + $0x10] sm:$0xff]  ;;  %29 = vst.msk [vmem:[#allocation2 + $0x8] sm:$0xff] %vm27_vm0, %v220_v2  ;;  %28 = vst.msk [vmem:[#allocation2] sm:$0xff] %vm27_vm0, %v220_v2 }
   0x2   :  { %204 = vmatprep.subr.mxu0 %v37_v0  ;;  %v32_v3 = vld [vmem:[%s308_s0] sm:$0xff]  ;;  %v35_v4 = vld [vmem:[%s307_s1 + $0x8] sm:$0xff] }
   0x3   :  { %205 = vmatpush3.msra.mxu0 %v37_v0  ;;  %212 = vmatprep.mubr.msk.f32.mxu0 %vm27_vm0, %v32_v3  ;;  %v34_v5 = vld [vmem:[%s307_s1] sm:$0xff]  ;;  %v33_v6 = vld [vmem:[%s308_s0 + $0x8] sm:$0xff] }
   0x4   :  { %206 = vmatprep.subr.mxu0 %v36_v1  ;;  %v195_v13 = vld [vmem:[%s309_s2] ss:$0 sm:$0xff]  ;;  %v139_v19 = vld [vmem:[%s310_s3 + $0x8] sm:$0xff] }
   0x5   :  { %207 = vmatpush3.msra.mxu0 %v36_v1  ;;  %v138_v16 = vld [vmem:[%s310_s3] sm:$0xff] }
   0x6   :  { %208 = vmatprep.subr.mxu0 %v35_v4  ;;  %v196_v41 = vld [vmem:[%s311_s4] ss:$0 sm:$0xff] }
   0x7   :  { %209 = vmatpush3.msra.mxu0 %v35_v4  ;;  %v197_v43 = vld [vmem:[%s312_s5] ss:$0 sm:$0xff] }
   0x8   :  { %210 = vmatprep.subr.mxu0 %v34_v5  ;;  %v31_v7 = vld [vmem:[#allocation2 + $0x8] sm:$0xff]  ;;  %v30_v9 = vld [vmem:[#allocation2] sm:$0xff] }
   0x9   :  { %211 = vmatpush3.msra.mxu0 %v34_v5 }
   0xa   :  { %213 = vmatmul.mubr.msk.f32.vlgmr.msra.gmra.mxu0 %vm27_vm0, %v33_v6 }
  0xca   :  { %v214_v8 = vpop.f32.mrf.mxu0 }
  0xcb   :  { %v121_v10 = vadd.f32 %v214_v8, %v31_v7 }
  0xcc   :  { %v111_v11 = vpop.f32.mrf.mxu0 }
  0xcd   :  { %123 = vst.msk [vmem:[#allocation2 + $0x8] sm:$0xff] %vm27_vm0, %v121_v10  ;;  %v120_v12 = vadd.f32 %v111_v11, %v30_v9 }
  0xcf   :  { %122 = vst.msk [vmem:[#allocation2] sm:$0xff] %vm27_vm0, %v120_v12 }
  0xd4   :  { %v128_v14 = vld [vmem:[#allocation2 + $0x8] sm:$0xff] }
  0xd5   :  { %v137_v18 = vadd.f32 %v195_v13, %v128_v14 }
  0xd6   :  { %v127_v15 = vld [vmem:[#allocation2] sm:$0xff] }
  0xd7   :  { %v136_v17 = vadd.f32 %v195_v13, %v127_v15  ;;  %v141_v22 = vadd.f32 %v139_v19, %v137_v18 }
  0xd9   :  { %v140_v20 = vadd.f32 %v138_v16, %v136_v17  ;;  %v145_v23 = vsel %vm27_vm0, %v141_v22, 0.0 }
  0xdb   :  { %v142_v21 = vsel %vm27_vm0, %v140_v20, 0.0 }
  0xdc   :  { %143 = vadd.xlane.f32.xlu0 %v142_v21 }
  0xe0   :  { %146 = vadd.xlane.f32.xlu0 %v145_v23 }
 0x165   :  { %v144_v24 = vpop.xlane.xlu0 %143 }
 0x166   :  { %v149_v25 = vmul.f32 0.03125, %v144_v24 }
 0x168   :  { %v151_v26 = vsub.f32 %v140_v20, %v149_v25 }
 0x169   :  { %v147_v27 = vpop.xlane.xlu0 %146 }
 0x16a   :  { %v150_v28 = vmul.f32 0.03125, %v147_v27  ;;  %v153_v29 = vmul.f32 %v151_v26, %v151_v26 }
 0x16c   :  { %v152_v30 = vsub.f32 %v141_v22, %v150_v28  ;;  %v155_v31 = vsel %vm27_vm0, %v153_v29, 0.0 }
 0x16d   :  { %156 = vadd.xlane.f32.xlu1 %v155_v31 }
 0x16e   :  { %v154_v32 = vmul.f32 %v152_v30, %v152_v30 }
 0x170   :  { %v158_v33 = vsel %vm27_vm0, %v154_v32, 0.0 }
 0x171   :  { %159 = vadd.xlane.f32.xlu1 %v158_v33 }
 0x1f6   :  { %v157_v34 = vpop.xlane.xlu1 %156 }
 0x1f7   :  { %v161_v35 = vmul.f32 0.03125, %v157_v34 }
 0x1f9   :  { %v163_v36 = vadd.f32 1e-05, %v161_v35 }
 0x1fa   :  { %v160_v37 = vpop.xlane.xlu1 %159 }
 0x1fb   :  { %216 = vrsqrt.f32 %v163_v36  ;;  %v162_v38 = vmul.f32 0.03125, %v160_v37 }
 0x1fd   :  { %v164_v39 = vadd.f32 1e-05, %v162_v38 }
 0x1ff   :  { %218 = vrsqrt.f32 %v164_v39 }
 0x208   :  { %v217_v40 = vpop.eup %216 }
 0x209   :  { %v167_v42 = vmul.f32 %v217_v40, %v151_v26 }
 0x20b   :  { %v176_v44 = vmul.f32 %v196_v41, %v167_v42 }
 0x20c   :  { %v219_v45 = vpop.eup %218 }
 0x20d   :  { %v185_v46 = vadd.f32 %v197_v43, %v176_v44  ;;  %v168_v47 = vmul.f32 %v219_v45, %v152_v30 }
 0x20f   :  { %187 = vst.msk [vmem:[%s313_s6] sm:$0xff] %vm27_vm0, %v185_v46  ;;  %v177_v48 = vmul.f32 %v196_v41, %v168_v47 }
 0x211   :  { %v186_v49 = vadd.f32 %v197_v43, %v177_v48 }
 0x213   :  { %188 = vst.msk [vmem:[%s313_s6 + $0x8] sm:$0xff] %vm27_vm0, %v186_v49 }

// kernel: transformer_encoder_forward.17
= control target key start
LH: loop header
LB: loop body
LE: loop exit
PB: predicated region body
PF: predicated region fallthrough
CT: control target
= control target key end

     0   :  { %vm28_vm0 = vcmask 261120   ;;  %s205_s1 = inlined_call_operand.vmem [shape: f32[32,128], index: 1, kind: input, shape index: {}]   ;;  %s206_s0 = inlined_call_operand.vmem [shape: f32[16,32], index: 0, kind: input, shape index: {}]   ;;  %s207_s2 = inlined_call_operand.vmem [shape: f32[1,128], index: 2, kind: input, shape index: {}]   ;;  %s208_s3 = inlined_call_operand.vmem [shape: f32[16,128], index: 3, kind: output, shape index: {}]  }
   0x1   :  { %v27_v0 = vld [vmem:[%s205_s1 + $0x18] sm:$0xff]  ;;  %v26_v1 = vld [vmem:[%s205_s1 + $0x10] sm:$0xff]  ;;  %v22_v2 = vld [vmem:[%s206_s0] sm:$0xff] }
   0x2   :  { %145 = vmatprep.subr.mxu0 %v27_v0  ;;  %v25_v3 = vld [vmem:[%s205_s1 + $0x8] sm:$0xff]  ;;  %153 = vmatprep.mubr.msk.f32.mxu0 %vm28_vm0, %v22_v2  ;;  %v24_v4 = vld [vmem:[%s205_s1] sm:$0xff] }
   0x3   :  { %146 = vmatpush3.msra.mxu0 %v27_v0  ;;  %v23_v5 = vld [vmem:[%s206_s0 + $0x8] sm:$0xff]  ;;  %v138_v6 = vld [vmem:[%s207_s2] ss:$0 sm:$0xff] }
   0x4   :  { %147 = vmatprep.subr.mxu0 %v26_v1 }
   0x5   :  { %148 = vmatpush3.msra.mxu0 %v26_v1 }
   0x6   :  { %149 = vmatprep.subr.mxu0 %v25_v3 }
   0x7   :  { %150 = vmatpush3.msra.mxu0 %v25_v3 }
   0x8   :  { %151 = vmatprep.subr.mxu0 %v24_v4 }
   0x9   :  { %152 = vmatpush3.msra.mxu0 %v24_v4 }
   0xa   :  { %154 = vmatmul.mubr.msk.f32.vlgmr.msra.gmra.mxu0 %vm28_vm0, %v23_v5 }
  0xca   :  { %v155_v7 = vpop.f32.mrf.mxu0 }
  0xcb   :  { %v127_v8 = vadd.f32 %v155_v7, %v138_v6 }
  0xcc   :  { %v101_v9 = vpop.f32.mrf.mxu0 }
  0xcd   :  { %v129_v10 = vmax.f32 %v127_v8, 0.0  ;;  %v126_v11 = vadd.f32 %v138_v6, %v101_v9 }
  0xcf   :  { %131 = vst [vmem:[%s208_s3 + $0x8] sm:$0xff] %v129_v10  ;;  %v128_v12 = vmax.f32 %v126_v11, 0.0 }
  0xd1   :  { %130 = vst [vmem:[%s208_s3] sm:$0xff] %v128_v12 }

// kernel: transformer_encoder_forward.25
= control target key start
LH: loop header
LB: loop body
LE: loop exit
PB: predicated region body
PF: predicated region fallthrough
CT: control target
= control target key end

     0   :  { %v311_v1 = vmov 0.0   ;;  %vm312_vm0 = vmmov 0   ;;  %vm33_vm1 = vcmask 261120   ;;  %s440_s0 = inlined_call_operand.vmem [shape: f32[2,32], index: 0, kind: input, shape index: {}]   ;;  %s441_s1 = inlined_call_operand.vmem [shape: f32[32,128], index: 1, kind: input, shape index: {}]   ;;  %s442_s2 = inlined_call_operand.vmem [shape: f32[1,128], index: 2, kind: input, shape index: {}]   ;;  %s443_s3 = inlined_call_operand.vmem [shape: f32[128,128], index: 3, kind: input, shape index: {}]   ;;  %s444_s4 = inlined_call_operand.vmem [shape: f32[1,128], index: 4, kind: input, shape index: {}]   ;;  %s445_s5 = inlined_call_operand.hbm [shape: f32[2,128], index: 5, kind: output, shape index: {}]  }
   0x1   :  { %v25_v0 = vld [vmem:[%s441_s1 + $0x18] sm:$0xff]  ;;  %240 = vmatprep.subr.mxu0 %v311_v1  ;;  %v24_v2 = vld [vmem:[%s441_s1 + $0x10] sm:$0xff]  ;;  %248 = vmatprep.mubr.msk.f32.mxu0 %vm312_vm0, %v311_v1  ;;  %v23_v5 = vld [vmem:[%s441_s1 + $0x8] sm:$0xff] }
   0x2   :  { %v122_v3 = vld [vmem:[%s443_s3 + $0x78] sm:$0xff]  ;;  %241 = vmatpush3.msra.mxu0 %v25_v0  ;;  %251 = vmatprep.subr.mxu1 %v311_v1  ;;  %v121_v4 = vld [vmem:[%s443_s3 + $0x70] sm:$0xff]  ;;  %v120_v6 = vld [vmem:[%s443_s3 + $0x68] sm:$0xff] }
   0x3   :  { %242 = vmatprep.subr.mxu0 %v311_v1  ;;  %252 = vmatpush3.msra.mxu1 %v122_v3  ;;  %v22_v7 = vld [vmem:[%s441_s1] sm:$0xff] }
   0x4   :  { %243 = vmatpush3.msra.mxu0 %v24_v2  ;;  %253 = vmatprep.subr.mxu1 %v311_v1  ;;  %v21_v8 = vld [vmem:[%s440_s0] sm:$0x3] }
   0x5   :  { %244 = vmatprep.subr.mxu0 %v311_v1  ;;  %254 = vmatpush3.msra.mxu1 %v121_v4  ;;  %v119_v9 = vld [vmem:[%s443_s3 + $0x60] sm:$0xff] }
   0x6   :  { %245 = vmatpush3.msra.mxu0 %v23_v5  ;;  %255 = vmatprep.subr.mxu1 %v311_v1 }
   0x7   :  { %10 = vsyncpa [#allocation3], 0  ;;  %246 = vmatprep.subr.mxu0 %v311_v1  ;;  %256 = vmatpush3.msra.mxu1 %v120_v6  ;;  %v118_v10 = vld [vmem:[%s443_s3 + $0x58] sm:$0xff]  ;;  %v117_v11 = vld [vmem:[%s443_s3 + $0x50] sm:$0xff]  ;;  %s313_s11 = smov [#allocation2]  }
   0x8   :  { %247 = vmatpush3.msra.mxu0 %v22_v7  ;;  %257 = vmatprep.subr.mxu1 %v311_v1  ;;  %v116_v12 = vld [vmem:[%s443_s3 + $0x48] sm:$0xff]  ;;  %v115_v13 = vld [vmem:[%s443_s3 + $0x40] sm:$0xff]  ;;  %v114_v14 = vld [vmem:[%s443_s3 + $0x38] sm:$0xff]  ;;  %s207_s0 = sshll.u32 %s313_s11, 4  ;;  %s208_s0 = int_to_ptr.vmem [resolvable:$true] %s207_s0 }
   0x9   :  { %249 = vmatmul.mubr.msk.f32.vlgmr.msra.gmra.mxu0 %vm33_vm1, %v21_v8  ;;  %258 = vmatpush3.msra.mxu1 %v119_v9  ;;  %v113_v15 = vld [vmem:[%s443_s3 + $0x30] sm:$0xff]  ;;  %v112_v16 = vld [vmem:[%s443_s3 + $0x28] sm:$0xff]  ;;  %v111_v17 = vld [vmem:[%s443_s3 + $0x20] sm:$0xff]  ;;  %p294_p1 = scmp.lt.s32.totalorder %s208_s0, %s208_s0 }
   0xa   :  { %259 = vmatprep.subr.mxu1 %v311_v1  ;;  %283 = vmatprep.mubr.msk.f32.mxu1 %vm312_vm0, %v311_v1  ;;  %v110_v18 = vld [vmem:[%s443_s3 + $0x18] sm:$0xff]  ;;  %v109_v19 = vld [vmem:[%s443_s3 + $0x10] sm:$0xff]  ;;  %v108_v20 = vld [vmem:[%s443_s3 + $0x8] sm:$0xff] }
   0xb   :  { %260 = vmatpush3.msra.mxu1 %v118_v10  ;;  %v107_v21 = vld [vmem:[%s443_s3] sm:$0xff]  ;;  %s289_s3 = scalar_lea.vmem %s208_s0, 32 }
   0xc   :  { %261 = vmatprep.subr.mxu1 %v311_v1  ;;  %v215_v22 = vld [vmem:[%s442_s2] ss:$0 sm:$0xff]  ;;  %p290_p0 = scmp.ne.s32.totalorder %s208_s0, %s289_s3  ;;  %p295_p2 = scmp.lt.s32.totalorder %s289_s3, %s289_s3 }
   0xd   :  { %262 = vmatpush3.msra.mxu1 %v117_v11  ;;  %v217_v26 = vld [vmem:[%s444_s4] ss:$0 sm:$0xff] }
   0xe   :  { %263 = vmatprep.subr.mxu1 %v311_v1  ;;  %p296_p3 = por %p295_p2, %p294_p1 }
   0xf   :  { %264 = vmatpush3.msra.mxu1 %v116_v12 }
  0x10   :  { %265 = vmatprep.subr.mxu1 %v311_v1  ;;  %p297_p4 = pnand %p296_p3, %p290_p0 }
  0x11   :  { %266 = vmatpush3.msra.mxu1 %v115_v13 }
  0x12   :  { %267 = vmatprep.subr.mxu1 %v311_v1 }
  0x13   :  { %268 = vmatpush3.msra.mxu1 %v114_v14 }
  0x14   :  { %269 = vmatprep.subr.mxu1 %v311_v1 }
  0x15   :  { %270 = vmatpush3.msra.mxu1 %v113_v15 }
  0x16   :  { %271 = vmatprep.subr.mxu1 %v311_v1 }
  0x17   :  { %272 = vmatpush3.msra.mxu1 %v112_v16 }
  0x18   :  { %273 = vmatprep.subr.mxu1 %v311_v1 }
  0x19   :  { %274 = vmatpush3.msra.mxu1 %v111_v17 }
  0x1a   :  { %275 = vmatprep.subr.mxu1 %v311_v1 }
  0x1b   :  { %276 = vmatpush3.msra.mxu1 %v110_v18 }
  0x1c   :  { %277 = vmatprep.subr.mxu1 %v311_v1 }
  0x1d   :  { %278 = vmatpush3.msra.mxu1 %v109_v19 }
  0x1e   :  { %279 = vmatprep.subr.mxu1 %v311_v1 }
  0x1f   :  { %280 = vmatpush3.msra.mxu1 %v108_v20 }
  0x20   :  { %281 = vmatprep.subr.mxu1 %v311_v1 }
  0x21   :  { %282 = vmatpush3.msra.mxu1 %v107_v21 }
  0xc9   :  { %v103_v23 = vpop.f32.mrf.mxu0 }
  0xca   :  { %v104_v24 = vadd.f32 %v215_v22, %v103_v23 }
  0xcb   :  { %v250_v25 = vpop.f32.mrf.mxu0 }
  0xcc   :  { %284 = vmatmul.mubr.f32.vlgmr.msra.gmra.mxu1 %v104_v24 }
 0x18c   :  { %v196_v27 = vpop.f32.mrf.mxu1 }
 0x18d   :  { %v197_v28 = vadd.f32 %v217_v26, %v196_v27 }
 0x18e   :  { %v285_v29 = vpop.f32.mrf.mxu1 }
 0x18f   :  { %200 = vst [vmem:[#allocation2] sm:$0x3] %v197_v28 }
 0x190   :  { %300 = shalt.err (!%p297_p4)
}
 0x191   :  { %210 = dma.vmem_to_hbm [thread:$0]  %s208_s0, 32, %s445_s5, [#allocation3]  }
 0x192   :  { %309 = dma.done.wait [#allocation3], 32  }
 0x193   :  { %310 = vsyncadd [#allocation3], 4294967264 }
 0x194   :  { %214 = vsyncpa [#allocation3], 1 }

// kernel: transformer_encoder_forward.18
= control target key start
LH: loop header
LB: loop body
LE: loop exit
PB: predicated region body
PF: predicated region fallthrough
CT: control target
= control target key end

     0   :  { %vm27_vm0 = vcmask 261120   ;;  %v260_v2 = vmov 0.0   ;;  %s381_s1 = inlined_call_operand.vmem [shape: f32[128,32], index: 1, kind: input, shape index: {}]   ;;  %s382_s0 = inlined_call_operand.vmem [shape: f32[16,128], index: 0, kind: input, shape index: {}]   ;;  %s383_s2 = inlined_call_operand.vmem [shape: f32[1,32], index: 2, kind: input, shape index: {}]   ;;  %s384_s3 = inlined_call_operand.vmem [shape: f32[16,32], index: 3, kind: input, shape index: {}]   ;;  %s385_s4 = inlined_call_operand.vmem [shape: f32[1,32], index: 4, kind: input, shape index: {}]   ;;  %s386_s5 = inlined_call_operand.vmem [shape: f32[1,32], index: 5, kind: input, shape index: {}]   ;;  %s387_s6 = inlined_call_operand.vmem [shape: f32[16,32], index: 6, kind: output, shape index: {}]  }
   0x1   :  { %v49_v0 = vld [vmem:[%s381_s1 + $0x78] sm:$0xff]  ;;  %v48_v1 = vld [vmem:[%s381_s1 + $0x70] sm:$0xff]  ;;  %29 = vst.msk [vmem:[#allocation2 + $0x8] sm:$0xff] %vm27_vm0, %v260_v2  ;;  %28 = vst.msk [vmem:[#allocation2] sm:$0xff] %vm27_vm0, %v260_v2 }
   0x2   :  { %220 = vmatprep.subr.mxu0 %v49_v0  ;;  %v47_v3 = vld [vmem:[%s381_s1 + $0x68] sm:$0xff]  ;;  %v46_v4 = vld [vmem:[%s381_s1 + $0x60] sm:$0xff]  ;;  %v45_v6 = vld [vmem:[%s381_s1 + $0x58] sm:$0xff] }
   0x3   :  { %221 = vmatpush3.msra.mxu0 %v49_v0  ;;  %v32_v5 = vld [vmem:[%s382_s0] sm:$0xff]  ;;  %v44_v7 = vld [vmem:[%s381_s1 + $0x50] sm:$0xff]  ;;  %v43_v8 = vld [vmem:[%s381_s1 + $0x48] sm:$0xff] }
   0x4   :  { %222 = vmatprep.subr.mxu0 %v48_v1  ;;  %252 = vmatprep.mubr.f32.mxu0 %v32_v5  ;;  %v42_v9 = vld [vmem:[%s381_s1 + $0x40] sm:$0xff]  ;;  %v41_v10 = vld [vmem:[%s381_s1 + $0x38] sm:$0xff]  ;;  %v40_v11 = vld [vmem:[%s381_s1 + $0x30] sm:$0xff] }
   0x5   :  { %223 = vmatpush3.msra.mxu0 %v48_v1  ;;  %v39_v12 = vld [vmem:[%s381_s1 + $0x28] sm:$0xff]  ;;  %v38_v13 = vld [vmem:[%s381_s1 + $0x20] sm:$0xff]  ;;  %v37_v14 = vld [vmem:[%s381_s1 + $0x18] sm:$0xff] }
   0x6   :  { %224 = vmatprep.subr.mxu0 %v47_v3  ;;  %v36_v15 = vld [vmem:[%s381_s1 + $0x10] sm:$0xff]  ;;  %v35_v16 = vld [vmem:[%s381_s1 + $0x8] sm:$0xff]  ;;  %v34_v17 = vld [vmem:[%s381_s1] sm:$0xff] }
   0x7   :  { %225 = vmatpush3.msra.mxu0 %v47_v3  ;;  %v33_v18 = vld [vmem:[%s382_s0 + $0x8] sm:$0xff]  ;;  %v199_v25 = vld [vmem:[%s383_s2] ss:$0 sm:$0xff] }
   0x8   :  { %226 = vmatprep.subr.mxu0 %v46_v4  ;;  %v31_v19 = vld [vmem:[#allocation2 + $0x8] sm:$0xff]  ;;  %v30_v21 = vld [vmem:[#allocation2] sm:$0xff] }
   0x9   :  { %227 = vmatpush3.msra.mxu0 %v46_v4  ;;  %v144_v28 = vld [vmem:[%s384_s3] sm:$0xff]  ;;  %v145_v31 = vld [vmem:[%s384_s3 + $0x8] sm:$0xff] }
   0xa   :  { %228 = vmatprep.subr.mxu0 %v45_v6  ;;  %v200_v53 = vld [vmem:[%s385_s4] ss:$0 sm:$0xff] }
   0xb   :  { %229 = vmatpush3.msra.mxu0 %v45_v6  ;;  %v201_v55 = vld [vmem:[%s386_s5] ss:$0 sm:$0xff] }
   0xc   :  { %230 = vmatprep.subr.mxu0 %v44_v7 }
   0xd   :  { %231 = vmatpush3.msra.mxu0 %v44_v7 }
   0xe   :  { %232 = vmatprep.subr.mxu0 %v43_v8 }
   0xf   :  { %233 = vmatpush3.msra.mxu0 %v43_v8 }
  0x10   :  { %234 = vmatprep.subr.mxu0 %v42_v9 }
  0x11   :  { %235 = vmatpush3.msra.mxu0 %v42_v9 }
  0x12   :  { %236 = vmatprep.subr.mxu0 %v41_v10 }
  0x13   :  { %237 = vmatpush3.msra.mxu0 %v41_v10 }
  0x14   :  { %238 = vmatprep.subr.mxu0 %v40_v11 }
  0x15   :  { %239 = vmatpush3.msra.mxu0 %v40_v11 }
  0x16   :  { %240 = vmatprep.subr.mxu0 %v39_v12 }
  0x17   :  { %241 = vmatpush3.msra.mxu0 %v39_v12 }
  0x18   :  { %242 = vmatprep.subr.mxu0 %v38_v13 }
  0x19   :  { %243 = vmatpush3.msra.mxu0 %v38_v13 }
  0x1a   :  { %244 = vmatprep.subr.mxu0 %v37_v14 }
  0x1b   :  { %245 = vmatpush3.msra.mxu0 %v37_v14 }
  0x1c   :  { %246 = vmatprep.subr.mxu0 %v36_v15 }
  0x1d   :  { %247 = vmatpush3.msra.mxu0 %v36_v15 }
  0x1e   :  { %248 = vmatprep.subr.mxu0 %v35_v16 }
  0x1f   :  { %249 = vmatpush3.msra.mxu0 %v35_v16 }
  0x20   :  { %250 = vmatprep.subr.mxu0 %v34_v17 }
  0x21   :  { %251 = vmatpush3.msra.mxu0 %v34_v17 }
  0x22   :  { %253 = vmatmul.mubr.f32.vlgmr.msra.gmra.mxu0 %v33_v18 }
  0xe2   :  { %v254_v20 = vpop.f32.mrf.mxu0 }
  0xe3   :  { %v126_v22 = vadd.f32 %v254_v20, %v31_v19 }
  0xe4   :  { %v116_v23 = vpop.f32.mrf.mxu0 }
  0xe5   :  { %129 = vst.msk [vmem:[#allocation2 + $0x8] sm:$0xff] %vm27_vm0, %v126_v22  ;;  %v125_v24 = vadd.f32 %v116_v23, %v30_v21 }
  0xe7   :  { %128 = vst.msk [vmem:[#allocation2] sm:$0xff] %vm27_vm0, %v125_v24 }
  0xec   :  { %v134_v26 = vld [vmem:[#allocation2 + $0x8] sm:$0xff] }
  0xed   :  { %v143_v30 = vadd.f32 %v199_v25, %v134_v26 }
  0xee   :  { %v133_v27 = vld [vmem:[#allocation2] sm:$0xff] }
  0xef   :  { %v142_v29 = vadd.f32 %v199_v25, %v133_v27  ;;  %v147_v34 = vadd.f32 %v145_v31, %v143_v30 }
  0xf1   :  { %v146_v32 = vadd.f32 %v144_v28, %v142_v29  ;;  %v151_v35 = vsel %vm27_vm0, %v147_v34, 0.0 }
  0xf3   :  { %v148_v33 = vsel %vm27_vm0, %v146_v32, 0.0 }
  0xf4   :  { %149 = vadd.xlane.f32.xlu0 %v148_v33 }
  0xf8   :  { %152 = vadd.xlane.f32.xlu0 %v151_v35 }
 0x17d   :  { %v150_v36 = vpop.xlane.xlu0 %149 }
 0x17e   :  { %v155_v37 = vmul.f32 0.03125, %v150_v36 }
 0x180   :  { %v157_v38 = vsub.f32 %v146_v32, %v155_v37 }
 0x181   :  { %v153_v39 = vpop.xlane.xlu0 %152 }
 0x182   :  { %v156_v40 = vmul.f32 0.03125, %v153_v39  ;;  %v159_v41 = vmul.f32 %v157_v38, %v157_v38 }
 0x184   :  { %v158_v42 = vsub.f32 %v147_v34, %v156_v40  ;;  %v161_v43 = vsel %vm27_vm0, %v159_v41, 0.0 }
 0x185   :  { %162 = vadd.xlane.f32.xlu1 %v161_v43 }
 0x186   :  { %v160_v44 = vmul.f32 %v158_v42, %v158_v42 }
 0x188   :  { %v164_v45 = vsel %vm27_vm0, %v160_v44, 0.0 }
 0x189   :  { %165 = vadd.xlane.f32.xlu1 %v164_v45 }
 0x20e   :  { %v163_v46 = vpop.xlane.xlu1 %162 }
 0x20f   :  { %v167_v47 = vmul.f32 0.03125, %v163_v46 }
 0x211   :  { %v169_v48 = vadd.f32 1e-05, %v167_v47 }
 0x212   :  { %v166_v49 = vpop.xlane.xlu1 %165 }
 0x213   :  { %256 = vrsqrt.f32 %v169_v48  ;;  %v168_v50 = vmul.f32 0.03125, %v166_v49 }
 0x215   :  { %v170_v51 = vadd.f32 1e-05, %v168_v50 }
 0x217   :  { %258 = vrsqrt.f32 %v170_v51 }
 0x220   :  { %v257_v52 = vpop.eup %256 }
 0x221   :  { %v173_v54 = vmul.f32 %v257_v52, %v157_v38 }
 0x223   :  { %v182_v56 = vmul.f32 %v200_v53, %v173_v54 }
 0x224   :  { %v259_v57 = vpop.eup %258 }
 0x225   :  { %v191_v58 = vadd.f32 %v201_v55, %v182_v56  ;;  %v174_v59 = vmul.f32 %v259_v57, %v158_v42 }
 0x227   :  { %193 = vst.msk [vmem:[%s387_s6] sm:$0xff] %vm27_vm0, %v191_v58  ;;  %v183_v60 = vmul.f32 %v200_v53, %v174_v59 }
 0x229   :  { %v192_v61 = vadd.f32 %v201_v55, %v183_v60 }
 0x22b   :  { %194 = vst.msk [vmem:[%s387_s6 + $0x8] sm:$0xff] %vm27_vm0, %v192_v61 }

// kernel: transformer_encoder_forward.15
= control target key start
LH: loop header
LB: loop body
LE: loop exit
PB: predicated region body
PF: predicated region fallthrough
CT: control target
= control target key end

     0   :  { %v6204_v2 = vmov 0.0   ;;  %vm6205_vm0 = vmmov 0   ;;  %s6206_s10 = smov 96   ;;  %vm27_vm1 = vcmask 64512   ;;  %vm649_vm2 = vcmask 9216   ;;  %s6207_s23 = smov 64   ;;  %s7241_s0 = inlined_call_operand.vmem [shape: f32[8,2,96], index: 0, kind: input, shape index: {}]   ;;  %s7242_s1 = inlined_call_operand.vmem [shape: f32[8,2,32], index: 1, kind: output, shape index: {}]  }
   0x1   :  { %v6233_v0 = vld [vmem:[%s7241_s0] sm:$0x3]  ;;  %v6238_v1 = vld [vmem:[%s7241_s0 + $0x4] sm:$0x3]  ;;  %5732 = vmatprep.subr.mxu0 %v6204_v2  ;;  %5734 = vmatprep.mubr.msk.f32.mxu0 %vm6205_vm0, %v6204_v2  ;;  %v6248_v3 = vld [vmem:[%s7241_s0 + $0x2] sm:$0x3] }
   0x2   :  { %25 = vrot.lane.b32.xlu0 %v6233_v0, %s6206_s10  ;;  %182 = vrot.lane.b32.xlu1 %v6238_v1, %s6206_s10  ;;  %v6253_v4 = vld [vmem:[%s7241_s0 + $0x6] sm:$0x3]  ;;  %v6263_v5 = vld [vmem:[%s7241_s0 + $0x8] sm:$0x3]  ;;  %v6285_v11 = vmul.f32 0.35355338, %v6233_v0 }
   0x3   :  { %5737 = vmatprep.subr.mxu1 %v6204_v2  ;;  %5739 = vmatprep.mubr.msk.f32.mxu1 %vm6205_vm0, %v6204_v2  ;;  %v6268_v6 = vld [vmem:[%s7241_s0 + $0xa] sm:$0x3]  ;;  %v6275_v7 = vld [vmem:[%s7241_s0 + $0xc] sm:$0x3]  ;;  %v6280_v8 = vld [vmem:[%s7241_s0 + $0xe] sm:$0x3] }
   0x4   :  { %v6292_v14 = vmul.f32 0.35355338, %v6248_v3  ;;  %v6295_v15 = vmul.f32 0.35355338, %v6238_v1  ;;  %v6308_v18 = vmul.f32 0.35355338, %v6253_v4 }
   0x5   :  { %v6311_v19 = vmul.f32 0.35355338, %v6263_v5  ;;  %v6326_v21 = vmul.f32 0.35355338, %v6268_v6  ;;  %v6329_v22 = vmul.f32 0.35355338, %v6275_v7 }
   0x6   :  { %104 = vrot.lane.b32.xlu0 %v6248_v3, %s6206_s10  ;;  %260 = vrot.lane.b32.xlu1 %v6253_v4, %s6206_s10  ;;  %v6344_v24 = vmul.f32 0.35355338, %v6280_v8  ;;  %s6208_s24 = smov 88   ;;  %s6209_s25 = smov 120   ;;  %vm744_vm3 = vcmask 1041408   ;;  %vm740_vm4 = vcmask 15360  }
   0x7   :  { %vm1356_vm5 = vcmask 58368   ;;  %s6210_s13 = smov 56   ;;  %s6211_s14 = smov 80   ;;  %vm2725_vm6 = vcmask 123968   ;;  %vm4094_vm7 = vcmask 189568   ;;  %vm5463_vm8 = vcmask 255168  }
   0x8   :  { %s6212_s15 = smov 112   ;;  %s6213_s18 = smov 48  }
   0x9   :  { %s6214_s4 = smov 72   ;;  %s6215_s5 = smov 104  }
   0xa   :  { %338 = vrot.lane.b32.xlu0 %v6263_v5, %s6206_s10  ;;  %416 = vrot.lane.b32.xlu1 %v6268_v6, %s6206_s10  ;;  %s6217_s6 = smov 8   ;;  %s6218_s7 = smov 16  }
   0xe   :  { %494 = vrot.lane.b32.xlu0 %v6275_v7, %s6206_s10  ;;  %572 = vrot.lane.b32.xlu1 %v6280_v8, %s6206_s10  ;;  %s6219_s10 = smov 24  }
  0x74   :  { %v26_v9 = vpop.permute.xlu0 %25  ;;  %v183_v10 = vpop.permute.xlu1 %182 }
  0x75   :  { %5733 = vmatpush3.xpose.msk.msra.mxu0 %vm27_vm1, %v26_v9 }
  0x76   :  { %5742 = vmatprep.subr.mxu0 %v6204_v2 }
  0x78   :  { %v105_v12 = vpop.permute.xlu0 %104  ;;  %5735 = vmatmul.mubr.msk.f32.vlgmr.msra.gmra.mxu0 %vm27_vm1, %v6285_v11  ;;  %v261_v13 = vpop.permute.xlu1 %260 }
  0x79   :  { %5738 = vmatpush3.xpose.msk.msra.mxu1 %vm27_vm1, %v105_v12  ;;  %5743 = vmatpush3.xpose.msk.msra.mxu0 %vm27_vm1, %v183_v10 }
  0x7a   :  { %5744 = vmatprep.mubr.msk.f32.mxu0 %vm6205_vm0, %v6204_v2  ;;  %5747 = vmatprep.subr.mxu1 %v6204_v2 }
  0x7b   :  { %5752 = vmatprep.subr.mxu0 %v6204_v2 }
  0x7c   :  { %5740 = vmatmul.mubr.msk.f32.vlgmr.msra.gmra.mxu1 %vm27_vm1, %v6292_v14  ;;  %v339_v16 = vpop.permute.xlu0 %338  ;;  %5745 = vmatmul.mubr.msk.f32.vlgmr.msra.gmra.mxu0 %vm27_vm1, %v6295_v15  ;;  %v417_v17 = vpop.permute.xlu1 %416 }
  0x7d   :  { %5748 = vmatpush3.xpose.msk.msra.mxu1 %vm27_vm1, %v261_v13  ;;  %5753 = vmatpush3.xpose.msk.msra.mxu0 %vm27_vm1, %v339_v16 }
  0x7e   :  { %5749 = vmatprep.mubr.msk.f32.mxu1 %vm6205_vm0, %v6204_v2  ;;  %5754 = vmatprep.mubr.msk.f32.mxu0 %vm6205_vm0, %v6204_v2 }
  0x7f   :  { %5757 = vmatprep.subr.mxu1 %v6204_v2  ;;  %5762 = vmatprep.subr.mxu0 %v6204_v2 }
  0x80   :  { %5750 = vmatmul.mubr.msk.f32.vlgmr.msra.gmra.mxu1 %vm27_vm1, %v6308_v18  ;;  %v495_v20 = vpop.permute.xlu0 %494  ;;  %5755 = vmatmul.mubr.msk.f32.vlgmr.msra.gmra.mxu0 %vm27_vm1, %v6311_v19  ;;  %v573_v23 = vpop.permute.xlu1 %572 }
  0x81   :  { %5758 = vmatpush3.xpose.msk.msra.mxu1 %vm27_vm1, %v417_v17  ;;  %5763 = vmatpush3.xpose.msk.msra.mxu0 %vm27_vm1, %v495_v20 }
  0x82   :  { %5759 = vmatprep.mubr.msk.f32.mxu1 %vm6205_vm0, %v6204_v2  ;;  %5764 = vmatprep.mubr.msk.f32.mxu0 %vm6205_vm0, %v6204_v2 }
  0x83   :  { %5767 = vmatprep.subr.mxu1 %v6204_v2  ;;  %5772 = vmatprep.subr.mxu0 %v6204_v2 }
  0x84   :  { %5760 = vmatmul.mubr.msk.f32.vlgmr.msra.gmra.mxu1 %vm27_vm1, %v6326_v21  ;;  %5765 = vmatmul.mubr.msk.f32.vlgmr.msra.gmra.mxu0 %vm27_vm1, %v6329_v22 }
  0x85   :  { %5768 = vmatpush3.xpose.msk.msra.mxu1 %vm27_vm1, %v573_v23  ;;  %5769 = vmatprep.mubr.msk.f32.mxu1 %vm6205_vm0, %v6204_v2 }
  0x86   :  { %5777 = vmatprep.subr.mxu1 %v6204_v2  ;;  %5774 = vmatprep.mubr.msk.f32.mxu0 %vm6205_vm0, %v6204_v2 }
  0x88   :  { %5770 = vmatmul.mubr.msk.f32.vlgmr.msra.gmra.mxu1 %vm27_vm1, %v6344_v24 }
  0x89   :  { %5779 = vmatprep.mubr.msk.f32.mxu1 %vm6205_vm0, %v6204_v2 }
 0x138   :  { %v99_v25 = vpop.f32.mrf.mxu0 }
 0x139   :  { %v650_v26 = vsel %vm649_vm2, %v99_v25, -inf }
 0x13a   :  { %651 = vmax.xlane.f32.xlu0 %v650_v26  ;;  %v5736_v27 = vpop.f32.mrf.mxu0 }
 0x13c   :  { %v177_v28 = vpop.f32.mrf.mxu1  ;;  %v255_v29 = vpop.f32.mrf.mxu0 }
 0x13d   :  { %v653_v30 = vsel %vm649_vm2, %v177_v28, -inf  ;;  %v656_v31 = vsel %vm649_vm2, %v255_v29, -inf }
 0x13e   :  { %654 = vmax.xlane.f32.xlu1 %v653_v30  ;;  %v5741_v32 = vpop.f32.mrf.mxu1  ;;  %657 = vmax.xlane.f32.xlu0 %v656_v31  ;;  %v5746_v33 = vpop.f32.mrf.mxu0 }
 0x140   :  { %v333_v34 = vpop.f32.mrf.mxu1  ;;  %v411_v35 = vpop.f32.mrf.mxu0 }
 0x141   :  { %v659_v36 = vsel %vm649_vm2, %v333_v34, -inf  ;;  %v662_v37 = vsel %vm649_vm2, %v411_v35, -inf }
 0x142   :  { %v5751_v38 = vpop.f32.mrf.mxu1  ;;  %660 = vmax.xlane.f32.xlu0 %v659_v36  ;;  %663 = vmax.xlane.f32.xlu1 %v662_v37  ;;  %v5756_v39 = vpop.f32.mrf.mxu0 }
 0x144   :  { %v489_v40 = vpop.f32.mrf.mxu1  ;;  %v567_v41 = vpop.f32.mrf.mxu0 }
 0x145   :  { %v665_v42 = vsel %vm649_vm2, %v489_v40, -inf  ;;  %v668_v43 = vsel %vm649_vm2, %v567_v41, -inf }
 0x146   :  { %v5761_v44 = vpop.f32.mrf.mxu1  ;;  %666 = vmax.xlane.f32.xlu0 %v665_v42  ;;  %669 = vmax.xlane.f32.xlu1 %v668_v43  ;;  %v5766_v45 = vpop.f32.mrf.mxu0 }
 0x148   :  { %v645_v46 = vpop.f32.mrf.mxu1 }
 0x149   :  { %v671_v47 = vsel %vm649_vm2, %v645_v46, -inf }
 0x14a   :  { %v5771_v48 = vpop.f32.mrf.mxu1  ;;  %672 = vmax.xlane.f32.xlu0 %v671_v47 }
 0x157   :  { %738 = vrot.lane.b32.xlu1 %v6233_v0, %s6207_s23 }
 0x15b   :  { %894 = vrot.lane.b32.xlu1 %v6238_v1, %s6207_s23 }
 0x15f   :  { %971 = vrot.lane.b32.xlu1 %v6253_v4, %s6207_s23 }
 0x160   :  { %817 = vrot.lane.b32.xlu0 %v6248_v3, %s6207_s23 }
 0x163   :  { %1125 = vrot.lane.b32.xlu1 %v6268_v6, %s6207_s23 }
 0x164   :  { %1048 = vrot.lane.b32.xlu0 %v6263_v5, %s6207_s23 }
 0x167   :  { %1279 = vrot.lane.b32.xlu1 %v6280_v8, %s6207_s23 }
 0x168   :  { %1202 = vrot.lane.b32.xlu0 %v6275_v7, %s6207_s23 }
 0x16b   :  { %1445 = vrot.lane.b32.xlu1 %v6248_v3, %s6208_s24 }
 0x16c   :  { %1367 = vrot.lane.b32.xlu0 %v6233_v0, %s6208_s24 }
 0x16f   :  { %1443 = vrot.lane.b32.xlu1 %v6292_v14, %s6209_s25 }
 0x170   :  { %1365 = vrot.lane.b32.xlu0 %v6285_v11, %s6209_s25 }
 0x173   :  { %1601 = vrot.lane.b32.xlu1 %v6253_v4, %s6208_s24 }
 0x174   :  { %1523 = vrot.lane.b32.xlu0 %v6238_v1, %s6208_s24 }
 0x1c3   :  { %v652_v49 = vpop.xlane.xlu0 %651 }
 0x1c4   :  { %v674_v50 = vsub.f32 %v99_v25, %v652_v49 }
 0x1c6   :  { %v682_v51 = vmul.f32 1.442695, %v674_v50 }
 0x1c7   :  { %v655_v52 = vpop.xlane.xlu1 %654  ;;  %v658_v53 = vpop.xlane.xlu0 %657 }
 0x1c8   :  { %6068 = vpow2.f32 %v682_v51  ;;  %v675_v54 = vsub.f32 %v177_v28, %v655_v52  ;;  %v676_v55 = vsub.f32 %v255_v29, %v658_v53 }
 0x1ca   :  { %v684_v56 = vmul.f32 1.442695, %v675_v54  ;;  %v686_v57 = vmul.f32 1.442695, %v676_v55 }
 0x1cb   :  { %v661_v58 = vpop.xlane.xlu0 %660  ;;  %v664_v59 = vpop.xlane.xlu1 %663 }
 0x1cc   :  { %6070 = vpow2.f32 %v684_v56  ;;  %v677_v60 = vsub.f32 %v333_v34, %v661_v58  ;;  %v678_v61 = vsub.f32 %v411_v35, %v664_v59 }
 0x1cd   :  { %6072 = vpow2.f32 %v686_v57 }
 0x1ce   :  { %v688_v62 = vmul.f32 1.442695, %v677_v60  ;;  %v690_v63 = vmul.f32 1.442695, %v678_v61 }
 0x1cf   :  { %v667_v9 = vpop.xlane.xlu0 %666  ;;  %v670_v10 = vpop.xlane.xlu1 %669 }
 0x1d0   :  { %6074 = vpow2.f32 %v688_v62  ;;  %v679_v12 = vsub.f32 %v489_v40, %v667_v9  ;;  %v680_v13 = vsub.f32 %v567_v41, %v670_v10 }
 0x1d1   :  { %6076 = vpow2.f32 %v690_v63 }
 0x1d2   :  { %v692_v16 = vmul.f32 1.442695, %v679_v12  ;;  %v694_v17 = vmul.f32 1.442695, %v680_v13 }
 0x1d3   :  { %v673_v20 = vpop.xlane.xlu0 %672  ;;  %v739_v23 = vpop.permute.xlu1 %738 }
 0x1d4   :  { %6078 = vpow2.f32 %v692_v16  ;;  %v681_v25 = vsub.f32 %v645_v46, %v673_v20  ;;  %5773 = vmatpush3.msk.msra.mxu0 %vm744_vm3, %v739_v23 }
 0x1d5   :  { %v6385_v26 = vpop.eup %6068  ;;  %6080 = vpow2.f32 %v694_v17  ;;  %5782 = vmatprep.subr.mxu0 %v6204_v2 }
 0x1d6   :  { %v696_v27 = vmul.f32 1.442695, %v681_v25  ;;  %v698_v28 = vsel %vm649_vm2, %v6385_v26, 0.0 }
 0x1d7   :  { %699 = vadd.xlane.f32.xlu1 %v698_v28  ;;  %v818_v29 = vpop.permute.xlu0 %817  ;;  %v895_v44 = vpop.permute.xlu1 %894 }
 0x1d8   :  { %6082 = vpow2.f32 %v696_v27  ;;  %5778 = vmatpush3.msk.msra.mxu1 %vm744_vm3, %v818_v29 }
 0x1d9   :  { %v6391_v30 = vpop.eup %6070  ;;  %5787 = vmatprep.subr.mxu1 %v6204_v2 }
 0x1da   :  { %v6394_v31 = vpop.eup %6072  ;;  %v701_v32 = vsel %vm649_vm2, %v6391_v30, 0.0 }
 0x1db   :  { %702 = vadd.xlane.f32.xlu0 %v701_v32  ;;  %v704_v33 = vsel %vm649_vm2, %v6394_v31, 0.0  ;;  %v972_v45 = vpop.permute.xlu1 %971  ;;  %v1049_v47 = vpop.permute.xlu0 %1048 }
 0x1dc   :  { %705 = vadd.xlane.f32.xlu1 %v704_v33 }
 0x1dd   :  { %v6400_v34 = vpop.eup %6074 }
 0x1de   :  { %v6402_v35 = vpop.eup %6076  ;;  %v707_v36 = vsel %vm649_vm2, %v6400_v34, 0.0 }
 0x1df   :  { %708 = vadd.xlane.f32.xlu0 %v707_v36  ;;  %v710_v37 = vsel %vm649_vm2, %v6402_v35, 0.0  ;;  %v1126_v46 = vpop.permute.xlu1 %1125  ;;  %v1203_v49 = vpop.permute.xlu0 %1202 }
 0x1e0   :  { %711 = vadd.xlane.f32.xlu1 %v710_v37 }
 0x1e1   :  { %v6408_v38 = vpop.eup %6078 }
 0x1e2   :  { %v6410_v39 = vpop.eup %6080  ;;  %v713_v40 = vsel %vm649_vm2, %v6408_v38, 0.0 }
 0x1e3   :  { %714 = vadd.xlane.f32.xlu0 %v713_v40  ;;  %v716_v41 = vsel %vm649_vm2, %v6410_v39, 0.0  ;;  %v6440_v48 = vpop.permute.xlu1 %1279  ;;  %v6444_v51 = vpop.permute.xlu0 %1367 }
 0x1e4   :  { %717 = vadd.xlane.f32.xlu1 %v716_v41 }
 0x1e5   :  { %v6416_v42 = vpop.eup %6082 }
 0x1e6   :  { %v719_v43 = vsel %vm649_vm2, %v6416_v42, 0.0 }
 0x1e7   :  { %720 = vadd.xlane.f32.xlu0 %v719_v43  ;;  %v6442_v50 = vpop.permute.xlu1 %1445  ;;  %v6448_v53 = vpop.permute.xlu0 %1365 }
 0x1eb   :  { %v6446_v52 = vpop.permute.xlu1 %1443  ;;  %v6452_v55 = vpop.permute.xlu0 %1523 }
 0x1ef   :  { %v6450_v54 = vpop.permute.xlu1 %1601 }
 0x1f5   :  { %1599 = vrot.lane.b32.xlu1 %v6308_v18, %s6209_s25 }
 0x1f9   :  { %1757 = vrot.lane.b32.xlu1 %v6268_v6, %s6208_s24 }
 0x1fd   :  { %1521 = vrot.lane.b32.xlu0 %v6295_v15, %s6209_s25  ;;  %1755 = vrot.lane.b32.xlu1 %v6326_v21, %s6209_s25 }
 0x201   :  { %1679 = vrot.lane.b32.xlu0 %v6263_v5, %s6208_s24  ;;  %1913 = vrot.lane.b32.xlu1 %v6280_v8, %s6208_s24 }
 0x205   :  { %1677 = vrot.lane.b32.xlu0 %v6311_v19, %s6209_s25  ;;  %1911 = vrot.lane.b32.xlu1 %v6344_v24, %s6209_s25 }
 0x209   :  { %1835 = vrot.lane.b32.xlu0 %v6275_v7, %s6208_s24 }
 0x20d   :  { %1833 = vrot.lane.b32.xlu0 %v6329_v22, %s6209_s25 }
 0x260   :  { %v700_v56 = vpop.xlane.xlu1 %699 }
 0x261   :  { %6084 = vrcp.f32 %v700_v56 }
 0x264   :  { %v703_v57 = vpop.xlane.xlu0 %702 }
 0x265   :  { %6086 = vrcp.f32 %v703_v57  ;;  %v706_v58 = vpop.xlane.xlu1 %705 }
 0x266   :  { %6088 = vrcp.f32 %v706_v58 }
 0x268   :  { %v709_v59 = vpop.xlane.xlu0 %708 }
 0x269   :  { %6090 = vrcp.f32 %v709_v59  ;;  %v712_v60 = vpop.xlane.xlu1 %711 }
 0x26a   :  { %6092 = vrcp.f32 %v712_v60 }
 0x26c   :  { %v715_v61 = vpop.xlane.xlu0 %714 }
 0x26d   :  { %6094 = vrcp.f32 %v715_v61  ;;  %v718_v62 = vpop.xlane.xlu1 %717 }
 0x26e   :  { %v6085_v63 = vpop.eup %6084  ;;  %6096 = vrcp.f32 %v718_v62 }
 0x26f   :  { %v730_v9 = vmul.f32 %v6085_v63, %v6385_v26 }
 0x270   :  { %v721_v10 = vpop.xlane.xlu0 %720 }
 0x271   :  { %6098 = vrcp.f32 %v721_v10  ;;  %5775 = vmatmul.mubr.msk.f32.vlgmr.msra.gmra.mxu0 %vm740_vm4, %v730_v9  ;;  %v1600_v25 = vpop.permute.xlu1 %1599 }
 0x272   :  { %v6087_v12 = vpop.eup %6086  ;;  %5783 = vmatpush3.msk.msra.mxu0 %vm744_vm3, %v895_v44  ;;  %5784 = vmatprep.mubr.msk.f32.mxu0 %vm6205_vm0, %v6204_v2 }
 0x273   :  { %v6089_v13 = vpop.eup %6088  ;;  %5792 = vmatprep.subr.mxu0 %v6204_v2  ;;  %v731_v16 = vmul.f32 %v6087_v12, %v6391_v30 }
 0x274   :  { %v732_v17 = vmul.f32 %v6089_v13, %v6394_v31  ;;  %v1522_v20 = vpop.permute.xlu0 %1521 }
 0x275   :  { %5780 = vmatmul.mubr.msk.f32.vlgmr.msra.gmra.mxu1 %vm740_vm4, %v731_v16 }
 0x276   :  { %v6091_v23 = vpop.eup %6090  ;;  %5785 = vmatmul.mubr.msk.f32.vlgmr.msra.gmra.mxu0 %vm740_vm4, %v732_v17  ;;  %5788 = vmatpush3.msk.msra.mxu1 %vm744_vm3, %v972_v45 }
 0x277   :  { %v6093_v26 = vpop.eup %6092  ;;  %5793 = vmatpush3.msk.msra.mxu0 %vm744_vm3, %v1049_v47  ;;  %5789 = vmatprep.mubr.msk.f32.mxu1 %vm6205_vm0, %v6204_v2  ;;  %v733_v27 = vmul.f32 %v6091_v23, %v6400_v34  ;;  %v1758_v34 = vpop.permute.xlu1 %1757 }
 0x278   :  { %5794 = vmatprep.mubr.msk.f32.mxu0 %vm6205_vm0, %v6204_v2  ;;  %5797 = vmatprep.subr.mxu1 %v6204_v2  ;;  %v734_v28 = vmul.f32 %v6093_v26, %v6402_v35  ;;  %v1680_v29 = vpop.permute.xlu0 %1679 }
 0x279   :  { %5802 = vmatprep.subr.mxu0 %v6204_v2  ;;  %5790 = vmatmul.mubr.msk.f32.vlgmr.msra.gmra.mxu1 %vm740_vm4, %v733_v27 }
 0x27a   :  { %v6095_v30 = vpop.eup %6094  ;;  %5795 = vmatmul.mubr.msk.f32.vlgmr.msra.gmra.mxu0 %vm740_vm4, %v734_v28  ;;  %5798 = vmatpush3.msk.msra.mxu1 %vm744_vm3, %v1126_v46 }
 0x27b   :  { %v6097_v31 = vpop.eup %6096  ;;  %5803 = vmatpush3.msk.msra.mxu0 %vm744_vm3, %v1203_v49  ;;  %5799 = vmatprep.mubr.msk.f32.mxu1 %vm6205_vm0, %v6204_v2  ;;  %v735_v32 = vmul.f32 %v6095_v30, %v6408_v38  ;;  %v1756_v38 = vpop.permute.xlu1 %1755 }
 0x27c   :  { %5804 = vmatprep.mubr.msk.f32.mxu0 %vm6205_vm0, %v6204_v2  ;;  %5807 = vmatprep.subr.mxu1 %v6204_v2  ;;  %v736_v33 = vmul.f32 %v6097_v31, %v6410_v39  ;;  %v1678_v37 = vpop.permute.xlu0 %1677 }
 0x27d   :  { %5812 = vmatprep.subr.mxu0 %v6204_v2  ;;  %5800 = vmatmul.mubr.msk.f32.vlgmr.msra.gmra.mxu1 %vm740_vm4, %v735_v32 }
 0x27e   :  { %v6099_v35 = vpop.eup %6098  ;;  %5805 = vmatmul.mubr.msk.f32.vlgmr.msra.gmra.mxu0 %vm740_vm4, %v736_v33  ;;  %5808 = vmatpush3.msk.msra.mxu1 %vm744_vm3, %v6440_v48 }
 0x27f   :  { %5813 = vmatpush3.xpose.msk.msra.mxu0 %vm27_vm1, %v6444_v51  ;;  %5809 = vmatprep.mubr.msk.f32.mxu1 %vm6205_vm0, %v6204_v2  ;;  %v737_v36 = vmul.f32 %v6099_v35, %v6416_v42  ;;  %v1914_v40 = vpop.permute.xlu1 %1913 }
 0x280   :  { %5814 = vmatprep.mubr.msk.f32.mxu0 %vm6205_vm0, %v6204_v2  ;;  %5817 = vmatprep.subr.mxu1 %v6204_v2  ;;  %v1836_v39 = vpop.permute.xlu0 %1835 }
 0x281   :  { %5822 = vmatprep.subr.mxu0 %v6204_v2  ;;  %5810 = vmatmul.mubr.msk.f32.vlgmr.msra.gmra.mxu1 %vm740_vm4, %v737_v36 }
 0x282   :  { %5815 = vmatmul.mubr.msk.f32.vlgmr.msra.gmra.mxu0 %vm27_vm1, %v6448_v53  ;;  %5818 = vmatpush3.xpose.msk.msra.mxu1 %vm27_vm1, %v6442_v50 }
 0x283   :  { %5823 = vmatpush3.xpose.msk.msra.mxu0 %vm27_vm1, %v6452_v55  ;;  %5819 = vmatprep.mubr.msk.f32.mxu1 %vm6205_vm0, %v6204_v2  ;;  %v1912_v42 = vpop.permute.xlu1 %1911 }
 0x284   :  { %5824 = vmatprep.mubr.msk.f32.mxu0 %vm6205_vm0, %v6204_v2  ;;  %5827 = vmatprep.subr.mxu1 %v6204_v2  ;;  %v1834_v41 = vpop.permute.xlu0 %1833 }
 0x285   :  { %5832 = vmatprep.subr.mxu0 %v6204_v2  ;;  %5820 = vmatmul.mubr.msk.f32.vlgmr.msra.gmra.mxu1 %vm27_vm1, %v6446_v52 }
 0x286   :  { %5825 = vmatmul.mubr.msk.f32.vlgmr.msra.gmra.mxu0 %vm27_vm1, %v1522_v20  ;;  %5828 = vmatpush3.xpose.msk.msra.mxu1 %vm27_vm1, %v6450_v54 }
 0x287   :  { %5833 = vmatpush3.xpose.msk.msra.mxu0 %vm27_vm1, %v1680_v29  ;;  %5829 = vmatprep.mubr.msk.f32.mxu1 %vm6205_vm0, %v6204_v2 }
 0x288   :  { %5834 = vmatprep.mubr.msk.f32.mxu0 %vm6205_vm0, %v6204_v2  ;;  %5837 = vmatprep.subr.mxu1 %v6204_v2 }
 0x289   :  { %5830 = vmatmul.mubr.msk.f32.vlgmr.msra.gmra.mxu1 %vm27_vm1, %v1600_v25  ;;  %5842 = vmatprep.subr.mxu0 %v6204_v2 }
 0x28a   :  { %5835 = vmatmul.mubr.msk.f32.vlgmr.msra.gmra.mxu0 %vm27_vm1, %v1678_v37  ;;  %5838 = vmatpush3.xpose.msk.msra.mxu1 %vm27_vm1, %v1758_v34 }
 0x28b   :  { %5843 = vmatpush3.xpose.msk.msra.mxu0 %vm27_vm1, %v1836_v39  ;;  %5839 = vmatprep.mubr.msk.f32.mxu1 %vm6205_vm0, %v6204_v2 }
 0x28c   :  { %5844 = vmatprep.mubr.msk.f32.mxu0 %vm6205_vm0, %v6204_v2  ;;  %5847 = vmatprep.subr.mxu1 %v6204_v2 }
 0x28d   :  { %5840 = vmatmul.mubr.msk.f32.vlgmr.msra.gmra.mxu1 %vm27_vm1, %v1756_v38  ;;  %5852 = vmatprep.subr.mxu0 %v6204_v2 }
 0x28e   :  { %5845 = vmatmul.mubr.msk.f32.vlgmr.msra.gmra.mxu0 %vm27_vm1, %v1834_v41  ;;  %5848 = vmatpush3.xpose.msk.msra.mxu1 %vm27_vm1, %v1914_v40 }
 0x28f   :  { %5849 = vmatprep.mubr.msk.f32.mxu1 %vm6205_vm0, %v6204_v2  ;;  %5857 = vmatprep.subr.mxu1 %v6204_v2 }
 0x290   :  { %5854 = vmatprep.mubr.msk.f32.mxu0 %vm6205_vm0, %v6204_v2 }
 0x291   :  { %5850 = vmatmul.mubr.msk.f32.vlgmr.msra.gmra.mxu1 %vm27_vm1, %v1912_v42 }
 0x292   :  { %5859 = vmatprep.mubr.msk.f32.mxu1 %vm6205_vm0, %v6204_v2 }
 0x331   :  { %v813_v43 = vpop.f32.mrf.mxu0 }
 0x332   :  { %1357 = vst.msk [vmem:[%s7242_s1] sm:$0x3] %vm1356_vm5, %v813_v43 }
 0x333   :  { %v5776_v44 = vpop.f32.mrf.mxu0 }
 0x335   :  { %v890_v45 = vpop.f32.mrf.mxu1 }
 0x336   :  { %1358 = vst.msk [vmem:[%s7242_s1 + $0x2] sm:$0x3] %vm1356_vm5, %v890_v45  ;;  %v967_v46 = vpop.f32.mrf.mxu0 }
 0x337   :  { %1359 = vst.msk [vmem:[%s7242_s1 + $0x4] sm:$0x3] %vm1356_vm5, %v967_v46  ;;  %v5781_v47 = vpop.f32.mrf.mxu1 }
 0x338   :  { %v5786_v48 = vpop.f32.mrf.mxu0 }
 0x339   :  { %v1044_v49 = vpop.f32.mrf.mxu1 }
 0x33a   :  { %1360 = vst.msk [vmem:[%s7242_s1 + $0x6] sm:$0x3] %vm1356_vm5, %v1044_v49  ;;  %v1121_v50 = vpop.f32.mrf.mxu0 }
 0x33b   :  { %1361 = vst.msk [vmem:[%s7242_s1 + $0x8] sm:$0x3] %vm1356_vm5, %v1121_v50  ;;  %v5791_v51 = vpop.f32.mrf.mxu1 }
 0x33c   :  { %v5796_v52 = vpop.f32.mrf.mxu0 }
 0x33d   :  { %v1198_v53 = vpop.f32.mrf.mxu1 }
 0x33e   :  { %1362 = vst.msk [vmem:[%s7242_s1 + $0xa] sm:$0x3] %vm1356_vm5, %v1198_v53  ;;  %v1275_v54 = vpop.f32.mrf.mxu0 }
 0x33f   :  { %1363 = vst.msk [vmem:[%s7242_s1 + $0xc] sm:$0x3] %vm1356_vm5, %v1275_v54  ;;  %v5801_v55 = vpop.f32.mrf.mxu1 }
 0x340   :  { %v5806_v56 = vpop.f32.mrf.mxu0 }
 0x341   :  { %v1352_v57 = vpop.f32.mrf.mxu1 }
 0x342   :  { %1364 = vst.msk [vmem:[%s7242_s1 + $0xe] sm:$0x3] %vm1356_vm5, %v1352_v57  ;;  %v1439_v58 = vpop.f32.mrf.mxu0 }
 0x343   :  { %v5811_v59 = vpop.f32.mrf.mxu1  ;;  %v1989_v60 = vsel %vm649_vm2, %v1439_v58, -inf }
 0x344   :  { %1990 = vmax.xlane.f32.xlu0 %v1989_v60  ;;  %v5816_v61 = vpop.f32.mrf.mxu0 }
 0x345   :  { %v1517_v62 = vpop.f32.mrf.mxu1 }
 0x346   :  { %v1595_v63 = vpop.f32.mrf.mxu0  ;;  %v1992_v9 = vsel %vm649_vm2, %v1517_v62, -inf }
 0x347   :  { %1993 = vmax.xlane.f32.xlu1 %v1992_v9  ;;  %v5821_v10 = vpop.f32.mrf.mxu1  ;;  %v1995_v12 = vsel %vm649_vm2, %v1595_v63, -inf }
 0x348   :  { %1996 = vmax.xlane.f32.xlu0 %v1995_v12  ;;  %v5826_v13 = vpop.f32.mrf.mxu0 }
 0x349   :  { %v1673_v16 = vpop.f32.mrf.mxu1 }
 0x34a   :  { %v1751_v17 = vpop.f32.mrf.mxu0  ;;  %v1998_v20 = vsel %vm649_vm2, %v1673_v16, -inf }
 0x34b   :  { %v5831_v23 = vpop.f32.mrf.mxu1  ;;  %v2001_v25 = vsel %vm649_vm2, %v1751_v17, -inf }
 0x34c   :  { %1999 = vmax.xlane.f32.xlu0 %v1998_v20  ;;  %2002 = vmax.xlane.f32.xlu1 %v2001_v25  ;;  %v5836_v26 = vpop.f32.mrf.mxu0 }
 0x34d   :  { %v1829_v27 = vpop.f32.mrf.mxu1 }
 0x34e   :  { %v1907_v28 = vpop.f32.mrf.mxu0  ;;  %v2004_v29 = vsel %vm649_vm2, %v1829_v27, -inf }
 0x34f   :  { %v5841_v30 = vpop.f32.mrf.mxu1  ;;  %v2007_v31 = vsel %vm649_vm2, %v1907_v28, -inf }
 0x350   :  { %2005 = vmax.xlane.f32.xlu0 %v2004_v29  ;;  %2008 = vmax.xlane.f32.xlu1 %v2007_v31  ;;  %v5846_v32 = vpop.f32.mrf.mxu0 }
 0x351   :  { %v1985_v33 = vpop.f32.mrf.mxu1 }
 0x352   :  { %v2010_v34 = vsel %vm649_vm2, %v1985_v33, -inf }
 0x353   :  { %v5851_v35 = vpop.f32.mrf.mxu1 }
 0x354   :  { %2011 = vmax.xlane.f32.xlu0 %v2010_v34 }
 0x361   :  { %2077 = vrot.lane.b32.xlu1 %v6233_v0, %s6210_s13 }
 0x365   :  { %2231 = vrot.lane.b32.xlu1 %v6238_v1, %s6210_s13 }
 0x369   :  { %2308 = vrot.lane.b32.xlu1 %v6253_v4, %s6210_s13 }
 0x36a   :  { %2154 = vrot.lane.b32.xlu0 %v6248_v3, %s6210_s13 }
 0x36d   :  { %2462 = vrot.lane.b32.xlu1 %v6268_v6, %s6210_s13 }
 0x36e   :  { %2385 = vrot.lane.b32.xlu0 %v6263_v5, %s6210_s13 }
 0x371   :  { %2616 = vrot.lane.b32.xlu1 %v6280_v8, %s6210_s13 }
 0x372   :  { %2539 = vrot.lane.b32.xlu0 %v6275_v7, %s6210_s13 }
 0x375   :  { %2814 = vrot.lane.b32.xlu1 %v6248_v3, %s6211_s14 }
 0x376   :  { %2736 = vrot.lane.b32.xlu0 %v6233_v0, %s6211_s14 }
 0x379   :  { %2812 = vrot.lane.b32.xlu1 %v6292_v14, %s6212_s15 }
 0x37a   :  { %2734 = vrot.lane.b32.xlu0 %v6285_v11, %s6212_s15 }
 0x37d   :  { %2970 = vrot.lane.b32.xlu1 %v6253_v4, %s6211_s14 }
 0x37e   :  { %2892 = vrot.lane.b32.xlu0 %v6238_v1, %s6211_s14 }
 0x3cd   :  { %v1991_v36 = vpop.xlane.xlu0 %1990 }
 0x3ce   :  { %v2013_v37 = vsub.f32 %v1439_v58, %v1991_v36 }
 0x3d0   :  { %v2021_v38 = vmul.f32 1.442695, %v2013_v37  ;;  %v1994_v3 = vpop.xlane.xlu1 %1993 }
 0x3d1   :  { %v2014_v39 = vsub.f32 %v1517_v62, %v1994_v3  ;;  %v1997_v40 = vpop.xlane.xlu0 %1996 }
 0x3d2   :  { %6100 = vpow2.f32 %v2021_v38  ;;  %v2015_v0 = vsub.f32 %v1595_v63, %v1997_v40 }
 0x3d3   :  { %v2023_v41 = vmul.f32 1.442695, %v2014_v39 }
 0x3d4   :  { %v2025_v42 = vmul.f32 1.442695, %v2015_v0 }
 0x3d5   :  { %6102 = vpow2.f32 %v2023_v41  ;;  %v2000_v43 = vpop.xlane.xlu0 %1999  ;;  %v2003_v44 = vpop.xlane.xlu1 %2002 }
 0x3d6   :  { %6104 = vpow2.f32 %v2025_v42  ;;  %v2016_v45 = vsub.f32 %v1673_v16, %v2000_v43  ;;  %v2017_v46 = vsub.f32 %v1751_v17, %v2003_v44 }
 0x3d8   :  { %v2027_v4 = vmul.f32 1.442695, %v2016_v45  ;;  %v2029_v47 = vmul.f32 1.442695, %v2017_v46 }
 0x3d9   :  { %v2006_v48 = vpop.xlane.xlu0 %2005  ;;  %v2009_v1 = vpop.xlane.xlu1 %2008 }
 0x3da   :  { %6106 = vpow2.f32 %v2027_v4  ;;  %v2018_v49 = vsub.f32 %v1829_v27, %v2006_v48  ;;  %v2019_v50 = vsub.f32 %v1907_v28, %v2009_v1 }
 0x3db   :  { %6108 = vpow2.f32 %v2029_v47 }
 0x3dc   :  { %v2031_v51 = vmul.f32 1.442695, %v2018_v49  ;;  %v2033_v52 = vmul.f32 1.442695, %v2019_v50 }
 0x3dd   :  { %v2012_v53 = vpop.xlane.xlu0 %2011  ;;  %v2078_v54 = vpop.permute.xlu1 %2077 }
 0x3de   :  { %6110 = vpow2.f32 %v2031_v51  ;;  %v2020_v55 = vsub.f32 %v1985_v33, %v2012_v53  ;;  %5853 = vmatpush3.msk.msra.mxu0 %vm744_vm3, %v2078_v54 }
 0x3df   :  { %v6606_v56 = vpop.eup %6100  ;;  %6112 = vpow2.f32 %v2033_v52  ;;  %5862 = vmatprep.subr.mxu0 %v6204_v2 }
 0x3e0   :  { %v2035_v57 = vmul.f32 1.442695, %v2020_v55  ;;  %v2037_v58 = vsel %vm649_vm2, %v6606_v56, 0.0 }
 0x3e1   :  { %2038 = vadd.xlane.f32.xlu1 %v2037_v58  ;;  %v2155_v59 = vpop.permute.xlu0 %2154 }
 0x3e2   :  { %v6611_v60 = vpop.eup %6102  ;;  %6114 = vpow2.f32 %v2035_v57  ;;  %5858 = vmatpush3.msk.msra.mxu1 %vm744_vm3, %v2155_v59 }
 0x3e3   :  { %v6614_v61 = vpop.eup %6104  ;;  %v2040_v62 = vsel %vm649_vm2, %v6611_v60, 0.0  ;;  %5867 = vmatprep.subr.mxu1 %v6204_v2 }
 0x3e4   :  { %2041 = vadd.xlane.f32.xlu0 %v2040_v62  ;;  %v2043_v63 = vsel %vm649_vm2, %v6614_v61, 0.0 }
 0x3e5   :  { %2044 = vadd.xlane.f32.xlu1 %v2043_v63  ;;  %v2386_v29 = vpop.permute.xlu0 %2385 }
 0x3e7   :  { %v6621_v9 = vpop.eup %6106 }
 0x3e8   :  { %v6623_v10 = vpop.eup %6108  ;;  %v2046_v12 = vsel %vm649_vm2, %v6621_v9, 0.0 }
 0x3e9   :  { %2047 = vadd.xlane.f32.xlu0 %v2046_v12  ;;  %v2049_v13 = vsel %vm649_vm2, %v6623_v10, 0.0  ;;  %v2540_v30 = vpop.permute.xlu0 %2539 }
 0x3ea   :  { %2050 = vadd.xlane.f32.xlu1 %v2049_v13 }
 0x3eb   :  { %v6629_v16 = vpop.eup %6110 }
 0x3ec   :  { %v6631_v17 = vpop.eup %6112  ;;  %v2052_v20 = vsel %vm649_vm2, %v6629_v16, 0.0 }
 0x3ed   :  { %2053 = vadd.xlane.f32.xlu0 %v2052_v20  ;;  %v2055_v23 = vsel %vm649_vm2, %v6631_v17, 0.0  ;;  %v6665_v31 = vpop.permute.xlu0 %2736 }
 0x3ee   :  { %2056 = vadd.xlane.f32.xlu1 %v2055_v23 }
 0x3ef   :  { %v6637_v25 = vpop.eup %6114 }
 0x3f0   :  { %v2058_v26 = vsel %vm649_vm2, %v6637_v25, 0.0 }
 0x3f1   :  { %2059 = vadd.xlane.f32.xlu0 %v2058_v26  ;;  %v6669_v33 = vpop.permute.xlu0 %2734 }
 0x3ff   :  { %2968 = vrot.lane.b32.xlu1 %v6308_v18, %s6212_s15 }
 0x403   :  { %3126 = vrot.lane.b32.xlu1 %v6268_v6, %s6211_s14  ;;  %v2232_v6 = vpop.permute.xlu1 %2231 }
 0x407   :  { %2890 = vrot.lane.b32.xlu0 %v6295_v15, %s6212_s15  ;;  %3124 = vrot.lane.b32.xlu1 %v6326_v21, %s6212_s15  ;;  %v2309_v27 = vpop.permute.xlu1 %2308 }
 0x40b   :  { %3048 = vrot.lane.b32.xlu0 %v6263_v5, %s6211_s14  ;;  %3282 = vrot.lane.b32.xlu1 %v6280_v8, %s6211_s14  ;;  %v2463_v28 = vpop.permute.xlu1 %2462 }
 0x40f   :  { %3046 = vrot.lane.b32.xlu0 %v6311_v19, %s6212_s15  ;;  %3280 = vrot.lane.b32.xlu1 %v6344_v24, %s6212_s15  ;;  %v6661_v5 = vpop.permute.xlu1 %2616 }
 0x413   :  { %3204 = vrot.lane.b32.xlu0 %v6275_v7, %s6211_s14  ;;  %v6663_v8 = vpop.permute.xlu1 %2814  ;;  %v6673_v7 = vpop.permute.xlu0 %2892 }
 0x417   :  { %3202 = vrot.lane.b32.xlu0 %v6329_v22, %s6212_s15  ;;  %v6667_v32 = vpop.permute.xlu1 %2812 }
 0x41b   :  { %v6671_v34 = vpop.permute.xlu1 %2970 }
 0x46a   :  { %v2039_v35 = vpop.xlane.xlu1 %2038 }
 0x46b   :  { %6116 = vrcp.f32 %v2039_v35 }
 0x46d   :  { %v2042_v36 = vpop.xlane.xlu0 %2041 }
 0x46e   :  { %6118 = vrcp.f32 %v2042_v36  ;;  %v2045_v37 = vpop.xlane.xlu1 %2044 }
 0x46f   :  { %6120 = vrcp.f32 %v2045_v37 }
 0x472   :  { %v2048_v38 = vpop.xlane.xlu0 %2047 }
 0x473   :  { %6122 = vrcp.f32 %v2048_v38  ;;  %v2051_v3 = vpop.xlane.xlu1 %2050 }
 0x474   :  { %6124 = vrcp.f32 %v2051_v3 }
 0x476   :  { %v2054_v39 = vpop.xlane.xlu0 %2053 }
 0x477   :  { %6126 = vrcp.f32 %v2054_v39  ;;  %v2057_v40 = vpop.xlane.xlu1 %2056 }
 0x478   :  { %v6117_v0 = vpop.eup %6116  ;;  %6128 = vrcp.f32 %v2057_v40 }
 0x479   :  { %v2069_v41 = vmul.f32 %v6117_v0, %v6606_v56 }
 0x47a   :  { %v2060_v42 = vpop.xlane.xlu0 %2059 }
 0x47b   :  { %v6119_v43 = vpop.eup %6118  ;;  %6130 = vrcp.f32 %v2060_v42  ;;  %5855 = vmatmul.mubr.msk.f32.vlgmr.msra.gmra.mxu0 %vm740_vm4, %v2069_v41  ;;  %v2969_v48 = vpop.permute.xlu1 %2968 }
 0x47c   :  { %v6121_v44 = vpop.eup %6120  ;;  %5863 = vmatpush3.msk.msra.mxu0 %vm744_vm3, %v2232_v6  ;;  %5864 = vmatprep.mubr.msk.f32.mxu0 %vm6205_vm0, %v6204_v2  ;;  %v2070_v45 = vmul.f32 %v6119_v43, %v6611_v60 }
 0x47d   :  { %5872 = vmatprep.subr.mxu0 %v6204_v2  ;;  %v2071_v46 = vmul.f32 %v6121_v44, %v6614_v61 }
 0x47e   :  { %5860 = vmatmul.mubr.msk.f32.vlgmr.msra.gmra.mxu1 %vm740_vm4, %v2070_v45  ;;  %v2891_v4 = vpop.permute.xlu0 %2890 }
 0x47f   :  { %5865 = vmatmul.mubr.msk.f32.vlgmr.msra.gmra.mxu0 %vm740_vm4, %v2071_v46  ;;  %5868 = vmatpush3.msk.msra.mxu1 %vm744_vm3, %v2309_v27  ;;  %v3127_v56 = vpop.permute.xlu1 %3126 }
 0x480   :  { %v6123_v47 = vpop.eup %6122  ;;  %5873 = vmatpush3.msk.msra.mxu0 %vm744_vm3, %v2386_v29  ;;  %5869 = vmatprep.mubr.msk.f32.mxu1 %vm6205_vm0, %v6204_v2 }
 0x481   :  { %v6125_v1 = vpop.eup %6124  ;;  %5874 = vmatprep.mubr.msk.f32.mxu0 %vm6205_vm0, %v6204_v2  ;;  %5877 = vmatprep.subr.mxu1 %v6204_v2  ;;  %v2072_v49 = vmul.f32 %v6123_v47, %v6621_v9 }
 0x482   :  { %5882 = vmatprep.subr.mxu0 %v6204_v2  ;;  %v2073_v50 = vmul.f32 %v6125_v1, %v6623_v10  ;;  %v3049_v51 = vpop.permute.xlu0 %3048 }
 0x483   :  { %5870 = vmatmul.mubr.msk.f32.vlgmr.msra.gmra.mxu1 %vm740_vm4, %v2072_v49  ;;  %v3125_v60 = vpop.permute.xlu1 %3124 }
 0x484   :  { %v6127_v52 = vpop.eup %6126  ;;  %5875 = vmatmul.mubr.msk.f32.vlgmr.msra.gmra.mxu0 %vm740_vm4, %v2073_v50  ;;  %5878 = vmatpush3.msk.msra.mxu1 %vm744_vm3, %v2463_v28  ;;  %v6796_v50 = vld [vmem:[%s7241_s0] sm:$0x3] }
 0x485   :  { %v6129_v53 = vpop.eup %6128  ;;  %5883 = vmatpush3.msk.msra.mxu0 %vm744_vm3, %v2540_v30  ;;  %5879 = vmatprep.mubr.msk.f32.mxu1 %vm6205_vm0, %v6204_v2  ;;  %v2074_v54 = vmul.f32 %v6127_v52, %v6629_v16  ;;  %v6808_v52 = vld [vmem:[%s7241_s0 + $0x6] sm:$0x3] }
 0x486   :  { %5884 = vmatprep.mubr.msk.f32.mxu0 %vm6205_vm0, %v6204_v2  ;;  %5887 = vmatprep.subr.mxu1 %v6204_v2  ;;  %v2075_v55 = vmul.f32 %v6129_v53, %v6631_v17  ;;  %v3047_v59 = vpop.permute.xlu0 %3046  ;;  %v6814_v53 = vld [vmem:[%s7241_s0 + $0x2] sm:$0x3] }
 0x487   :  { %5892 = vmatprep.subr.mxu0 %v6204_v2  ;;  %5880 = vmatmul.mubr.msk.f32.vlgmr.msra.gmra.mxu1 %vm740_vm4, %v2074_v54  ;;  %v3283_v62 = vpop.permute.xlu1 %3282  ;;  %v6820_v54 = vld [vmem:[%s7241_s0 + $0xa] sm:$0x3] }
 0x488   :  { %v6131_v57 = vpop.eup %6130  ;;  %5885 = vmatmul.mubr.msk.f32.vlgmr.msra.gmra.mxu0 %vm740_vm4, %v2075_v55  ;;  %5888 = vmatpush3.msk.msra.mxu1 %vm744_vm3, %v6661_v5  ;;  %v6826_v55 = vld [vmem:[%s7241_s0 + $0x8] sm:$0x3] }
 0x489   :  { %5893 = vmatpush3.xpose.msk.msra.mxu0 %vm27_vm1, %v6665_v31  ;;  %5889 = vmatprep.mubr.msk.f32.mxu1 %vm6205_vm0, %v6204_v2  ;;  %v2076_v58 = vmul.f32 %v6131_v57, %v6637_v25  ;;  %v6838_v57 = vld [vmem:[%s7241_s0 + $0xc] sm:$0x3] }
 0x48a   :  { %5894 = vmatprep.mubr.msk.f32.mxu0 %vm6205_vm0, %v6204_v2  ;;  %5897 = vmatprep.subr.mxu1 %v6204_v2  ;;  %v3205_v61 = vpop.permute.xlu0 %3204 }
 0x48b   :  { %5902 = vmatprep.subr.mxu0 %v6204_v2  ;;  %5890 = vmatmul.mubr.msk.f32.vlgmr.msra.gmra.mxu1 %vm740_vm4, %v2076_v58  ;;  %v3281_v9 = vpop.permute.xlu1 %3280 }
 0x48c   :  { %5895 = vmatmul.mubr.msk.f32.vlgmr.msra.gmra.mxu0 %vm27_vm1, %v6669_v33  ;;  %5898 = vmatpush3.xpose.msk.msra.mxu1 %vm27_vm1, %v6663_v8 }
 0x48d   :  { %5903 = vmatpush3.xpose.msk.msra.mxu0 %vm27_vm1, %v6673_v7  ;;  %5899 = vmatprep.mubr.msk.f32.mxu1 %vm6205_vm0, %v6204_v2 }
 0x48e   :  { %5904 = vmatprep.mubr.msk.f32.mxu0 %vm6205_vm0, %v6204_v2  ;;  %5907 = vmatprep.subr.mxu1 %v6204_v2  ;;  %v3203_v63 = vpop.permute.xlu0 %3202 }
 0x48f   :  { %5912 = vmatprep.subr.mxu0 %v6204_v2  ;;  %5900 = vmatmul.mubr.msk.f32.vlgmr.msra.gmra.mxu1 %vm27_vm1, %v6667_v32 }
 0x490   :  { %5905 = vmatmul.mubr.msk.f32.vlgmr.msra.gmra.mxu0 %vm27_vm1, %v2891_v4  ;;  %5908 = vmatpush3.xpose.msk.msra.mxu1 %vm27_vm1, %v6671_v34 }
 0x491   :  { %5913 = vmatpush3.xpose.msk.msra.mxu0 %vm27_vm1, %v3049_v51  ;;  %5909 = vmatprep.mubr.msk.f32.mxu1 %vm6205_vm0, %v6204_v2  ;;  %v6802_v51 = vld [vmem:[%s7241_s0 + $0x4] sm:$0x3] }
 0x492   :  { %5914 = vmatprep.mubr.msk.f32.mxu0 %vm6205_vm0, %v6204_v2  ;;  %5917 = vmatprep.subr.mxu1 %v6204_v2 }
 0x493   :  { %5910 = vmatmul.mubr.msk.f32.vlgmr.msra.gmra.mxu1 %vm27_vm1, %v2969_v48  ;;  %5922 = vmatprep.subr.mxu0 %v6204_v2 }
 0x494   :  { %5915 = vmatmul.mubr.msk.f32.vlgmr.msra.gmra.mxu0 %vm27_vm1, %v3047_v59  ;;  %5918 = vmatpush3.xpose.msk.msra.mxu1 %vm27_vm1, %v3127_v56  ;;  %v6832_v56 = vld [vmem:[%s7241_s0 + $0xe] sm:$0x3]  ;;  %s6216_s0 = smov 40  }
 0x495   :  { %5923 = vmatpush3.xpose.msk.msra.mxu0 %vm27_vm1, %v3205_v61  ;;  %5919 = vmatprep.mubr.msk.f32.mxu1 %vm6205_vm0, %v6204_v2 }
 0x496   :  { %5924 = vmatprep.mubr.msk.f32.mxu0 %vm6205_vm0, %v6204_v2  ;;  %5927 = vmatprep.subr.mxu1 %v6204_v2 }
 0x497   :  { %5920 = vmatmul.mubr.msk.f32.vlgmr.msra.gmra.mxu1 %vm27_vm1, %v3125_v60  ;;  %5932 = vmatprep.subr.mxu0 %v6204_v2 }
 0x498   :  { %5925 = vmatmul.mubr.msk.f32.vlgmr.msra.gmra.mxu0 %vm27_vm1, %v3203_v63  ;;  %5928 = vmatpush3.xpose.msk.msra.mxu1 %vm27_vm1, %v3283_v62 }
 0x499   :  { %5929 = vmatprep.mubr.msk.f32.mxu1 %vm6205_vm0, %v6204_v2  ;;  %5937 = vmatprep.subr.mxu1 %v6204_v2 }
 0x49a   :  { %5934 = vmatprep.mubr.msk.f32.mxu0 %vm6205_vm0, %v6204_v2 }
 0x49b   :  { %5930 = vmatmul.mubr.msk.f32.vlgmr.msra.gmra.mxu1 %vm27_vm1, %v3281_v9 }
 0x49c   :  { %5939 = vmatprep.mubr.msk.f32.mxu1 %vm6205_vm0, %v6204_v2 }
 0x53b   :  { %v6766_v10 = vpop.f32.mrf.mxu0 }
 0x53d   :  { %v5856_v12 = vpop.f32.mrf.mxu0 }
 0x53e   :  { %v6768_v13 = vpop.f32.mrf.mxu1 }
 0x53f   :  { %v6770_v16 = vpop.f32.mrf.mxu0 }
 0x540   :  { %v5861_v17 = vpop.f32.mrf.mxu1 }
 0x541   :  { %v5866_v20 = vpop.f32.mrf.mxu0 }
 0x543   :  { %v6772_v23 = vpop.f32.mrf.mxu1 }
 0x544   :  { %v6774_v25 = vpop.f32.mrf.mxu0 }
 0x545   :  { %v5871_v26 = vpop.f32.mrf.mxu1 }
 0x546   :  { %v5876_v6 = vpop.f32.mrf.mxu0 }
 0x547   :  { %v6776_v27 = vpop.f32.mrf.mxu1 }
 0x548   :  { %v6778_v28 = vpop.f32.mrf.mxu0 }
 0x549   :  { %v5881_v29 = vpop.f32.mrf.mxu1 }
 0x54a   :  { %v5886_v5 = vpop.f32.mrf.mxu0 }
 0x54b   :  { %v6780_v30 = vpop.f32.mrf.mxu1 }
 0x54c   :  { %v2808_v8 = vpop.f32.mrf.mxu0 }
 0x54d   :  { %v5891_v31 = vpop.f32.mrf.mxu1  ;;  %v3358_v32 = vsel %vm649_vm2, %v2808_v8, -inf }
 0x54e   :  { %3359 = vmax.xlane.f32.xlu0 %v3358_v32  ;;  %v5896_v33 = vpop.f32.mrf.mxu0 }
 0x54f   :  { %v2886_v34 = vpop.f32.mrf.mxu1 }
 0x550   :  { %v2964_v7 = vpop.f32.mrf.mxu0  ;;  %v3361_v35 = vsel %vm649_vm2, %v2886_v34, -inf }
 0x551   :  { %3362 = vmax.xlane.f32.xlu1 %v3361_v35  ;;  %v5901_v36 = vpop.f32.mrf.mxu1  ;;  %v3364_v37 = vsel %vm649_vm2, %v2964_v7, -inf }
 0x552   :  { %3365 = vmax.xlane.f32.xlu0 %v3364_v37  ;;  %v5906_v38 = vpop.f32.mrf.mxu0 }
 0x553   :  { %v3042_v3 = vpop.f32.mrf.mxu1 }
 0x554   :  { %v3120_v39 = vpop.f32.mrf.mxu0  ;;  %v3367_v40 = vsel %vm649_vm2, %v3042_v3, -inf }
 0x555   :  { %v5911_v0 = vpop.f32.mrf.mxu1  ;;  %v3370_v41 = vsel %vm649_vm2, %v3120_v39, -inf }
 0x556   :  { %3368 = vmax.xlane.f32.xlu0 %v3367_v40  ;;  %3371 = vmax.xlane.f32.xlu1 %v3370_v41  ;;  %v5916_v42 = vpop.f32.mrf.mxu0 }
 0x557   :  { %v3198_v43 = vpop.f32.mrf.mxu1 }
 0x558   :  { %v3276_v44 = vpop.f32.mrf.mxu0  ;;  %v3373_v45 = vsel %vm649_vm2, %v3198_v43, -inf }
 0x559   :  { %v5921_v46 = vpop.f32.mrf.mxu1  ;;  %v3376_v4 = vsel %vm649_vm2, %v3276_v44, -inf }
 0x55a   :  { %3374 = vmax.xlane.f32.xlu0 %v3373_v45  ;;  %3377 = vmax.xlane.f32.xlu1 %v3376_v4  ;;  %v5926_v47 = vpop.f32.mrf.mxu0 }
 0x55b   :  { %v6789_v48 = vpop.f32.mrf.mxu1 }
 0x55c   :  { %v3379_v1 = vsel %vm649_vm2, %v6789_v48, -inf }
 0x55d   :  { %v5931_v49 = vpop.f32.mrf.mxu1 }
 0x55e   :  { %3380 = vmax.xlane.f32.xlu0 %v3379_v1 }
 0x56b   :  { %3446 = vrot.lane.b32.xlu1 %v6796_v50, %s6213_s18 }
 0x56f   :  { %3600 = vrot.lane.b32.xlu1 %v6802_v51, %s6213_s18 }
 0x573   :  { %3677 = vrot.lane.b32.xlu1 %v6808_v52, %s6213_s18 }
 0x574   :  { %3523 = vrot.lane.b32.xlu0 %v6814_v53, %s6213_s18 }
 0x577   :  { %3831 = vrot.lane.b32.xlu1 %v6820_v54, %s6213_s18 }
 0x578   :  { %3754 = vrot.lane.b32.xlu0 %v6826_v55, %s6213_s18 }
 0x57b   :  { %3985 = vrot.lane.b32.xlu1 %v6832_v56, %s6213_s18 }
 0x57c   :  { %3908 = vrot.lane.b32.xlu0 %v6838_v57, %s6213_s18 }
 0x57f   :  { %4183 = vrot.lane.b32.xlu1 %v6814_v53, %s6214_s4 }
 0x580   :  { %4105 = vrot.lane.b32.xlu0 %v6796_v50, %s6214_s4 }
 0x583   :  { %4181 = vrot.lane.b32.xlu1 %v6292_v14, %s6215_s5 }
 0x584   :  { %4103 = vrot.lane.b32.xlu0 %v6285_v11, %s6215_s5 }
 0x587   :  { %4339 = vrot.lane.b32.xlu1 %v6808_v52, %s6214_s4 }
 0x588   :  { %4261 = vrot.lane.b32.xlu0 %v6802_v51, %s6214_s4 }
 0x5d7   :  { %v3360_v58 = vpop.xlane.xlu0 %3359 }
 0x5d8   :  { %v3382_v59 = vsub.f32 %v2808_v8, %v3360_v58 }
 0x5da   :  { %v3390_v60 = vmul.f32 1.442695, %v3382_v59  ;;  %v3363_v61 = vpop.xlane.xlu1 %3362 }
 0x5db   :  { %v3383_v62 = vsub.f32 %v2886_v34, %v3363_v61  ;;  %v3366_v63 = vpop.xlane.xlu0 %3365 }
 0x5dc   :  { %6132 = vpow2.f32 %v3390_v60  ;;  %v3384_v9 = vsub.f32 %v2964_v7, %v3366_v63 }
 0x5dd   :  { %v3392_v12 = vmul.f32 1.442695, %v3383_v62 }
 0x5de   :  { %v3394_v17 = vmul.f32 1.442695, %v3384_v9 }
 0x5df   :  { %6134 = vpow2.f32 %v3392_v12  ;;  %v3369_v14 = vpop.xlane.xlu0 %3368  ;;  %v3372_v20 = vpop.xlane.xlu1 %3371 }
 0x5e0   :  { %6136 = vpow2.f32 %v3394_v17  ;;  %v3385_v11 = vsub.f32 %v3042_v3, %v3369_v14  ;;  %v3386_v26 = vsub.f32 %v3120_v39, %v3372_v20 }
 0x5e2   :  { %v3396_v6 = vmul.f32 1.442695, %v3385_v11  ;;  %v3398_v29 = vmul.f32 1.442695, %v3386_v26 }
 0x5e3   :  { %v3375_v5 = vpop.xlane.xlu0 %3374  ;;  %v3378_v31 = vpop.xlane.xlu1 %3377 }
 0x5e4   :  { %6138 = vpow2.f32 %v3396_v6  ;;  %v3387_v8 = vsub.f32 %v3198_v43, %v3375_v5  ;;  %v3388_v32 = vsub.f32 %v3276_v44, %v3378_v31 }
 0x5e5   :  { %6140 = vpow2.f32 %v3398_v29 }
 0x5e6   :  { %v3400_v33 = vmul.f32 1.442695, %v3387_v8  ;;  %v3402_v34 = vmul.f32 1.442695, %v3388_v32 }
 0x5e7   :  { %v3381_v35 = vpop.xlane.xlu0 %3380  ;;  %v3447_v7 = vpop.permute.xlu1 %3446 }
 0x5e8   :  { %6142 = vpow2.f32 %v3400_v33  ;;  %v3389_v36 = vsub.f32 %v6789_v48, %v3381_v35  ;;  %5933 = vmatpush3.msk.msra.mxu0 %vm744_vm3, %v3447_v7 }
 0x5e9   :  { %v6855_v37 = vpop.eup %6132  ;;  %6144 = vpow2.f32 %v3402_v34  ;;  %5942 = vmatprep.subr.mxu0 %v6204_v2 }
 0x5ea   :  { %v3404_v38 = vmul.f32 1.442695, %v3389_v36  ;;  %v3406_v3 = vsel %vm649_vm2, %v6855_v37, 0.0 }
 0x5eb   :  { %3407 = vadd.xlane.f32.xlu1 %v3406_v3  ;;  %v3524_v39 = vpop.permute.xlu0 %3523 }
 0x5ec   :  { %v6860_v40 = vpop.eup %6134  ;;  %6146 = vpow2.f32 %v3404_v38  ;;  %5938 = vmatpush3.msk.msra.mxu1 %vm744_vm3, %v3524_v39 }
 0x5ed   :  { %v6863_v0 = vpop.eup %6136  ;;  %v3409_v41 = vsel %vm649_vm2, %v6860_v40, 0.0  ;;  %5947 = vmatprep.subr.mxu1 %v6204_v2 }
 0x5ee   :  { %3410 = vadd.xlane.f32.xlu0 %v3409_v41  ;;  %v3412_v42 = vsel %vm649_vm2, %v6863_v0, 0.0 }
 0x5ef   :  { %3413 = vadd.xlane.f32.xlu1 %v3412_v42  ;;  %v3755_v59 = vpop.permute.xlu0 %3754 }
 0x5f1   :  { %v6870_v43 = vpop.eup %6138 }
 0x5f2   :  { %v6872_v44 = vpop.eup %6140  ;;  %v3415_v45 = vsel %vm649_vm2, %v6870_v43, 0.0 }
 0x5f3   :  { %3416 = vadd.xlane.f32.xlu0 %v3415_v45  ;;  %v3418_v46 = vsel %vm649_vm2, %v6872_v44, 0.0  ;;  %v3909_v61 = vpop.permute.xlu0 %3908 }
 0x5f4   :  { %3419 = vadd.xlane.f32.xlu1 %v3418_v46 }
 0x5f5   :  { %v6878_v4 = vpop.eup %6142 }
 0x5f6   :  { %v6880_v47 = vpop.eup %6144  ;;  %v3421_v48 = vsel %vm649_vm2, %v6878_v4, 0.0 }
 0x5f7   :  { %3422 = vadd.xlane.f32.xlu0 %v3421_v48  ;;  %v3424_v1 = vsel %vm649_vm2, %v6880_v47, 0.0  ;;  %v6914_v63 = vpop.permute.xlu0 %4105 }
 0x5f8   :  { %3425 = vadd.xlane.f32.xlu1 %v3424_v1 }
 0x5f9   :  { %v6886_v49 = vpop.eup %6146 }
 0x5fa   :  { %v3427_v58 = vsel %vm649_vm2, %v6886_v49, 0.0 }
 0x5fb   :  { %3428 = vadd.xlane.f32.xlu0 %v3427_v58 }
 0x609   :  { %4337 = vrot.lane.b32.xlu1 %v6308_v18, %s6215_s5 }
 0x60d   :  { %4495 = vrot.lane.b32.xlu1 %v6820_v54, %s6214_s4 }
 0x611   :  { %4259 = vrot.lane.b32.xlu0 %v6295_v15, %s6215_s5  ;;  %4493 = vrot.lane.b32.xlu1 %v6326_v21, %s6215_s5  ;;  %v3601_v15 = vpop.permute.xlu1 %3600 }
 0x615   :  { %4417 = vrot.lane.b32.xlu0 %v6826_v55, %s6214_s4  ;;  %4651 = vrot.lane.b32.xlu1 %v6832_v56, %s6214_s4  ;;  %v3678_v18 = vpop.permute.xlu1 %3677 }
 0x619   :  { %4415 = vrot.lane.b32.xlu0 %v6311_v19, %s6215_s5  ;;  %4649 = vrot.lane.b32.xlu1 %v6344_v24, %s6215_s5  ;;  %v3832_v21 = vpop.permute.xlu1 %3831  ;;  %v6918_v24 = vpop.permute.xlu0 %4103 }
 0x61d   :  { %4573 = vrot.lane.b32.xlu0 %v6838_v57, %s6214_s4  ;;  %v6910_v60 = vpop.permute.xlu1 %3985  ;;  %v6922_v12 = vpop.permute.xlu0 %4261 }
 0x621   :  { %4571 = vrot.lane.b32.xlu0 %v6329_v22, %s6215_s5  ;;  %v6912_v62 = vpop.permute.xlu1 %4183 }
 0x625   :  { %v6916_v19 = vpop.permute.xlu1 %4181 }
 0x629   :  { %v6920_v9 = vpop.permute.xlu1 %4339 }
 0x674   :  { %v3408_v22 = vpop.xlane.xlu1 %3407 }
 0x675   :  { %6148 = vrcp.f32 %v3408_v22 }
 0x677   :  { %v3411_v17 = vpop.xlane.xlu0 %3410 }
 0x678   :  { %6150 = vrcp.f32 %v3411_v17  ;;  %v3414_v14 = vpop.xlane.xlu1 %3413 }
 0x679   :  { %6152 = vrcp.f32 %v3414_v14 }
 0x67c   :  { %v3417_v20 = vpop.xlane.xlu0 %3416 }
 0x67d   :  { %6154 = vrcp.f32 %v3417_v20  ;;  %v3420_v11 = vpop.xlane.xlu1 %3419 }
 0x67e   :  { %6156 = vrcp.f32 %v3420_v11 }
 0x680   :  { %v3423_v26 = vpop.xlane.xlu0 %3422 }
 0x681   :  { %6158 = vrcp.f32 %v3423_v26  ;;  %v3426_v6 = vpop.xlane.xlu1 %3425 }
 0x682   :  { %v6149_v29 = vpop.eup %6148  ;;  %6160 = vrcp.f32 %v3426_v6 }
 0x683   :  { %v3438_v5 = vmul.f32 %v6149_v29, %v6855_v37 }
 0x684   :  { %v3429_v31 = vpop.xlane.xlu0 %3428 }
 0x685   :  { %v6151_v8 = vpop.eup %6150  ;;  %6162 = vrcp.f32 %v3429_v31  ;;  %5935 = vmatmul.mubr.msk.f32.vlgmr.msra.gmra.mxu0 %vm740_vm4, %v3438_v5  ;;  %v4338_v36 = vpop.permute.xlu1 %4337 }
 0x686   :  { %v6153_v32 = vpop.eup %6152  ;;  %5943 = vmatpush3.msk.msra.mxu0 %vm744_vm3, %v3601_v15  ;;  %5944 = vmatprep.mubr.msk.f32.mxu0 %vm6205_vm0, %v6204_v2  ;;  %v3439_v33 = vmul.f32 %v6151_v8, %v6860_v40 }
 0x687   :  { %5952 = vmatprep.subr.mxu0 %v6204_v2  ;;  %v3440_v34 = vmul.f32 %v6153_v32, %v6863_v0 }
 0x688   :  { %5940 = vmatmul.mubr.msk.f32.vlgmr.msra.gmra.mxu1 %vm740_vm4, %v3439_v33  ;;  %v4260_v35 = vpop.permute.xlu0 %4259 }
 0x689   :  { %5945 = vmatmul.mubr.msk.f32.vlgmr.msra.gmra.mxu0 %vm740_vm4, %v3440_v34  ;;  %5948 = vmatpush3.msk.msra.mxu1 %vm744_vm3, %v3678_v18 }
 0x68a   :  { %v6155_v7 = vpop.eup %6154  ;;  %5953 = vmatpush3.msk.msra.mxu0 %vm744_vm3, %v3755_v59  ;;  %5949 = vmatprep.mubr.msk.f32.mxu1 %vm6205_vm0, %v6204_v2 }
 0x68b   :  { %v6157_v37 = vpop.eup %6156  ;;  %5954 = vmatprep.mubr.msk.f32.mxu0 %vm6205_vm0, %v6204_v2  ;;  %5957 = vmatprep.subr.mxu1 %v6204_v2  ;;  %v3441_v38 = vmul.f32 %v6155_v7, %v6870_v43  ;;  %v4496_v43 = vpop.permute.xlu1 %4495 }
 0x68c   :  { %5962 = vmatprep.subr.mxu0 %v6204_v2  ;;  %v3442_v3 = vmul.f32 %v6157_v37, %v6872_v44  ;;  %v4418_v39 = vpop.permute.xlu0 %4417 }
 0x68d   :  { %5950 = vmatmul.mubr.msk.f32.vlgmr.msra.gmra.mxu1 %vm740_vm4, %v3441_v38 }
 0x68e   :  { %v6159_v40 = vpop.eup %6158  ;;  %5955 = vmatmul.mubr.msk.f32.vlgmr.msra.gmra.mxu0 %vm740_vm4, %v3442_v3  ;;  %5958 = vmatpush3.msk.msra.mxu1 %vm744_vm3, %v3832_v21 }
 0x68f   :  { %v6161_v0 = vpop.eup %6160  ;;  %5963 = vmatpush3.msk.msra.mxu0 %vm744_vm3, %v3909_v61  ;;  %5959 = vmatprep.mubr.msk.f32.mxu1 %vm6205_vm0, %v6204_v2  ;;  %v3443_v41 = vmul.f32 %v6159_v40, %v6878_v4  ;;  %v4494_v4 = vpop.permute.xlu1 %4493 }
 0x690   :  { %5964 = vmatprep.mubr.msk.f32.mxu0 %vm6205_vm0, %v6204_v2  ;;  %5967 = vmatprep.subr.mxu1 %v6204_v2  ;;  %v3444_v42 = vmul.f32 %v6161_v0, %v6880_v47  ;;  %v4416_v46 = vpop.permute.xlu0 %4415 }
 0x691   :  { %5972 = vmatprep.subr.mxu0 %v6204_v2  ;;  %5960 = vmatmul.mubr.msk.f32.vlgmr.msra.gmra.mxu1 %vm740_vm4, %v3443_v41 }
 0x692   :  { %v6163_v44 = vpop.eup %6162  ;;  %5965 = vmatmul.mubr.msk.f32.vlgmr.msra.gmra.mxu0 %vm740_vm4, %v3444_v42  ;;  %5968 = vmatpush3.msk.msra.mxu1 %vm744_vm3, %v6910_v60 }
 0x693   :  { %5973 = vmatpush3.xpose.msk.msra.mxu0 %vm27_vm1, %v6914_v63  ;;  %5969 = vmatprep.mubr.msk.f32.mxu1 %vm6205_vm0, %v6204_v2  ;;  %v3445_v45 = vmul.f32 %v6163_v44, %v6886_v49  ;;  %v4652_v48 = vpop.permute.xlu1 %4651 }
 0x694   :  { %5974 = vmatprep.mubr.msk.f32.mxu0 %vm6205_vm0, %v6204_v2  ;;  %5977 = vmatprep.subr.mxu1 %v6204_v2  ;;  %v4574_v47 = vpop.permute.xlu0 %4573 }
 0x695   :  { %5982 = vmatprep.subr.mxu0 %v6204_v2  ;;  %5970 = vmatmul.mubr.msk.f32.vlgmr.msra.gmra.mxu1 %vm740_vm4, %v3445_v45 }
 0x696   :  { %5975 = vmatmul.mubr.msk.f32.vlgmr.msra.gmra.mxu0 %vm27_vm1, %v6918_v24  ;;  %5978 = vmatpush3.xpose.msk.msra.mxu1 %vm27_vm1, %v6912_v62 }
 0x697   :  { %5983 = vmatpush3.xpose.msk.msra.mxu0 %vm27_vm1, %v6922_v12  ;;  %5979 = vmatprep.mubr.msk.f32.mxu1 %vm6205_vm0, %v6204_v2  ;;  %v4650_v49 = vpop.permute.xlu1 %4649 }
 0x698   :  { %5984 = vmatprep.mubr.msk.f32.mxu0 %vm6205_vm0, %v6204_v2  ;;  %5987 = vmatprep.subr.mxu1 %v6204_v2  ;;  %v4572_v1 = vpop.permute.xlu0 %4571 }
 0x699   :  { %5980 = vmatmul.mubr.msk.f32.vlgmr.msra.gmra.mxu1 %vm27_vm1, %v6916_v19  ;;  %5992 = vmatprep.subr.mxu0 %v6204_v2 }
 0x69a   :  { %5985 = vmatmul.mubr.msk.f32.vlgmr.msra.gmra.mxu0 %vm27_vm1, %v4260_v35  ;;  %5988 = vmatpush3.xpose.msk.msra.mxu1 %vm27_vm1, %v6920_v9 }
 0x69b   :  { %5993 = vmatpush3.xpose.msk.msra.mxu0 %vm27_vm1, %v4418_v39  ;;  %5989 = vmatprep.mubr.msk.f32.mxu1 %vm6205_vm0, %v6204_v2 }
 0x69c   :  { %5994 = vmatprep.mubr.msk.f32.mxu0 %vm6205_vm0, %v6204_v2  ;;  %5997 = vmatprep.subr.mxu1 %v6204_v2 }
 0x69d   :  { %5990 = vmatmul.mubr.msk.f32.vlgmr.msra.gmra.mxu1 %vm27_vm1, %v4338_v36  ;;  %6002 = vmatprep.subr.mxu0 %v6204_v2 }
 0x69e   :  { %5995 = vmatmul.mubr.msk.f32.vlgmr.msra.gmra.mxu0 %vm27_vm1, %v4416_v46  ;;  %5998 = vmatpush3.xpose.msk.msra.mxu1 %vm27_vm1, %v4496_v43 }
 0x69f   :  { %6003 = vmatpush3.xpose.msk.msra.mxu0 %vm27_vm1, %v4574_v47  ;;  %5999 = vmatprep.mubr.msk.f32.mxu1 %vm6205_vm0, %v6204_v2 }
 0x6a0   :  { %6004 = vmatprep.mubr.msk.f32.mxu0 %vm6205_vm0, %v6204_v2  ;;  %6007 = vmatprep.subr.mxu1 %v6204_v2 }
 0x6a1   :  { %6000 = vmatmul.mubr.msk.f32.vlgmr.msra.gmra.mxu1 %vm27_vm1, %v4494_v4  ;;  %6012 = vmatprep.subr.mxu0 %v6204_v2 }
 0x6a2   :  { %6005 = vmatmul.mubr.msk.f32.vlgmr.msra.gmra.mxu0 %vm27_vm1, %v4572_v1  ;;  %6008 = vmatpush3.xpose.msk.msra.mxu1 %vm27_vm1, %v4652_v48 }
 0x6a3   :  { %6009 = vmatprep.mubr.msk.f32.mxu1 %vm6205_vm0, %v6204_v2  ;;  %6017 = vmatprep.subr.mxu1 %v6204_v2 }
 0x6a4   :  { %6014 = vmatprep.mubr.msk.f32.mxu0 %vm6205_vm0, %v6204_v2 }
 0x6a5   :  { %6010 = vmatmul.mubr.msk.f32.vlgmr.msra.gmra.mxu1 %vm27_vm1, %v4650_v49 }
 0x6a6   :  { %6019 = vmatprep.mubr.msk.f32.mxu1 %vm6205_vm0, %v6204_v2 }
 0x745   :  { %v7015_v58 = vpop.f32.mrf.mxu0 }
 0x747   :  { %v5936_v15 = vpop.f32.mrf.mxu0 }
 0x748   :  { %v7017_v18 = vpop.f32.mrf.mxu1 }
 0x749   :  { %v7019_v21 = vpop.f32.mrf.mxu0 }
 0x74a   :  { %v5941_v59 = vpop.f32.mrf.mxu1 }
 0x74b   :  { %v5946_v60 = vpop.f32.mrf.mxu0 }
 0x74d   :  { %v7021_v61 = vpop.f32.mrf.mxu1 }
 0x74e   :  { %v7023_v62 = vpop.f32.mrf.mxu0 }
 0x74f   :  { %v5951_v63 = vpop.f32.mrf.mxu1 }
 0x750   :  { %v5956_v19 = vpop.f32.mrf.mxu0 }
 0x751   :  { %v7025_v24 = vpop.f32.mrf.mxu1 }
 0x752   :  { %v7027_v9 = vpop.f32.mrf.mxu0 }
 0x753   :  { %v5961_v12 = vpop.f32.mrf.mxu1 }
 0x754   :  { %v5966_v22 = vpop.f32.mrf.mxu0 }
 0x755   :  { %v7029_v17 = vpop.f32.mrf.mxu1 }
 0x756   :  { %v4177_v14 = vpop.f32.mrf.mxu0 }
 0x757   :  { %v5971_v20 = vpop.f32.mrf.mxu1  ;;  %v4727_v11 = vsel %vm649_vm2, %v4177_v14, -inf }
 0x758   :  { %4728 = vmax.xlane.f32.xlu0 %v4727_v11  ;;  %v5976_v26 = vpop.f32.mrf.mxu0 }
 0x759   :  { %v4255_v6 = vpop.f32.mrf.mxu1 }
 0x75a   :  { %v4333_v29 = vpop.f32.mrf.mxu0  ;;  %v4730_v5 = vsel %vm649_vm2, %v4255_v6, -inf }
 0x75b   :  { %4731 = vmax.xlane.f32.xlu1 %v4730_v5  ;;  %v5981_v31 = vpop.f32.mrf.mxu1  ;;  %v4733_v8 = vsel %vm649_vm2, %v4333_v29, -inf }
 0x75c   :  { %4734 = vmax.xlane.f32.xlu0 %v4733_v8  ;;  %v5986_v32 = vpop.f32.mrf.mxu0 }
 0x75d   :  { %v4411_v33 = vpop.f32.mrf.mxu1 }
 0x75e   :  { %v4489_v34 = vpop.f32.mrf.mxu0  ;;  %v4736_v35 = vsel %vm649_vm2, %v4411_v33, -inf }
 0x75f   :  { %v5991_v7 = vpop.f32.mrf.mxu1  ;;  %v4739_v36 = vsel %vm649_vm2, %v4489_v34, -inf }
 0x760   :  { %4737 = vmax.xlane.f32.xlu0 %v4736_v35  ;;  %4740 = vmax.xlane.f32.xlu1 %v4739_v36  ;;  %v5996_v37 = vpop.f32.mrf.mxu0 }
 0x761   :  { %v4567_v38 = vpop.f32.mrf.mxu1 }
 0x762   :  { %v4645_v3 = vpop.f32.mrf.mxu0  ;;  %v4742_v39 = vsel %vm649_vm2, %v4567_v38, -inf }
 0x763   :  { %v6001_v40 = vpop.f32.mrf.mxu1  ;;  %v4745_v0 = vsel %vm649_vm2, %v4645_v3, -inf }
 0x764   :  { %4743 = vmax.xlane.f32.xlu0 %v4742_v39  ;;  %4746 = vmax.xlane.f32.xlu1 %v4745_v0  ;;  %v6006_v41 = vpop.f32.mrf.mxu0 }
 0x765   :  { %v4723_v42 = vpop.f32.mrf.mxu1 }
 0x766   :  { %v4748_v43 = vsel %vm649_vm2, %v4723_v42, -inf }
 0x767   :  { %v6011_v44 = vpop.f32.mrf.mxu1 }
 0x768   :  { %4749 = vmax.xlane.f32.xlu0 %v4748_v43 }
 0x775   :  { %4815 = vrot.lane.b32.xlu1 %v6796_v50, %s6216_s0 }
 0x779   :  { %4969 = vrot.lane.b32.xlu1 %v6802_v51, %s6216_s0 }
 0x77d   :  { %5046 = vrot.lane.b32.xlu1 %v6808_v52, %s6216_s0 }
 0x77e   :  { %4892 = vrot.lane.b32.xlu0 %v6814_v53, %s6216_s0 }
 0x781   :  { %5200 = vrot.lane.b32.xlu1 %v6820_v54, %s6216_s0 }
 0x782   :  { %5123 = vrot.lane.b32.xlu0 %v6826_v55, %s6216_s0 }
 0x7e1   :  { %v4729_v45 = vpop.xlane.xlu0 %4728 }
 0x7e2   :  { %v4751_v46 = vsub.f32 %v4177_v14, %v4729_v45 }
 0x7e4   :  { %v4759_v4 = vmul.f32 1.442695, %v4751_v46  ;;  %v4732_v47 = vpop.xlane.xlu1 %4731 }
 0x7e5   :  { %v4752_v50 = vsub.f32 %v4255_v6, %v4732_v47  ;;  %v4735_v48 = vpop.xlane.xlu0 %4734 }
 0x7e6   :  { %6164 = vpow2.f32 %v4759_v4  ;;  %v4753_v51 = vsub.f32 %v4333_v29, %v4735_v48 }
 0x7e7   :  { %v4761_v1 = vmul.f32 1.442695, %v4752_v50 }
 0x7e8   :  { %v4763_v49 = vmul.f32 1.442695, %v4753_v51 }
 0x7e9   :  { %6166 = vpow2.f32 %v4761_v1  ;;  %v4738_v52 = vpop.xlane.xlu0 %4737  ;;  %v4741_v15 = vpop.xlane.xlu1 %4740 }
 0x7ea   :  { %6168 = vpow2.f32 %v4763_v49  ;;  %v4754_v53 = vsub.f32 %v4411_v33, %v4738_v52  ;;  %v4755_v59 = vsub.f32 %v4489_v34, %v4741_v15 }
 0x7ec   :  { %v4765_v54 = vmul.f32 1.442695, %v4754_v53  ;;  %v4767_v60 = vmul.f32 1.442695, %v4755_v59 }
 0x7ed   :  { %v4744_v63 = vpop.xlane.xlu0 %4743  ;;  %v4747_v55 = vpop.xlane.xlu1 %4746 }
 0x7ee   :  { %6170 = vpow2.f32 %v4765_v54  ;;  %v4756_v19 = vsub.f32 %v4567_v38, %v4744_v63  ;;  %v4757_v12 = vsub.f32 %v4645_v3, %v4747_v55 }
 0x7ef   :  { %6172 = vpow2.f32 %v4767_v60 }
 0x7f0   :  { %v4769_v22 = vmul.f32 1.442695, %v4756_v19  ;;  %v4771_v14 = vmul.f32 1.442695, %v4757_v12 }
 0x7f1   :  { %v4750_v20 = vpop.xlane.xlu0 %4749  ;;  %v4816_v11 = vpop.permute.xlu1 %4815 }
 0x7f2   :  { %6174 = vpow2.f32 %v4769_v22  ;;  %v4758_v26 = vsub.f32 %v4723_v42, %v4750_v20  ;;  %6013 = vmatpush3.msk.msra.mxu0 %vm744_vm3, %v4816_v11 }
 0x7f3   :  { %v7052_v6 = vpop.eup %6164  ;;  %6176 = vpow2.f32 %v4771_v14  ;;  %6022 = vmatprep.subr.mxu0 %v6204_v2 }
 0x7f4   :  { %v4773_v29 = vmul.f32 1.442695, %v4758_v26  ;;  %v4775_v5 = vsel %vm649_vm2, %v7052_v6, 0.0 }
 0x7f5   :  { %4776 = vadd.xlane.f32.xlu1 %v4775_v5  ;;  %v4893_v31 = vpop.permute.xlu0 %4892 }
 0x7f6   :  { %v7057_v8 = vpop.eup %6166  ;;  %6178 = vpow2.f32 %v4773_v29  ;;  %6018 = vmatpush3.msk.msra.mxu1 %vm744_vm3, %v4893_v31 }
 0x7f7   :  { %v7060_v32 = vpop.eup %6168  ;;  %v4778_v33 = vsel %vm649_vm2, %v7057_v8, 0.0  ;;  %6027 = vmatprep.subr.mxu1 %v6204_v2 }
 0x7f8   :  { %4779 = vadd.xlane.f32.xlu0 %v4778_v33  ;;  %v4781_v34 = vsel %vm649_vm2, %v7060_v32, 0.0 }
 0x7f9   :  { %4782 = vadd.xlane.f32.xlu1 %v4781_v34 }
 0x7fb   :  { %v7067_v35 = vpop.eup %6170 }
 0x7fc   :  { %v7069_v7 = vpop.eup %6172  ;;  %v4784_v36 = vsel %vm649_vm2, %v7067_v35, 0.0 }
 0x7fd   :  { %4785 = vadd.xlane.f32.xlu0 %v4784_v36  ;;  %v4787_v37 = vsel %vm649_vm2, %v7069_v7, 0.0 }
 0x7fe   :  { %4788 = vadd.xlane.f32.xlu1 %v4787_v37 }
 0x7ff   :  { %v7075_v38 = vpop.eup %6174 }
 0x800   :  { %v7077_v3 = vpop.eup %6176  ;;  %v4790_v39 = vsel %vm649_vm2, %v7075_v38, 0.0 }
 0x801   :  { %4791 = vadd.xlane.f32.xlu0 %v4790_v39  ;;  %v4793_v40 = vsel %vm649_vm2, %v7077_v3, 0.0 }
 0x802   :  { %4794 = vadd.xlane.f32.xlu1 %v4793_v40 }
 0x803   :  { %v7083_v0 = vpop.eup %6178 }
 0x804   :  { %v4796_v41 = vsel %vm649_vm2, %v7083_v0, 0.0 }
 0x805   :  { %4797 = vadd.xlane.f32.xlu0 %v4796_v41 }
 0x813   :  { %5354 = vrot.lane.b32.xlu1 %v6832_v56, %s6216_s0 }
 0x817   :  { %2703 = vrot.lane.b32.xlu1 %v6768_v13, %s6217_s6 }
 0x81b   :  { %2707 = vrot.lane.b32.xlu1 %v6772_v23, %s6217_s6  ;;  %5277 = vrot.lane.b32.xlu0 %v6838_v57, %s6216_s0  ;;  %v5124_v23 = vpop.permute.xlu0 %5123 }
 0x81f   :  { %2711 = vrot.lane.b32.xlu1 %v6776_v27, %s6217_s6  ;;  %2701 = vrot.lane.b32.xlu0 %v6766_v10, %s6217_s6  ;;  %v4970_v10 = vpop.permute.xlu1 %4969 }
 0x823   :  { %2715 = vrot.lane.b32.xlu1 %v6780_v30, %s6217_s6  ;;  %2705 = vrot.lane.b32.xlu0 %v6770_v16, %s6217_s6  ;;  %v5047_v13 = vpop.permute.xlu1 %5046 }
 0x827   :  { %4072 = vrot.lane.b32.xlu1 %v7017_v18, %s6218_s7  ;;  %2709 = vrot.lane.b32.xlu0 %v6774_v25, %s6217_s6  ;;  %v5201_v16 = vpop.permute.xlu1 %5200 }
 0x82b   :  { %4076 = vrot.lane.b32.xlu1 %v7021_v61, %s6218_s7  ;;  %2713 = vrot.lane.b32.xlu0 %v6778_v28, %s6217_s6 }
 0x82f   :  { %4080 = vrot.lane.b32.xlu1 %v7025_v24, %s6218_s7  ;;  %4070 = vrot.lane.b32.xlu0 %v7015_v58, %s6218_s7 }
 0x833   :  { %4084 = vrot.lane.b32.xlu1 %v7029_v17, %s6218_s7  ;;  %4074 = vrot.lane.b32.xlu0 %v7019_v21, %s6218_s7 }
 0x837   :  { %4078 = vrot.lane.b32.xlu0 %v7023_v62, %s6218_s7 }
 0x83b   :  { %4082 = vrot.lane.b32.xlu0 %v7027_v9, %s6218_s7 }
 0x87e   :  { %v4777_v25 = vpop.xlane.xlu1 %4776 }
 0x87f   :  { %6180 = vrcp.f32 %v4777_v25 }
 0x881   :  { %v4780_v27 = vpop.xlane.xlu0 %4779 }
 0x882   :  { %6182 = vrcp.f32 %v4780_v27  ;;  %v4783_v28 = vpop.xlane.xlu1 %4782 }
 0x883   :  { %6184 = vrcp.f32 %v4783_v28 }
 0x886   :  { %v4786_v30 = vpop.xlane.xlu0 %4785 }
 0x887   :  { %6186 = vrcp.f32 %v4786_v30  ;;  %v4789_v56 = vpop.xlane.xlu1 %4788 }
 0x888   :  { %6188 = vrcp.f32 %v4789_v56 }
 0x88a   :  { %v4792_v57 = vpop.xlane.xlu0 %4791 }
 0x88b   :  { %6190 = vrcp.f32 %v4792_v57  ;;  %v4795_v58 = vpop.xlane.xlu1 %4794 }
 0x88c   :  { %v6181_v18 = vpop.eup %6180  ;;  %6192 = vrcp.f32 %v4795_v58 }
 0x88d   :  { %v4807_v21 = vmul.f32 %v6181_v18, %v7052_v6 }
 0x88e   :  { %v4798_v61 = vpop.xlane.xlu0 %4797 }
 0x88f   :  { %v6183_v62 = vpop.eup %6182  ;;  %6194 = vrcp.f32 %v4798_v61  ;;  %v5355_v24 = vpop.permute.xlu1 %5354  ;;  %6015 = vmatmul.mubr.msk.f32.vlgmr.msra.gmra.mxu0 %vm740_vm4, %v4807_v21 }
 0x890   :  { %v6185_v9 = vpop.eup %6184  ;;  %6023 = vmatpush3.msk.msra.mxu0 %vm744_vm3, %v4970_v10  ;;  %6024 = vmatprep.mubr.msk.f32.mxu0 %vm6205_vm0, %v6204_v2  ;;  %v4808_v17 = vmul.f32 %v6183_v62, %v7057_v8 }
 0x891   :  { %6032 = vmatprep.subr.mxu0 %v6204_v2  ;;  %v4809_v42 = vmul.f32 %v6185_v9, %v7060_v32 }
 0x892   :  { %v5278_v43 = vpop.permute.xlu0 %5277  ;;  %6020 = vmatmul.mubr.msk.f32.vlgmr.msra.gmra.mxu1 %vm740_vm4, %v4808_v17 }
 0x893   :  { %v2704_v44 = vpop.permute.xlu1 %2703  ;;  %6025 = vmatmul.mubr.msk.f32.vlgmr.msra.gmra.mxu0 %vm740_vm4, %v4809_v42  ;;  %6028 = vmatpush3.msk.msra.mxu1 %vm744_vm3, %v5047_v13 }
 0x894   :  { %v6187_v45 = vpop.eup %6186  ;;  %2727 = vst.msk [vmem:[%s7242_s1 + $0x2] sm:$0x3] %vm2725_vm6, %v2704_v44  ;;  %6033 = vmatpush3.msk.msra.mxu0 %vm744_vm3, %v5124_v23  ;;  %6029 = vmatprep.mubr.msk.f32.mxu1 %vm6205_vm0, %v6204_v2 }
 0x895   :  { %v6189_v46 = vpop.eup %6188  ;;  %6034 = vmatprep.mubr.msk.f32.mxu0 %vm6205_vm0, %v6204_v2  ;;  %6037 = vmatprep.subr.mxu1 %v6204_v2  ;;  %v4810_v4 = vmul.f32 %v6187_v45, %v7067_v35 }
 0x896   :  { %v2702_v47 = vpop.permute.xlu0 %2701  ;;  %v4811_v50 = vmul.f32 %v6189_v46, %v7069_v7  ;;  %6042 = vmatprep.subr.mxu0 %v6204_v2 }
 0x897   :  { %2726 = vst.msk [vmem:[%s7242_s1] sm:$0x3] %vm2725_vm6, %v2702_v47  ;;  %v2708_v48 = vpop.permute.xlu1 %2707  ;;  %6030 = vmatmul.mubr.msk.f32.vlgmr.msra.gmra.mxu1 %vm740_vm4, %v4810_v4 }
 0x898   :  { %v6191_v51 = vpop.eup %6190  ;;  %2729 = vst.msk [vmem:[%s7242_s1 + $0x6] sm:$0x3] %vm2725_vm6, %v2708_v48  ;;  %6035 = vmatmul.mubr.msk.f32.vlgmr.msra.gmra.mxu0 %vm740_vm4, %v4811_v50  ;;  %6038 = vmatpush3.msk.msra.mxu1 %vm744_vm3, %v5201_v16 }
 0x899   :  { %v6193_v1 = vpop.eup %6192  ;;  %6039 = vmatprep.mubr.msk.f32.mxu1 %vm6205_vm0, %v6204_v2  ;;  %6043 = vmatpush3.msk.msra.mxu0 %vm744_vm3, %v5278_v43  ;;  %v4812_v49 = vmul.f32 %v6191_v51, %v7075_v38 }
 0x89a   :  { %v2706_v52 = vpop.permute.xlu0 %2705  ;;  %6044 = vmatprep.mubr.msk.f32.mxu0 %vm6205_vm0, %v6204_v2  ;;  %v4813_v15 = vmul.f32 %v6193_v1, %v7077_v3  ;;  %6047 = vmatprep.subr.mxu1 %v6204_v2 }
 0x89b   :  { %2728 = vst.msk [vmem:[%s7242_s1 + $0x4] sm:$0x3] %vm2725_vm6, %v2706_v52  ;;  %v2712_v53 = vpop.permute.xlu1 %2711  ;;  %6040 = vmatmul.mubr.msk.f32.vlgmr.msra.gmra.mxu1 %vm740_vm4, %v4812_v49 }
 0x89c   :  { %v6195_v59 = vpop.eup %6194  ;;  %2731 = vst.msk [vmem:[%s7242_s1 + $0xa] sm:$0x3] %vm2725_vm6, %v2712_v53  ;;  %6045 = vmatmul.mubr.msk.f32.vlgmr.msra.gmra.mxu0 %vm740_vm4, %v4813_v15  ;;  %6048 = vmatpush3.msk.msra.mxu1 %vm744_vm3, %v5355_v24 }
 0x89d   :  { %6049 = vmatprep.mubr.msk.f32.mxu1 %vm6205_vm0, %v6204_v2  ;;  %v4814_v54 = vmul.f32 %v6195_v59, %v7083_v0 }
 0x89e   :  { %v2710_v60 = vpop.permute.xlu0 %2709 }
 0x89f   :  { %2730 = vst.msk [vmem:[%s7242_s1 + $0x8] sm:$0x3] %vm2725_vm6, %v2710_v60  ;;  %v2716_v63 = vpop.permute.xlu1 %2715  ;;  %6050 = vmatmul.mubr.msk.f32.vlgmr.msra.gmra.mxu1 %vm740_vm4, %v4814_v54 }
 0x8a0   :  { %2733 = vst.msk [vmem:[%s7242_s1 + $0xe] sm:$0x3] %vm2725_vm6, %v2716_v63 }
 0x8a2   :  { %v2714_v55 = vpop.permute.xlu0 %2713 }
 0x8a3   :  { %2732 = vst.msk [vmem:[%s7242_s1 + $0xc] sm:$0x3] %vm2725_vm6, %v2714_v55  ;;  %v4073_v2 = vpop.permute.xlu1 %4072 }
 0x8a4   :  { %4096 = vst.msk [vmem:[%s7242_s1 + $0x2] sm:$0x3] %vm4094_vm7, %v4073_v2 }
 0x8a6   :  { %v4071_v19 = vpop.permute.xlu0 %4070 }
 0x8a7   :  { %4095 = vst.msk [vmem:[%s7242_s1] sm:$0x3] %vm4094_vm7, %v4071_v19  ;;  %v4077_v12 = vpop.permute.xlu1 %4076 }
 0x8a8   :  { %4098 = vst.msk [vmem:[%s7242_s1 + $0x6] sm:$0x3] %vm4094_vm7, %v4077_v12 }
 0x8aa   :  { %v4075_v22 = vpop.permute.xlu0 %4074 }
 0x8ab   :  { %4097 = vst.msk [vmem:[%s7242_s1 + $0x4] sm:$0x3] %vm4094_vm7, %v4075_v22  ;;  %v4081_v14 = vpop.permute.xlu1 %4080 }
 0x8ac   :  { %4100 = vst.msk [vmem:[%s7242_s1 + $0xa] sm:$0x3] %vm4094_vm7, %v4081_v14 }
 0x8ae   :  { %v4079_v20 = vpop.permute.xlu0 %4078 }
 0x8af   :  { %4099 = vst.msk [vmem:[%s7242_s1 + $0x8] sm:$0x3] %vm4094_vm7, %v4079_v20  ;;  %v4085_v11 = vpop.permute.xlu1 %4084 }
 0x8b0   :  { %4102 = vst.msk [vmem:[%s7242_s1 + $0xe] sm:$0x3] %vm4094_vm7, %v4085_v11 }
 0x8b2   :  { %v4083_v26 = vpop.permute.xlu0 %4082 }
 0x8b3   :  { %4101 = vst.msk [vmem:[%s7242_s1 + $0xc] sm:$0x3] %vm4094_vm7, %v4083_v26 }
 0x94f   :  { %v4888_v6 = vpop.f32.mrf.mxu0 }
 0x950   :  { %5439 = vrot.lane.b32.xlu0 %v4888_v6, %s6219_s10 }
 0x951   :  { %v6016_v29 = vpop.f32.mrf.mxu0 }
 0x952   :  { %v4965_v5 = vpop.f32.mrf.mxu1 }
 0x953   :  { %v5042_v31 = vpop.f32.mrf.mxu0  ;;  %5441 = vrot.lane.b32.xlu1 %v4965_v5, %s6219_s10 }
 0x954   :  { %5443 = vrot.lane.b32.xlu0 %v5042_v31, %s6219_s10  ;;  %v6021_v8 = vpop.f32.mrf.mxu1 }
 0x955   :  { %v6026_v32 = vpop.f32.mrf.mxu0 }
 0x957   :  { %v5119_v33 = vpop.f32.mrf.mxu1 }
 0x958   :  { %v5196_v34 = vpop.f32.mrf.mxu0  ;;  %5445 = vrot.lane.b32.xlu1 %v5119_v33, %s6219_s10 }
 0x959   :  { %5447 = vrot.lane.b32.xlu0 %v5196_v34, %s6219_s10  ;;  %v6031_v35 = vpop.f32.mrf.mxu1 }
 0x95a   :  { %v6036_v7 = vpop.f32.mrf.mxu0 }
 0x95b   :  { %v5273_v36 = vpop.f32.mrf.mxu1 }
 0x95c   :  { %v5350_v37 = vpop.f32.mrf.mxu0  ;;  %5449 = vrot.lane.b32.xlu1 %v5273_v36, %s6219_s10 }
 0x95d   :  { %5451 = vrot.lane.b32.xlu0 %v5350_v37, %s6219_s10  ;;  %v6041_v38 = vpop.f32.mrf.mxu1 }
 0x95e   :  { %v6046_v3 = vpop.f32.mrf.mxu0 }
 0x95f   :  { %v5427_v39 = vpop.f32.mrf.mxu1 }
 0x960   :  { %5453 = vrot.lane.b32.xlu1 %v5427_v39, %s6219_s10 }
 0x961   :  { %v6051_v40 = vpop.f32.mrf.mxu1 }
 0x9c2   :  { %v5440_v0 = vpop.permute.xlu0 %5439 }
 0x9c3   :  { %5464 = vst.msk [vmem:[%s7242_s1] sm:$0x3] %vm5463_vm8, %v5440_v0 }
 0x9c5   :  { %v5442_v41 = vpop.permute.xlu1 %5441 }
 0x9c6   :  { %5465 = vst.msk [vmem:[%s7242_s1 + $0x2] sm:$0x3] %vm5463_vm8, %v5442_v41  ;;  %v5444_v10 = vpop.permute.xlu0 %5443 }
 0x9c7   :  { %5466 = vst.msk [vmem:[%s7242_s1 + $0x4] sm:$0x3] %vm5463_vm8, %v5444_v10 }
 0x9ca   :  { %v5446_v13 = vpop.permute.xlu1 %5445 }
 0x9cb   :  { %5467 = vst.msk [vmem:[%s7242_s1 + $0x6] sm:$0x3] %vm5463_vm8, %v5446_v13  ;;  %v5448_v16 = vpop.permute.xlu0 %5447 }
 0x9cc   :  { %5468 = vst.msk [vmem:[%s7242_s1 + $0x8] sm:$0x3] %vm5463_vm8, %v5448_v16 }
 0x9ce   :  { %v5450_v23 = vpop.permute.xlu1 %5449 }
 0x9cf   :  { %5469 = vst.msk [vmem:[%s7242_s1 + $0xa] sm:$0x3] %vm5463_vm8, %v5450_v23  ;;  %v5452_v25 = vpop.permute.xlu0 %5451 }
 0x9d0   :  { %5470 = vst.msk [vmem:[%s7242_s1 + $0xc] sm:$0x3] %vm5463_vm8, %v5452_v25 }
 0x9d2   :  { %v5454_v27 = vpop.permute.xlu1 %5453 }
 0x9d3   :  { %5471 = vst.msk [vmem:[%s7242_s1 + $0xe] sm:$0x3] %vm5463_vm8, %v5454_v27 }

// kernel: transformer_encoder_forward.24
= control target key start
LH: loop header
LB: loop body
LE: loop exit
PB: predicated region body
PF: predicated region fallthrough
CT: control target
= control target key end

     0   :  { %vm29_vm0 = vcmask 261120   ;;  %vm18_vm1 = vcmask 130048   ;;  %v157_v2 = vmov 0.0   ;;  %s213_s1 = inlined_call_operand.vmem [shape: f32[32,16], index: 1, kind: input, shape index: {}]   ;;  %s214_s0 = inlined_call_operand.vmem [shape: f32[16,32], index: 0, kind: input, shape index: {}]   ;;  %s215_s2 = inlined_call_operand.vmem [shape: f32[1,16], index: 2, kind: input, shape index: {}]   ;;  %s216_s3 = inlined_call_operand.vmem [shape: f32[16,16], index: 3, kind: output, shape index: {}]  }
   0x1   :  { %v28_v0 = vld [vmem:[%s213_s1 + $0x18] sm:$0xff]  ;;  %v27_v1 = vld [vmem:[%s213_s1 + $0x10] sm:$0xff]  ;;  %20 = vst.msk [vmem:[#allocation2 + $0x8] sm:$0xff] %vm18_vm1, %v157_v2  ;;  %19 = vst.msk [vmem:[#allocation2] sm:$0xff] %vm18_vm1, %v157_v2 }
   0x2   :  { %145 = vmatprep.subr.mxu0 %v28_v0  ;;  %v23_v3 = vld [vmem:[%s214_s0] sm:$0xff]  ;;  %v26_v4 = vld [vmem:[%s213_s1 + $0x8] sm:$0xff] }
   0x3   :  { %146 = vmatpush3.msra.mxu0 %v28_v0  ;;  %153 = vmatprep.mubr.msk.f32.mxu0 %vm29_vm0, %v23_v3  ;;  %v25_v5 = vld [vmem:[%s213_s1] sm:$0xff]  ;;  %v24_v6 = vld [vmem:[%s214_s0 + $0x8] sm:$0xff] }
   0x4   :  { %147 = vmatprep.subr.mxu0 %v27_v1  ;;  %v138_v13 = vld [vmem:[%s215_s2] ss:$0 sm:$0xff] }
   0x5   :  { %148 = vmatpush3.msra.mxu0 %v27_v1 }
   0x6   :  { %149 = vmatprep.subr.mxu0 %v26_v4 }
   0x7   :  { %150 = vmatpush3.msra.mxu0 %v26_v4 }
   0x8   :  { %151 = vmatprep.subr.mxu0 %v25_v5  ;;  %v22_v7 = vld [vmem:[#allocation2 + $0x8] sm:$0xff]  ;;  %v21_v9 = vld [vmem:[#allocation2] sm:$0xff] }
   0x9   :  { %152 = vmatpush3.msra.mxu0 %v25_v5 }
   0xa   :  { %154 = vmatmul.mubr.msk.f32.vlgmr.msra.gmra.mxu0 %vm29_vm0, %v24_v6 }
  0xca   :  { %v155_v8 = vpop.f32.mrf.mxu0 }
  0xcb   :  { %v112_v10 = vadd.f32 %v155_v8, %v22_v7 }
  0xcc   :  { %v102_v11 = vpop.f32.mrf.mxu0 }
  0xcd   :  { %115 = vst.msk [vmem:[#allocation2 + $0x8] sm:$0xff] %vm18_vm1, %v112_v10  ;;  %v111_v12 = vadd.f32 %v102_v11, %v21_v9 }
  0xcf   :  { %114 = vst.msk [vmem:[#allocation2] sm:$0xff] %vm18_vm1, %v111_v12 }
  0xd4   :  { %v120_v14 = vld [vmem:[#allocation2 + $0x8] sm:$0xff] }
  0xd5   :  { %v129_v15 = vadd.f32 %v138_v13, %v120_v14 }
  0xd6   :  { %v119_v16 = vld [vmem:[#allocation2] sm:$0xff] }
  0xd7   :  { %131 = vst.msk [vmem:[%s216_s3 + $0x8] sm:$0xff] %vm18_vm1, %v129_v15  ;;  %v128_v17 = vadd.f32 %v138_v13, %v119_v16 }
  0xd9   :  { %130 = vst.msk [vmem:[%s216_s3] sm:$0xff] %vm18_vm1, %v128_v17 }

</bundles_post_ra>
